<compile_context>
chip_gen: v7x
topology: tpu7x:2x2x1
jax: 0.10.0
libtpu: 0.0.40
codegen_flags: <defaults>
</compile_context>

<pallas_src>
import math
import functools

import jax
import jax.numpy as jnp
from jax.experimental import pallas as pl
from jax.experimental.pallas import tpu as pltpu

LEAK = 0.2
LANE = 128


def _leaky(x):
    # max(x, 0.2*x) == LeakyReLU(0.2); one VALU op instead of compare+select.
    return jnp.maximum(x, LEAK * x)


# ----------------------------------------------------------------------------
# Fused kernel: mapping network + synthesis head block + 1x1 toRGB.
# TB batch samples per grid step (grid axis is "parallel" -> megacore on v7x).
# ----------------------------------------------------------------------------
def stylegan_head_kernel(z_ref, noise_ref,
                         map_w_ref, map_b_ref,
                         style_w_ref, style_b_ref,
                         b1_w_ref,
                         conv_w_ref, conv_b_ref,
                         rgb_w_ref, rgb_b_ref,
                         out_ref, pad_ref, *, H, W):
    TB = z_ref.shape[0]
    L = map_w_ref.shape[0]
    D = map_w_ref.shape[2]
    CO = rgb_w_ref.shape[1]
    HW = H * W

    # ---- Mapping network f: PixelNorm + L x (equalized Linear + LeakyReLU) ----
    w = z_ref[...].reshape(TB, D)
    w = w * jax.lax.rsqrt(jnp.mean(w * w, axis=-1, keepdims=True) + 1e-8)
    for l in range(L):                                           # static unroll
        w = jnp.dot(w.astype(jnp.bfloat16), map_w_ref[l],
                    preferred_element_type=jnp.float32) + map_b_ref[l]
        w = _leaky(w)

    # ---- Both FC_A style projections fused into one matmul: (TB,D)x(D,4D) ----
    style = jnp.dot(w.astype(jnp.bfloat16), style_w_ref[...],
                    preferred_element_type=jnp.float32) + style_b_ref[...]
    f1 = style[:, 0 * D:1 * D][:, None, :]
    s1 = style[:, 1 * D:2 * D][:, None, :]
    f2 = style[:, 2 * D:3 * D][:, None, :]
    s2 = style[:, 3 * D:4 * D][:, None, :]

    # ---- Const input (ones) + scaled noise map B1 ----
    noise = noise_ref[...]                                       # (TB, HW, 1)
    x = 1.0 + b1_w_ref[...].reshape(1, 1, D) * noise             # (TB, HW, D)

    # ---- AdaIN #1 (InstanceNorm2d: biased var over HW, eps=1e-5) + LeakyReLU ----
    mean = jnp.mean(x, axis=1, keepdims=True)
    var = jnp.mean((x - mean) ** 2, axis=1, keepdims=True)
    y = _leaky((x - mean) * jax.lax.rsqrt(var + 1e-5) * f1 + s1)  # (TB, HW, D) f32

    # ---- Equalized 3x3 conv (pad=1): bf16 zero-padded scratch + im2col,
    #      single MXU matmul with K = 9*Cin, M = TB*HW ----
    pad_ref[...] = jnp.zeros_like(pad_ref)        # re-zero each step (megacore-safe)
    pad_ref[:, 1:H + 1, 1:W + 1, :] = y.astype(jnp.bfloat16).reshape(TB, H, W, D)
    cols = jnp.concatenate(
        [pad_ref[:, dy:dy + H, dx:dx + W, :]
         for dy in range(3) for dx in range(3)], axis=-1)        # (TB, H, W, 9D) bf16
    conv = jnp.dot(cols.reshape(TB * HW, 9 * D), conv_w_ref[...],
                   preferred_element_type=jnp.float32) + conv_b_ref[...]
    conv = conv.reshape(TB, HW, D)

    # ---- AdaIN #2 + LeakyReLU ----
    mean2 = jnp.mean(conv, axis=1, keepdims=True)
    var2 = jnp.mean((conv - mean2) ** 2, axis=1, keepdims=True)
    y2 = _leaky((conv - mean2) * jax.lax.rsqrt(var2 + 1e-5) * f2 + s2)

    # ---- Equalized 1x1 conv -> lane-padded RGB (lane-dense, unmasked store) ----
    rgb = jnp.dot(y2.reshape(TB * HW, D).astype(jnp.bfloat16), rgb_w_ref[...],
                  preferred_element_type=jnp.float32) + rgb_b_ref[...]
    out_ref[...] = rgb.reshape(TB, HW, CO)


# ----------------------------------------------------------------------------
# Parameter construction (deterministic, mirrors torch init + ScaleW runtime
# scale; matmul weights pre-scaled and pre-cast to bf16).
# Fused style columns are ordered [scale1, shift1, scale2, shift2]; any torch
# checkpoint import must preserve this ordering.
# ----------------------------------------------------------------------------
def init_params(key, D, L, out_ch):
    ks = jax.random.split(key, 6)
    co_pad = max(LANE, ((out_ch + LANE - 1) // LANE) * LANE)
    p = {}
    # Mapping network: L x SLinear(D, D); torch weight (out,in)~N(0,1), bias 0,
    # ScaleW scale sqrt(2/D). Stored as (in, out), pre-scaled, bf16.
    wmap = jax.random.normal(ks[0], (L, D, D), jnp.float32)          # (L, out, in)
    p["map_w"] = (jnp.transpose(wmap, (0, 2, 1)) * math.sqrt(2.0 / D)
                  ).astype(jnp.bfloat16)
    p["map_b"] = jnp.zeros((L, 1, D), jnp.float32)
    # FC_A style transforms (both fused): SLinear(D, 2D), bias[:D]=1, bias[D:]=0.
    s_ws, s_bs = [], []
    for k in (ks[1], ks[2]):
        wfc = jax.random.normal(k, (2 * D, D), jnp.float32)          # (out, in)
        s_ws.append(wfc.T * math.sqrt(2.0 / D))
        s_bs.append(jnp.concatenate([jnp.ones((D,), jnp.float32),
                                     jnp.zeros((D,), jnp.float32)]))
    p["style_w"] = jnp.concatenate(s_ws, axis=1).astype(jnp.bfloat16)  # (D, 4D)
    p["style_b"] = jnp.concatenate(s_bs).reshape(1, 4 * D)
    # ApplyNoizeMapLayer B1: weight zeros(1, D, 1, 1); ScaleW keeps it zero.
    p["b1_w"] = jnp.zeros((1, D), jnp.float32)
    # SConv2d(D, D, 3, padding=1): weight (D, D, 3, 3) ~ N(0,1), bias 0,
    # ScaleW scale sqrt(2/(D*9)). Stored im2col-ready as (9*Cin, Cout), bf16.
    wc = jax.random.normal(ks[3], (D, D, 3, 3), jnp.float32)
    wc = jnp.transpose(wc, (2, 3, 1, 0)) * math.sqrt(2.0 / (D * 9))  # (3,3,Cin,Cout)
    p["conv_w"] = wc.reshape(9 * D, D).astype(jnp.bfloat16)
    p["conv_b"] = jnp.zeros((1, D), jnp.float32)
    # out_layers['conv_1']: SConv2d(D, out_ch, 1): scale sqrt(2/D). Output
    # channels zero-padded to co_pad so the kernel's store is lane-dense.
    wrgb = jax.random.normal(ks[4], (out_ch, D, 1, 1), jnp.float32)
    wrgb = jnp.transpose(wrgb[:, :, 0, 0], (1, 0)) * math.sqrt(2.0 / D)  # (D, out)
    p["rgb_w"] = jnp.pad(wrgb, ((0, 0), (0, co_pad - out_ch))).astype(jnp.bfloat16)
    p["rgb_b"] = jnp.zeros((1, co_pad), jnp.float32)
    return p


def _full_spec(arr):
    n = arr.ndim
    return pl.BlockSpec(arr.shape, lambda b, _n=n: (0,) * _n)


def _pick_batch_tile(B, HW, target_rows=256):
    """Largest divisor of B with TB*HW <= target_rows, keeping grid >= 2 if possible."""
    tb_cap = max(1, target_rows // HW)
    divisors = [d for d in range(1, B + 1) if B % d == 0]
    cands = [d for d in divisors if d <= tb_cap] or [1]
    tb = max(cands)
    if B // tb == 1 and B >= 2:            # keep >=2 grid steps for v7x's 2 TCs
        smaller = [d for d in cands if B // d >= 2]
        if smaller:
            tb = max(smaller)
    return tb


# ----------------------------------------------------------------------------
# Forward wrapper (progress=0 path of StyleGANGenerator.forward)
# ----------------------------------------------------------------------------
@functools.partial(jax.jit, static_argnames=("out_ch", "batch_tile"))
def stylegan_generator_forward(latent_z, noize_map_nchw, params, *,
                               out_ch=3, batch_tile=None):
    B, D = latent_z.shape
    H, W = noize_map_nchw.shape[2], noize_map_nchw.shape[3]
    HW = H * W
    co_pad = params["rgb_w"].shape[1]

    TB = batch_tile if batch_tile is not None else _pick_batch_tile(B, HW)
    assert B % TB == 0, (B, TB)

    z3 = latent_z.reshape(B, 1, D)
    noise_flat = noize_map_nchw.reshape(B, HW, 1)                    # NCHW(1ch) -> (B,HW,1)

    ordered = (params["map_w"], params["map_b"], params["style_w"],
               params["style_b"], params["b1_w"], params["conv_w"],
               params["conv_b"], params["rgb_w"], params["rgb_b"])

    # --- explicit VMEM accounting (params resident, per-step blocks x2 bufs,
    #     scratch, cols / f32 activation temporaries), capped per-core capacity.
    param_bytes = 2 * sum(a.size * a.dtype.itemsize for a in ordered)
    block_bytes = 2 * (TB * D * 4 + TB * HW * 4 + TB * HW * co_pad * 4)
    scratch_bytes = TB * (H + 2) * (W + 2) * D * 2                   # bf16 pad scratch
    temp_bytes = TB * HW * 9 * D * 2 * 2 + 4 * TB * HW * D * 4       # cols + f32 acts
    vmem_bytes = param_bytes + block_bytes + scratch_bytes + temp_bytes
    try:
        vmem_cap = int(pltpu.get_tpu_info().vmem_capacity_bytes)     # 64 MiB/TC on v7x
    except Exception:
        vmem_cap = 64 << 20
    vmem_limit = int(min(max(int(1.5 * vmem_bytes), 8 << 20), int(0.85 * vmem_cap)))

    grid_spec = pltpu.PrefetchScalarGridSpec(
        num_scalar_prefetch=0,
        grid=(B // TB,),
        in_specs=[pl.BlockSpec((TB, 1, D), lambda b: (b, 0, 0)),      # latent_z
                  pl.BlockSpec((TB, HW, 1), lambda b: (b, 0, 0))]     # noise
                 + [_full_spec(a) for a in ordered],                  # params (resident)
        out_specs=pl.BlockSpec((TB, HW, co_pad), lambda b: (b, 0, 0)),
        scratch_shapes=[pltpu.VMEM((TB, H + 2, W + 2, D), jnp.bfloat16)],
    )

    out_flat = pl.pallas_call(
        functools.partial(stylegan_head_kernel, H=H, W=W),
        out_shape=jax.ShapeDtypeStruct((B, HW, co_pad), jnp.float32),
        grid_spec=grid_spec,
        compiler_params=pltpu.CompilerParams(
            dimension_semantics=("parallel",),
            vmem_limit_bytes=vmem_limit),
    )(z3, noise_flat, *ordered)

    rgb = out_flat[..., :out_ch].reshape(B, H, W, out_ch)             # drop lane pad
    return jnp.transpose(rgb, (0, 3, 1, 2))                           # NHWC -> NCHW


if __name__ == "__main__":
    # Small shapes (module defaults use D=512; D=128 here keeps the demo tiny).
    B, D, H, W, L, OUT = 8, 128, 4, 4, 8, 3
    key = jax.random.PRNGKey(0)
    k_param, k_z, k_n = jax.random.split(key, 3)

    params = init_params(k_param, D, L, OUT)
    latent_z = jax.random.normal(k_z, (B, D), jnp.float32)
    # noize_map_list[0] for the 4x4 head block, PyTorch NCHW layout (B, 1, H, W)
    noize_map = jax.random.normal(k_n, (B, 1, H, W), jnp.float32)

    out = stylegan_generator_forward(latent_z, noize_map, params, out_ch=OUT)
    jax.block_until_ready(out)
    assert out.shape == (B, OUT, H, W), out.shape
    assert out.dtype == jnp.float32
    print("KERNEL_OK")
</pallas_src>

<mosaic_0001>
module attributes {stable_mosaic.version = 11 : i64} {
  func.func @stylegan_head_kernel(%arg0: i32, %arg1: memref<4x1x128xf32, #tpu.memory_space<vmem>>, %arg2: memref<4x16x1xf32, #tpu.memory_space<vmem>>, %arg3: memref<8x128x128xbf16, #tpu.memory_space<vmem>>, %arg4: memref<8x1x128xf32, #tpu.memory_space<vmem>>, %arg5: memref<128x512xbf16, #tpu.memory_space<vmem>>, %arg6: memref<1x512xf32, #tpu.memory_space<vmem>>, %arg7: memref<1x128xf32, #tpu.memory_space<vmem>>, %arg8: memref<1152x128xbf16, #tpu.memory_space<vmem>>, %arg9: memref<1x128xf32, #tpu.memory_space<vmem>>, %arg10: memref<128x128xbf16, #tpu.memory_space<vmem>>, %arg11: memref<1x128xf32, #tpu.memory_space<vmem>>, %arg12: memref<4x16x128xf32, #tpu.memory_space<vmem>>, %arg13: memref<4x6x6x128xbf16, #tpu.memory_space<vmem>>) attributes {dimension_semantics = [#tpu.dimension_semantics<parallel>], iteration_bounds = array<i64: 2>, scalar_prefetch = 0 : i64, scratch_operands = 1 : i64, tpu.core_type = #tpu.core_type<tc>, window_params = [{transform_indices = @transform_0, window_bounds = array<i64: 4, 1, 128>}, {transform_indices = @transform_1, window_bounds = array<i64: 4, 16, 1>}, {pipeline_mode = #tpu.pipeline_mode<synchronous>, transform_indices = @transform_2, window_bounds = array<i64: 8, 128, 128>}, {pipeline_mode = #tpu.pipeline_mode<synchronous>, transform_indices = @transform_3, window_bounds = array<i64: 8, 1, 128>}, {pipeline_mode = #tpu.pipeline_mode<synchronous>, transform_indices = @transform_4, window_bounds = array<i64: 128, 512>}, {pipeline_mode = #tpu.pipeline_mode<synchronous>, transform_indices = @transform_5, window_bounds = array<i64: 1, 512>}, {pipeline_mode = #tpu.pipeline_mode<synchronous>, transform_indices = @transform_6, window_bounds = array<i64: 1, 128>}, {pipeline_mode = #tpu.pipeline_mode<synchronous>, transform_indices = @transform_7, window_bounds = array<i64: 1152, 128>}, {pipeline_mode = #tpu.pipeline_mode<synchronous>, transform_indices = @transform_8, window_bounds = array<i64: 1, 128>}, {pipeline_mode = #tpu.pipeline_mode<synchronous>, transform_indices = @transform_9, window_bounds = array<i64: 128, 128>}, {pipeline_mode = #tpu.pipeline_mode<synchronous>, transform_indices = @transform_10, window_bounds = array<i64: 1, 128>}, {transform_indices = @transform_11, window_bounds = array<i64: 4, 16, 128>}]} {
    %c0 = arith.constant 0 : index
    %c0_0 = arith.constant 0 : index
    %c0_1 = arith.constant 0 : index
    %0 = vector.load %arg1[%c0, %c0_0, %c0_1] : memref<4x1x128xf32, #tpu.memory_space<vmem>>, vector<4x1x128xf32>
    %1 = vector.shape_cast %0 : vector<4x1x128xf32> to vector<4x128xf32>
    %2 = arith.mulf %1, %1 : vector<4x128xf32>
    %cst = arith.constant dense<0.000000e+00> : vector<4xf32>
    %3 = vector.multi_reduction <add>, %2, %cst [1] : vector<4x128xf32> to vector<4xf32>
    %4 = vector.shape_cast %3 : vector<4xf32> to vector<4x1xf32>
    %cst_2 = arith.constant 1.280000e+02 : f32
    %5 = vector.broadcast %cst_2 : f32 to vector<4x1xf32>
    %6 = arith.divf %4, %5 : vector<4x1xf32>
    %cst_3 = arith.constant 9.99999993E-9 : f32
    %7 = vector.broadcast %cst_3 : f32 to vector<4x1xf32>
    %8 = arith.addf %6, %7 : vector<4x1xf32>
    %9 = math.rsqrt %8 : vector<4x1xf32>
    %10 = vector.broadcast %9 : vector<4x1xf32> to vector<4x128xf32>
    %11 = arith.mulf %1, %10 : vector<4x128xf32>
    %12 = arith.truncf %11 : vector<4x128xf32> to vector<4x128xbf16>
    %c0_4 = arith.constant 0 : index
    %c0_5 = arith.constant 0 : index
    %c0_6 = arith.constant 0 : index
    %13 = vector.load %arg3[%c0_4, %c0_5, %c0_6] : memref<8x128x128xbf16, #tpu.memory_space<vmem>>, vector<1x128x128xbf16>
    %14 = vector.shape_cast %13 : vector<1x128x128xbf16> to vector<128x128xbf16>
    %cst_7 = arith.constant dense<0.000000e+00> : vector<4x128xf32>
    %15 = tpu.matmul %12, %14, %cst_7 {dimension_numbers = #tpu.dot_dimension_numbers<[1], [0], [0], [1], [0, 0, 1, 1], [], []>} : vector<4x128xbf16>, vector<128x128xbf16>, vector<4x128xf32> -> vector<4x128xf32>
    %c0_8 = arith.constant 0 : index
    %c0_9 = arith.constant 0 : index
    %c0_10 = arith.constant 0 : index
    %16 = vector.load %arg4[%c0_8, %c0_9, %c0_10] : memref<8x1x128xf32, #tpu.memory_space<vmem>>, vector<1x1x128xf32>
    %17 = vector.shape_cast %16 : vector<1x1x128xf32> to vector<1x128xf32>
    %18 = vector.broadcast %17 : vector<1x128xf32> to vector<4x128xf32>
    %19 = arith.addf %15, %18 : vector<4x128xf32>
    %cst_11 = arith.constant 2.000000e-01 : f32
    %20 = vector.broadcast %cst_11 : f32 to vector<4x128xf32>
    %21 = arith.mulf %20, %19 : vector<4x128xf32>
    %22 = arith.maximumf %19, %21 : vector<4x128xf32>
    %23 = arith.truncf %22 : vector<4x128xf32> to vector<4x128xbf16>
    %c1 = arith.constant 1 : index
    %c0_12 = arith.constant 0 : index
    %c0_13 = arith.constant 0 : index
    %24 = vector.load %arg3[%c1, %c0_12, %c0_13] : memref<8x128x128xbf16, #tpu.memory_space<vmem>>, vector<1x128x128xbf16>
    %25 = vector.shape_cast %24 : vector<1x128x128xbf16> to vector<128x128xbf16>
    %cst_14 = arith.constant dense<0.000000e+00> : vector<4x128xf32>
    %26 = tpu.matmul %23, %25, %cst_14 {dimension_numbers = #tpu.dot_dimension_numbers<[1], [0], [0], [1], [0, 0, 1, 1], [], []>} : vector<4x128xbf16>, vector<128x128xbf16>, vector<4x128xf32> -> vector<4x128xf32>
    %c1_15 = arith.constant 1 : index
    %c0_16 = arith.constant 0 : index
    %c0_17 = arith.constant 0 : index
    %27 = vector.load %arg4[%c1_15, %c0_16, %c0_17] : memref<8x1x128xf32, #tpu.memory_space<vmem>>, vector<1x1x128xf32>
    %28 = vector.shape_cast %27 : vector<1x1x128xf32> to vector<1x128xf32>
    %29 = vector.broadcast %28 : vector<1x128xf32> to vector<4x128xf32>
    %30 = arith.addf %26, %29 : vector<4x128xf32>
    %cst_18 = arith.constant 2.000000e-01 : f32
    %31 = vector.broadcast %cst_18 : f32 to vector<4x128xf32>
    %32 = arith.mulf %31, %30 : vector<4x128xf32>
    %33 = arith.maximumf %30, %32 : vector<4x128xf32>
    %34 = arith.truncf %33 : vector<4x128xf32> to vector<4x128xbf16>
    %c2 = arith.constant 2 : index
    %c0_19 = arith.constant 0 : index
    %c0_20 = arith.constant 0 : index
    %35 = vector.load %arg3[%c2, %c0_19, %c0_20] : memref<8x128x128xbf16, #tpu.memory_space<vmem>>, vector<1x128x128xbf16>
    %36 = vector.shape_cast %35 : vector<1x128x128xbf16> to vector<128x128xbf16>
    %cst_21 = arith.constant dense<0.000000e+00> : vector<4x128xf32>
    %37 = tpu.matmul %34, %36, %cst_21 {dimension_numbers = #tpu.dot_dimension_numbers<[1], [0], [0], [1], [0, 0, 1, 1], [], []>} : vector<4x128xbf16>, vector<128x128xbf16>, vector<4x128xf32> -> vector<4x128xf32>
    %c2_22 = arith.constant 2 : index
    %c0_23 = arith.constant 0 : index
    %c0_24 = arith.constant 0 : index
    %38 = vector.load %arg4[%c2_22, %c0_23, %c0_24] : memref<8x1x128xf32, #tpu.memory_space<vmem>>, vector<1x1x128xf32>
    %39 = vector.shape_cast %38 : vector<1x1x128xf32> to vector<1x128xf32>
    %40 = vector.broadcast %39 : vector<1x128xf32> to vector<4x128xf32>
    %41 = arith.addf %37, %40 : vector<4x128xf32>
    %cst_25 = arith.constant 2.000000e-01 : f32
    %42 = vector.broadcast %cst_25 : f32 to vector<4x128xf32>
    %43 = arith.mulf %42, %41 : vector<4x128xf32>
    %44 = arith.maximumf %41, %43 : vector<4x128xf32>
    %45 = arith.truncf %44 : vector<4x128xf32> to vector<4x128xbf16>
    %c3 = arith.constant 3 : index
    %c0_26 = arith.constant 0 : index
    %c0_27 = arith.constant 0 : index
    %46 = vector.load %arg3[%c3, %c0_26, %c0_27] : memref<8x128x128xbf16, #tpu.memory_space<vmem>>, vector<1x128x128xbf16>
    %47 = vector.shape_cast %46 : vector<1x128x128xbf16> to vector<128x128xbf16>
    %cst_28 = arith.constant dense<0.000000e+00> : vector<4x128xf32>
    %48 = tpu.matmul %45, %47, %cst_28 {dimension_numbers = #tpu.dot_dimension_numbers<[1], [0], [0], [1], [0, 0, 1, 1], [], []>} : vector<4x128xbf16>, vector<128x128xbf16>, vector<4x128xf32> -> vector<4x128xf32>
    %c3_29 = arith.constant 3 : index
    %c0_30 = arith.constant 0 : index
    %c0_31 = arith.constant 0 : index
    %49 = vector.load %arg4[%c3_29, %c0_30, %c0_31] : memref<8x1x128xf32, #tpu.memory_space<vmem>>, vector<1x1x128xf32>
    %50 = vector.shape_cast %49 : vector<1x1x128xf32> to vector<1x128xf32>
    %51 = vector.broadcast %50 : vector<1x128xf32> to vector<4x128xf32>
    %52 = arith.addf %48, %51 : vector<4x128xf32>
    %cst_32 = arith.constant 2.000000e-01 : f32
    %53 = vector.broadcast %cst_32 : f32 to vector<4x128xf32>
    %54 = arith.mulf %53, %52 : vector<4x128xf32>
    %55 = arith.maximumf %52, %54 : vector<4x128xf32>
    %56 = arith.truncf %55 : vector<4x128xf32> to vector<4x128xbf16>
    %c4 = arith.constant 4 : index
    %c0_33 = arith.constant 0 : index
    %c0_34 = arith.constant 0 : index
    %57 = vector.load %arg3[%c4, %c0_33, %c0_34] : memref<8x128x128xbf16, #tpu.memory_space<vmem>>, vector<1x128x128xbf16>
    %58 = vector.shape_cast %57 : vector<1x128x128xbf16> to vector<128x128xbf16>
    %cst_35 = arith.constant dense<0.000000e+00> : vector<4x128xf32>
    %59 = tpu.matmul %56, %58, %cst_35 {dimension_numbers = #tpu.dot_dimension_numbers<[1], [0], [0], [1], [0, 0, 1, 1], [], []>} : vector<4x128xbf16>, vector<128x128xbf16>, vector<4x128xf32> -> vector<4x128xf32>
    %c4_36 = arith.constant 4 : index
    %c0_37 = arith.constant 0 : index
    %c0_38 = arith.constant 0 : index
    %60 = vector.load %arg4[%c4_36, %c0_37, %c0_38] : memref<8x1x128xf32, #tpu.memory_space<vmem>>, vector<1x1x128xf32>
    %61 = vector.shape_cast %60 : vector<1x1x128xf32> to vector<1x128xf32>
    %62 = vector.broadcast %61 : vector<1x128xf32> to vector<4x128xf32>
    %63 = arith.addf %59, %62 : vector<4x128xf32>
    %cst_39 = arith.constant 2.000000e-01 : f32
    %64 = vector.broadcast %cst_39 : f32 to vector<4x128xf32>
    %65 = arith.mulf %64, %63 : vector<4x128xf32>
    %66 = arith.maximumf %63, %65 : vector<4x128xf32>
    %67 = arith.truncf %66 : vector<4x128xf32> to vector<4x128xbf16>
    %c5 = arith.constant 5 : index
    %c0_40 = arith.constant 0 : index
    %c0_41 = arith.constant 0 : index
    %68 = vector.load %arg3[%c5, %c0_40, %c0_41] : memref<8x128x128xbf16, #tpu.memory_space<vmem>>, vector<1x128x128xbf16>
    %69 = vector.shape_cast %68 : vector<1x128x128xbf16> to vector<128x128xbf16>
    %cst_42 = arith.constant dense<0.000000e+00> : vector<4x128xf32>
    %70 = tpu.matmul %67, %69, %cst_42 {dimension_numbers = #tpu.dot_dimension_numbers<[1], [0], [0], [1], [0, 0, 1, 1], [], []>} : vector<4x128xbf16>, vector<128x128xbf16>, vector<4x128xf32> -> vector<4x128xf32>
    %c5_43 = arith.constant 5 : index
    %c0_44 = arith.constant 0 : index
    %c0_45 = arith.constant 0 : index
    %71 = vector.load %arg4[%c5_43, %c0_44, %c0_45] : memref<8x1x128xf32, #tpu.memory_space<vmem>>, vector<1x1x128xf32>
    %72 = vector.shape_cast %71 : vector<1x1x128xf32> to vector<1x128xf32>
    %73 = vector.broadcast %72 : vector<1x128xf32> to vector<4x128xf32>
    %74 = arith.addf %70, %73 : vector<4x128xf32>
    %cst_46 = arith.constant 2.000000e-01 : f32
    %75 = vector.broadcast %cst_46 : f32 to vector<4x128xf32>
    %76 = arith.mulf %75, %74 : vector<4x128xf32>
    %77 = arith.maximumf %74, %76 : vector<4x128xf32>
    %78 = arith.truncf %77 : vector<4x128xf32> to vector<4x128xbf16>
    %c6 = arith.constant 6 : index
    %c0_47 = arith.constant 0 : index
    %c0_48 = arith.constant 0 : index
    %79 = vector.load %arg3[%c6, %c0_47, %c0_48] : memref<8x128x128xbf16, #tpu.memory_space<vmem>>, vector<1x128x128xbf16>
    %80 = vector.shape_cast %79 : vector<1x128x128xbf16> to vector<128x128xbf16>
    %cst_49 = arith.constant dense<0.000000e+00> : vector<4x128xf32>
    %81 = tpu.matmul %78, %80, %cst_49 {dimension_numbers = #tpu.dot_dimension_numbers<[1], [0], [0], [1], [0, 0, 1, 1], [], []>} : vector<4x128xbf16>, vector<128x128xbf16>, vector<4x128xf32> -> vector<4x128xf32>
    %c6_50 = arith.constant 6 : index
    %c0_51 = arith.constant 0 : index
    %c0_52 = arith.constant 0 : index
    %82 = vector.load %arg4[%c6_50, %c0_51, %c0_52] : memref<8x1x128xf32, #tpu.memory_space<vmem>>, vector<1x1x128xf32>
    %83 = vector.shape_cast %82 : vector<1x1x128xf32> to vector<1x128xf32>
    %84 = vector.broadcast %83 : vector<1x128xf32> to vector<4x128xf32>
    %85 = arith.addf %81, %84 : vector<4x128xf32>
    %cst_53 = arith.constant 2.000000e-01 : f32
    %86 = vector.broadcast %cst_53 : f32 to vector<4x128xf32>
    %87 = arith.mulf %86, %85 : vector<4x128xf32>
    %88 = arith.maximumf %85, %87 : vector<4x128xf32>
    %89 = arith.truncf %88 : vector<4x128xf32> to vector<4x128xbf16>
    %c7 = arith.constant 7 : index
    %c0_54 = arith.constant 0 : index
    %c0_55 = arith.constant 0 : index
    %90 = vector.load %arg3[%c7, %c0_54, %c0_55] : memref<8x128x128xbf16, #tpu.memory_space<vmem>>, vector<1x128x128xbf16>
    %91 = vector.shape_cast %90 : vector<1x128x128xbf16> to vector<128x128xbf16>
    %cst_56 = arith.constant dense<0.000000e+00> : vector<4x128xf32>
    %92 = tpu.matmul %89, %91, %cst_56 {dimension_numbers = #tpu.dot_dimension_numbers<[1], [0], [0], [1], [0, 0, 1, 1], [], []>} : vector<4x128xbf16>, vector<128x128xbf16>, vector<4x128xf32> -> vector<4x128xf32>
    %c7_57 = arith.constant 7 : index
    %c0_58 = arith.constant 0 : index
    %c0_59 = arith.constant 0 : index
    %93 = vector.load %arg4[%c7_57, %c0_58, %c0_59] : memref<8x1x128xf32, #tpu.memory_space<vmem>>, vector<1x1x128xf32>
    %94 = vector.shape_cast %93 : vector<1x1x128xf32> to vector<1x128xf32>
    %95 = vector.broadcast %94 : vector<1x128xf32> to vector<4x128xf32>
    %96 = arith.addf %92, %95 : vector<4x128xf32>
    %cst_60 = arith.constant 2.000000e-01 : f32
    %97 = vector.broadcast %cst_60 : f32 to vector<4x128xf32>
    %98 = arith.mulf %97, %96 : vector<4x128xf32>
    %99 = arith.maximumf %96, %98 : vector<4x128xf32>
    %100 = arith.truncf %99 : vector<4x128xf32> to vector<4x128xbf16>
    %c0_61 = arith.constant 0 : index
    %c0_62 = arith.constant 0 : index
    %101 = vector.load %arg5[%c0_61, %c0_62] : memref<128x512xbf16, #tpu.memory_space<vmem>>, vector<128x512xbf16>
    %cst_63 = arith.constant dense<0.000000e+00> : vector<4x512xf32>
    %102 = tpu.matmul %100, %101, %cst_63 {dimension_numbers = #tpu.dot_dimension_numbers<[1], [0], [0], [1], [0, 0, 1, 1], [], []>} : vector<4x128xbf16>, vector<128x512xbf16>, vector<4x512xf32> -> vector<4x512xf32>
    %c0_64 = arith.constant 0 : index
    %c0_65 = arith.constant 0 : index
    %103 = vector.load %arg6[%c0_64, %c0_65] : memref<1x512xf32, #tpu.memory_space<vmem>>, vector<1x512xf32>
    %104 = vector.broadcast %103 : vector<1x512xf32> to vector<4x512xf32>
    %105 = arith.addf %102, %104 : vector<4x512xf32>
    %106 = vector.extract_strided_slice %105 {offsets = [0, 0], sizes = [4, 128], strides = [1, 1]} : vector<4x512xf32> to vector<4x128xf32>
    %107 = vector.shape_cast %106 : vector<4x128xf32> to vector<4x1x128xf32>
    %108 = vector.extract_strided_slice %105 {offsets = [0, 128], sizes = [4, 128], strides = [1, 1]} : vector<4x512xf32> to vector<4x128xf32>
    %109 = vector.shape_cast %108 : vector<4x128xf32> to vector<4x1x128xf32>
    %110 = vector.extract_strided_slice %105 {offsets = [0, 256], sizes = [4, 128], strides = [1, 1]} : vector<4x512xf32> to vector<4x128xf32>
    %111 = vector.shape_cast %110 : vector<4x128xf32> to vector<4x1x128xf32>
    %112 = vector.extract_strided_slice %105 {offsets = [0, 384], sizes = [4, 128], strides = [1, 1]} : vector<4x512xf32> to vector<4x128xf32>
    %113 = vector.shape_cast %112 : vector<4x128xf32> to vector<4x1x128xf32>
    %c0_66 = arith.constant 0 : index
    %c0_67 = arith.constant 0 : index
    %c0_68 = arith.constant 0 : index
    %114 = vector.load %arg2[%c0_66, %c0_67, %c0_68] : memref<4x16x1xf32, #tpu.memory_space<vmem>>, vector<4x16x1xf32>
    %c0_69 = arith.constant 0 : index
    %c0_70 = arith.constant 0 : index
    %115 = vector.load %arg7[%c0_69, %c0_70] : memref<1x128xf32, #tpu.memory_space<vmem>>, vector<1x128xf32>
    %116 = vector.shape_cast %115 : vector<1x128xf32> to vector<1x1x128xf32>
    %117 = vector.broadcast %116 : vector<1x1x128xf32> to vector<4x16x128xf32>
    %118 = vector.broadcast %114 : vector<4x16x1xf32> to vector<4x16x128xf32>
    %119 = arith.mulf %117, %118 : vector<4x16x128xf32>
    %cst_71 = arith.constant 1.000000e+00 : f32
    %120 = vector.broadcast %cst_71 : f32 to vector<4x16x128xf32>
    %121 = arith.addf %120, %119 : vector<4x16x128xf32>
    %cst_72 = arith.constant dense<0.000000e+00> : vector<4x128xf32>
    %122 = vector.multi_reduction <add>, %121, %cst_72 [1] : vector<4x16x128xf32> to vector<4x128xf32>
    %123 = vector.shape_cast %122 : vector<4x128xf32> to vector<4x1x128xf32>
    %cst_73 = arith.constant 1.600000e+01 : f32
    %124 = vector.broadcast %cst_73 : f32 to vector<4x1x128xf32>
    %125 = arith.divf %123, %124 : vector<4x1x128xf32>
    %126 = vector.broadcast %125 : vector<4x1x128xf32> to vector<4x16x128xf32>
    %127 = arith.subf %121, %126 : vector<4x16x128xf32>
    %128 = arith.mulf %127, %127 : vector<4x16x128xf32>
    %cst_74 = arith.constant dense<0.000000e+00> : vector<4x128xf32>
    %129 = vector.multi_reduction <add>, %128, %cst_74 [1] : vector<4x16x128xf32> to vector<4x128xf32>
    %130 = vector.shape_cast %129 : vector<4x128xf32> to vector<4x1x128xf32>
    %cst_75 = arith.constant 1.600000e+01 : f32
    %131 = vector.broadcast %cst_75 : f32 to vector<4x1x128xf32>
    %132 = arith.divf %130, %131 : vector<4x1x128xf32>
    %133 = vector.broadcast %125 : vector<4x1x128xf32> to vector<4x16x128xf32>
    %134 = arith.subf %121, %133 : vector<4x16x128xf32>
    %cst_76 = arith.constant 9.99999974E-6 : f32
    %135 = vector.broadcast %cst_76 : f32 to vector<4x1x128xf32>
    %136 = arith.addf %132, %135 : vector<4x1x128xf32>
    %137 = math.rsqrt %136 : vector<4x1x128xf32>
    %138 = vector.broadcast %137 : vector<4x1x128xf32> to vector<4x16x128xf32>
    %139 = arith.mulf %134, %138 : vector<4x16x128xf32>
    %140 = vector.broadcast %107 : vector<4x1x128xf32> to vector<4x16x128xf32>
    %141 = arith.mulf %139, %140 : vector<4x16x128xf32>
    %142 = vector.broadcast %109 : vector<4x1x128xf32> to vector<4x16x128xf32>
    %143 = arith.addf %141, %142 : vector<4x16x128xf32>
    %cst_77 = arith.constant 2.000000e-01 : f32
    %144 = vector.broadcast %cst_77 : f32 to vector<4x16x128xf32>
    %145 = arith.mulf %144, %143 : vector<4x16x128xf32>
    %146 = arith.maximumf %143, %145 : vector<4x16x128xf32>
    %cst_78 = arith.constant 0.000000e+00 : bf16
    %147 = vector.broadcast %cst_78 : bf16 to vector<4x6x6x128xbf16>
    %c0_79 = arith.constant 0 : index
    %c0_80 = arith.constant 0 : index
    %c0_81 = arith.constant 0 : index
    %c0_82 = arith.constant 0 : index
    %148 = vector.load %arg13[%c0_79, %c0_80, %c0_81, %c0_82] : memref<4x6x6x128xbf16, #tpu.memory_space<vmem>>, vector<4x6x6x128xbf16>
    tpu.vector_store %arg13[%c0_79, %c0_80, %c0_81, %c0_82], %147 {strides = array<i32>} : memref<4x6x6x128xbf16, #tpu.memory_space<vmem>>, vector<4x6x6x128xbf16>,
    %149 = arith.truncf %146 : vector<4x16x128xf32> to vector<4x16x128xbf16>
    %150 = vector.shape_cast %149 : vector<4x16x128xbf16> to vector<4x4x4x128xbf16>
    %c0_83 = arith.constant 0 : index
    %c1_84 = arith.constant 1 : index
    %c1_85 = arith.constant 1 : index
    %c0_86 = arith.constant 0 : index
    %151 = vector.load %arg13[%c0_83, %c1_84, %c1_85, %c0_86] : memref<4x6x6x128xbf16, #tpu.memory_space<vmem>>, vector<4x4x4x128xbf16>
    tpu.vector_store %arg13[%c0_83, %c1_84, %c1_85, %c0_86], %150 {strides = array<i32>} : memref<4x6x6x128xbf16, #tpu.memory_space<vmem>>, vector<4x4x4x128xbf16>,
    %c0_87 = arith.constant 0 : index
    %c0_88 = arith.constant 0 : index
    %c0_89 = arith.constant 0 : index
    %c0_90 = arith.constant 0 : index
    %152 = vector.load %arg13[%c0_87, %c0_88, %c0_89, %c0_90] : memref<4x6x6x128xbf16, #tpu.memory_space<vmem>>, vector<4x4x4x128xbf16>
    %c0_91 = arith.constant 0 : index
    %c0_92 = arith.constant 0 : index
    %c1_93 = arith.constant 1 : index
    %c0_94 = arith.constant 0 : index
    %153 = vector.load %arg13[%c0_91, %c0_92, %c1_93, %c0_94] : memref<4x6x6x128xbf16, #tpu.memory_space<vmem>>, vector<4x4x4x128xbf16>
    %c0_95 = arith.constant 0 : index
    %c0_96 = arith.constant 0 : index
    %c2_97 = arith.constant 2 : index
    %c0_98 = arith.constant 0 : index
    %154 = vector.load %arg13[%c0_95, %c0_96, %c2_97, %c0_98] : memref<4x6x6x128xbf16, #tpu.memory_space<vmem>>, vector<4x4x4x128xbf16>
    %c0_99 = arith.constant 0 : index
    %c1_100 = arith.constant 1 : index
    %c0_101 = arith.constant 0 : index
    %c0_102 = arith.constant 0 : index
    %155 = vector.load %arg13[%c0_99, %c1_100, %c0_101, %c0_102] : memref<4x6x6x128xbf16, #tpu.memory_space<vmem>>, vector<4x4x4x128xbf16>
    %c0_103 = arith.constant 0 : index
    %c1_104 = arith.constant 1 : index
    %c1_105 = arith.constant 1 : index
    %c0_106 = arith.constant 0 : index
    %156 = vector.load %arg13[%c0_103, %c1_104, %c1_105, %c0_106] : memref<4x6x6x128xbf16, #tpu.memory_space<vmem>>, vector<4x4x4x128xbf16>
    %c0_107 = arith.constant 0 : index
    %c1_108 = arith.constant 1 : index
    %c2_109 = arith.constant 2 : index
    %c0_110 = arith.constant 0 : index
    %157 = vector.load %arg13[%c0_107, %c1_108, %c2_109, %c0_110] : memref<4x6x6x128xbf16, #tpu.memory_space<vmem>>, vector<4x4x4x128xbf16>
    %c0_111 = arith.constant 0 : index
    %c2_112 = arith.constant 2 : index
    %c0_113 = arith.constant 0 : index
    %c0_114 = arith.constant 0 : index
    %158 = vector.load %arg13[%c0_111, %c2_112, %c0_113, %c0_114] : memref<4x6x6x128xbf16, #tpu.memory_space<vmem>>, vector<4x4x4x128xbf16>
    %c0_115 = arith.constant 0 : index
    %c2_116 = arith.constant 2 : index
    %c1_117 = arith.constant 1 : index
    %c0_118 = arith.constant 0 : index
    %159 = vector.load %arg13[%c0_115, %c2_116, %c1_117, %c0_118] : memref<4x6x6x128xbf16, #tpu.memory_space<vmem>>, vector<4x4x4x128xbf16>
    %c0_119 = arith.constant 0 : index
    %c2_120 = arith.constant 2 : index
    %c2_121 = arith.constant 2 : index
    %c0_122 = arith.constant 0 : index
    %160 = vector.load %arg13[%c0_119, %c2_120, %c2_121, %c0_122] : memref<4x6x6x128xbf16, #tpu.memory_space<vmem>>, vector<4x4x4x128xbf16>
    %161 = tpu.concatenate %152, %153, %154, %155, %156, %157, %158, %159, %160 in 3 : vector<4x4x4x128xbf16>, vector<4x4x4x128xbf16>, vector<4x4x4x128xbf16>, vector<4x4x4x128xbf16>, vector<4x4x4x128xbf16>, vector<4x4x4x128xbf16>, vector<4x4x4x128xbf16>, vector<4x4x4x128xbf16>, vector<4x4x4x128xbf16> -> vector<4x4x4x1152xbf16>
    %162 = vector.shape_cast %161 : vector<4x4x4x1152xbf16> to vector<64x1152xbf16>
    %c0_123 = arith.constant 0 : index
    %c0_124 = arith.constant 0 : index
    %163 = vector.load %arg8[%c0_123, %c0_124] : memref<1152x128xbf16, #tpu.memory_space<vmem>>, vector<1152x128xbf16>
    %cst_125 = arith.constant dense<0.000000e+00> : vector<64x128xf32>
    %164 = tpu.matmul %162, %163, %cst_125 {dimension_numbers = #tpu.dot_dimension_numbers<[1], [0], [0], [1], [0, 0, 1, 1], [], []>} : vector<64x1152xbf16>, vector<1152x128xbf16>, vector<64x128xf32> -> vector<64x128xf32>
    %c0_126 = arith.constant 0 : index
    %c0_127 = arith.constant 0 : index
    %165 = vector.load %arg9[%c0_126, %c0_127] : memref<1x128xf32, #tpu.memory_space<vmem>>, vector<1x128xf32>
    %166 = vector.broadcast %165 : vector<1x128xf32> to vector<64x128xf32>
    %167 = arith.addf %164, %166 : vector<64x128xf32>
    %168 = vector.shape_cast %167 : vector<64x128xf32> to vector<4x16x128xf32>
    %cst_128 = arith.constant dense<0.000000e+00> : vector<4x128xf32>
    %169 = vector.multi_reduction <add>, %168, %cst_128 [1] : vector<4x16x128xf32> to vector<4x128xf32>
    %170 = vector.shape_cast %169 : vector<4x128xf32> to vector<4x1x128xf32>
    %cst_129 = arith.constant 1.600000e+01 : f32
    %171 = vector.broadcast %cst_129 : f32 to vector<4x1x128xf32>
    %172 = arith.divf %170, %171 : vector<4x1x128xf32>
    %173 = vector.broadcast %172 : vector<4x1x128xf32> to vector<4x16x128xf32>
    %174 = arith.subf %168, %173 : vector<4x16x128xf32>
    %175 = arith.mulf %174, %174 : vector<4x16x128xf32>
    %cst_130 = arith.constant dense<0.000000e+00> : vector<4x128xf32>
    %176 = vector.multi_reduction <add>, %175, %cst_130 [1] : vector<4x16x128xf32> to vector<4x128xf32>
    %177 = vector.shape_cast %176 : vector<4x128xf32> to vector<4x1x128xf32>
    %cst_131 = arith.constant 1.600000e+01 : f32
    %178 = vector.broadcast %cst_131 : f32 to vector<4x1x128xf32>
    %179 = arith.divf %177, %178 : vector<4x1x128xf32>
    %180 = vector.broadcast %172 : vector<4x1x128xf32> to vector<4x16x128xf32>
    %181 = arith.subf %168, %180 : vector<4x16x128xf32>
    %cst_132 = arith.constant 9.99999974E-6 : f32
    %182 = vector.broadcast %cst_132 : f32 to vector<4x1x128xf32>
    %183 = arith.addf %179, %182 : vector<4x1x128xf32>
    %184 = math.rsqrt %183 : vector<4x1x128xf32>
    %185 = vector.broadcast %184 : vector<4x1x128xf32> to vector<4x16x128xf32>
    %186 = arith.mulf %181, %185 : vector<4x16x128xf32>
    %187 = vector.broadcast %111 : vector<4x1x128xf32> to vector<4x16x128xf32>
    %188 = arith.mulf %186, %187 : vector<4x16x128xf32>
    %189 = vector.broadcast %113 : vector<4x1x128xf32> to vector<4x16x128xf32>
    %190 = arith.addf %188, %189 : vector<4x16x128xf32>
    %cst_133 = arith.constant 2.000000e-01 : f32
    %191 = vector.broadcast %cst_133 : f32 to vector<4x16x128xf32>
    %192 = arith.mulf %191, %190 : vector<4x16x128xf32>
    %193 = arith.maximumf %190, %192 : vector<4x16x128xf32>
    %194 = vector.shape_cast %193 : vector<4x16x128xf32> to vector<64x128xf32>
    %195 = arith.truncf %194 : vector<64x128xf32> to vector<64x128xbf16>
    %c0_134 = arith.constant 0 : index
    %c0_135 = arith.constant 0 : index
    %196 = vector.load %arg10[%c0_134, %c0_135] : memref<128x128xbf16, #tpu.memory_space<vmem>>, vector<128x128xbf16>
    %cst_136 = arith.constant dense<0.000000e+00> : vector<64x128xf32>
    %197 = tpu.matmul %195, %196, %cst_136 {dimension_numbers = #tpu.dot_dimension_numbers<[1], [0], [0], [1], [0, 0, 1, 1], [], []>} : vector<64x128xbf16>, vector<128x128xbf16>, vector<64x128xf32> -> vector<64x128xf32>
    %c0_137 = arith.constant 0 : index
    %c0_138 = arith.constant 0 : index
    %198 = vector.load %arg11[%c0_137, %c0_138] : memref<1x128xf32, #tpu.memory_space<vmem>>, vector<1x128xf32>
    %199 = vector.broadcast %198 : vector<1x128xf32> to vector<64x128xf32>
    %200 = arith.addf %197, %199 : vector<64x128xf32>
    %201 = vector.shape_cast %200 : vector<64x128xf32> to vector<4x16x128xf32>
    %c0_139 = arith.constant 0 : index
    %c0_140 = arith.constant 0 : index
    %c0_141 = arith.constant 0 : index
    %202 = vector.load %arg12[%c0_139, %c0_140, %c0_141] : memref<4x16x128xf32, #tpu.memory_space<vmem>>, vector<4x16x128xf32>
    tpu.vector_store %arg12[%c0_139, %c0_140, %c0_141], %201 {strides = array<i32>} : memref<4x16x128xf32, #tpu.memory_space<vmem>>, vector<4x16x128xf32>,
    return
  }
  func.func @transform_0(%arg0: i32) -> (i32, i32, i32) {
    %c0_i32 = arith.constant 0 : i32
    %c0_i32_0 = arith.constant 0 : i32
    %c0_i32_1 = arith.constant 0 : i32
    return %arg0, %c0_i32, %c0_i32_0 : i32, i32, i32
  }
  func.func @transform_1(%arg0: i32) -> (i32, i32, i32) {
    %c0_i32 = arith.constant 0 : i32
    %c0_i32_0 = arith.constant 0 : i32
    %c0_i32_1 = arith.constant 0 : i32
    return %arg0, %c0_i32, %c0_i32_0 : i32, i32, i32
  }
  func.func @transform_2(%arg0: i32) -> (i32, i32, i32) {
    %c0_i32 = arith.constant 0 : i32
    %c0_i32_0 = arith.constant 0 : i32
    %c0_i32_1 = arith.constant 0 : i32
    %c0_i32_2 = arith.constant 0 : i32
    return %c0_i32, %c0_i32_0, %c0_i32_1 : i32, i32, i32
  }
  func.func @transform_3(%arg0: i32) -> (i32, i32, i32) {
    %c0_i32 = arith.constant 0 : i32
    %c0_i32_0 = arith.constant 0 : i32
    %c0_i32_1 = arith.constant 0 : i32
    %c0_i32_2 = arith.constant 0 : i32
    return %c0_i32, %c0_i32_0, %c0_i32_1 : i32, i32, i32
  }
  func.func @transform_4(%arg0: i32) -> (i32, i32) {
    %c0_i32 = arith.constant 0 : i32
    %c0_i32_0 = arith.constant 0 : i32
    %c0_i32_1 = arith.constant 0 : i32
    return %c0_i32, %c0_i32_0 : i32, i32
  }
  func.func @transform_5(%arg0: i32) -> (i32, i32) {
    %c0_i32 = arith.constant 0 : i32
    %c0_i32_0 = arith.constant 0 : i32
    %c0_i32_1 = arith.constant 0 : i32
    return %c0_i32, %c0_i32_0 : i32, i32
  }
  func.func @transform_6(%arg0: i32) -> (i32, i32) {
    %c0_i32 = arith.constant 0 : i32
    %c0_i32_0 = arith.constant 0 : i32
    %c0_i32_1 = arith.constant 0 : i32
    return %c0_i32, %c0_i32_0 : i32, i32
  }
  func.func @transform_7(%arg0: i32) -> (i32, i32) {
    %c0_i32 = arith.constant 0 : i32
    %c0_i32_0 = arith.constant 0 : i32
    %c0_i32_1 = arith.constant 0 : i32
    return %c0_i32, %c0_i32_0 : i32, i32
  }
  func.func @transform_8(%arg0: i32) -> (i32, i32) {
    %c0_i32 = arith.constant 0 : i32
    %c0_i32_0 = arith.constant 0 : i32
    %c0_i32_1 = arith.constant 0 : i32
    return %c0_i32, %c0_i32_0 : i32, i32
  }
  func.func @transform_9(%arg0: i32) -> (i32, i32) {
    %c0_i32 = arith.constant 0 : i32
    %c0_i32_0 = arith.constant 0 : i32
    %c0_i32_1 = arith.constant 0 : i32
    return %c0_i32, %c0_i32_0 : i32, i32
  }
  func.func @transform_10(%arg0: i32) -> (i32, i32) {
    %c0_i32 = arith.constant 0 : i32
    %c0_i32_0 = arith.constant 0 : i32
    %c0_i32_1 = arith.constant 0 : i32
    return %c0_i32, %c0_i32_0 : i32, i32
  }
  func.func @transform_11(%arg0: i32) -> (i32, i32, i32) {
    %c0_i32 = arith.constant 0 : i32
    %c0_i32_0 = arith.constant 0 : i32
    %c0_i32_1 = arith.constant 0 : i32
    return %arg0, %c0_i32, %c0_i32_0 : i32, i32, i32
  }
}

</mosaic_0001>

<bundles_post_ra>
// kernel: stylegan_generator_forward.1
= control target key start
LH: loop header
LB: loop body
LE: loop exit
PB: predicated region body
PF: predicated region fallthrough
CT: control target
= control target key end

     0   :  { %16 = vsyncpa [#allocation4], 0  ;;  %s7998_s0 = inlined_call_operand.vmem [shape: f32[8,1,128], index: 0, kind: input, shape index: {}]   ;;  %s7999_s1 = inlined_call_operand.vmem [shape: f32[8,16,1], index: 1, kind: input, shape index: {}]   ;;  %s8000_s2 = inlined_call_operand.hbm [shape: bf16[8,128,128], index: 2, kind: input, shape index: {}]   ;;  %s8001_s3 = inlined_call_operand.vmem [shape: f32[8,1,128], index: 3, kind: input, shape index: {}]   ;;  %s8002_s4 = inlined_call_operand.hbm [shape: bf16[128,512], index: 4, kind: input, shape index: {}]   ;;  %s8003_s5 = inlined_call_operand.vmem [shape: f32[1,512], index: 5, kind: input, shape index: {}]   ;;  %s8004_s6 = inlined_call_operand.vmem [shape: f32[1,128], index: 6, kind: input, shape index: {}]   ;;  %s8005_s7 = inlined_call_operand.hbm [shape: bf16[1152,128], index: 7, kind: input, shape index: {}]   ;;  %s8006_s8 = inlined_call_operand.vmem [shape: f32[1,128], index: 8, kind: input, shape index: {}]   ;;  %s8007_s9 = inlined_call_operand.vmem [shape: bf16[128,128], index: 9, kind: input, shape index: {}]   ;;  %s8008_s10 = inlined_call_operand.vmem [shape: f32[1,128], index: 10, kind: input, shape index: {}]   ;;  %s8009_s11 = inlined_call_operand.vmem [shape: f32[8,16,128], index: 11, kind: output, shape index: {}]  }
   0x1   :  { %17 = vsyncpa [#allocation6], 0  ;;  %s7082_s17 = smov 0  }
   0x2 LB: > { %s7010_s18 = smov [#allocation5]   ;;  %s8010_s20 = sadd.s32 4294967295, %s7008_s17   ;;  %s7008_s17 = sphi %s7082_s17, %s23_s17  }
   0x3   : > { %s323_s19 = sshll.u32 %s7010_s18, 4  ;;  %p5743_p0 = scmp.ge.s32.totalorder %s7008_s17, 1  ;;  %s7100_s19 = int_to_ptr.vmem [resolvable:$true] %s323_s19 }
   0x4   : > { %p295_p1 = scmp.lt.s32.totalorder %s7008_s17, 3  ;;  %p7092_p2 = scmp.eq.s32.totalorder %s8010_s20, 0 }
   0x5   : > { %s7011_s23 = smov [#allocation3]   ;;  %s7012_s26 = smov [#allocation7]  }
   0x6   : > { %s8014_s21 = scalar_select %p7092_p2, 1, 0 }
   0x7   : > { %p7096_p3 = pnand %p5743_p0, %p295_p1  ;;  %s307_s24 = sshll.u32 %s7011_s23, 4  ;;  %s7104_s24 = int_to_ptr.vmem [resolvable:$true] %s307_s24 }
   0x8   : > { %s7112_s27 = sshll.u32 %s7012_s26, 4  ;;  %s6910_s30 = scalar_lea.hbm %s8002_s4, 4096  ;;  %s343_s27 = int_to_ptr.vmem [resolvable:$true] %s7112_s27 }
   0x9   : > { %s8015_s22 = scalar_select %p7096_p3, 1, 0 }
   0xa   : > { %p6565_p4 = pneg %p7096_p3  ;;  %p6911_p6 = scmp.ne.s32.totalorder %s8002_s4, %s6910_s30 }
   0xb   : > { %p6917_p10 = scmp.lt.u32.totalorder %s6910_s30, %s8002_s4 }
   0xc   : > { %p7108_p5 = pnand %p7092_p2, %p6565_p4 }
   0xe   : > { %p7122_p7 = pneg %p7108_p5 }
  0x10   : > { %p6913_p8 = pnand %p7122_p7, %p6911_p6 }
  0x12   : > { %p6914_p9 = pneg %p6913_p8 }
  0x14   : > { %p6919_p11 = pnand %p6917_p10, %p6914_p9 }
  0x16   : > { %6922 = shalt.err (!%p6919_p11)
}
  0x17   : > { %s6923_s18 = scalar_lea.vmem %s7100_s19, 4096  ;;  %p6931_p1 = scmp.lt.s32.totalorder %s7100_s19, %s7100_s19 }
  0x18   : > { %p6924_p12 = scmp.ne.s32.totalorder %s7100_s19, %s6923_s18  ;;  %p6932_p4 = scmp.lt.s32.totalorder %s6923_s18, %s6923_s18 }
  0x1a   : > { %p6926_p13 = pnand %p6924_p12, %p7122_p7  ;;  %p6933_p6 = por %p6932_p4, %p6931_p1 }
  0x1c   : > { %p6927_p0 = pneg %p6926_p13 }
  0x1e   : > { %p6934_p8 = pnand %p6933_p6, %p6927_p0 }
  0x20   : > { %6937 = shalt.err (!%p6934_p8)
}
  0x21   : > { %s7013_s23 = smov 256   ;;  %s7014_s26 = smov 16  }
  0x22   : > { %6571 = dma.hbm_to_vmem [thread:$0]  (!%p7108_p5), %s8002_s4, 4096, %s7100_s19, [#allocation6], %s7013_s23, %s7013_s23, %s7014_s26  }
  0x23   : > { %s6938_s13 = scalar_lea.hbm %s8000_s2, 8192 }
  0x24   : > { %p6939_p9 = scmp.ne.s32.totalorder %s8000_s2, %s6938_s13  ;;  %p6945_p12 = scmp.lt.u32.totalorder %s6938_s13, %s8000_s2 }
  0x26   : > { %p6941_p10 = pnand %p6939_p9, %p7122_p7 }
  0x28   : > { %p6942_p11 = pneg %p6941_p10 }
  0x2a   : > { %p6947_p13 = pnand %p6945_p12, %p6942_p11 }
  0x2c   : > { %6950 = shalt.err (!%p6947_p13)
}
  0x2d   : > { %s6951_s19 = scalar_lea.vmem %s7104_s24, 8192  ;;  %p6959_p6 = scmp.lt.s32.totalorder %s7104_s24, %s7104_s24 }
  0x2e   : > { %p6952_p0 = scmp.ne.s32.totalorder %s7104_s24, %s6951_s19  ;;  %p6960_p8 = scmp.lt.s32.totalorder %s6951_s19, %s6951_s19 }
  0x30   : > { %p6954_p1 = pnand %p6952_p0, %p7122_p7  ;;  %p6961_p9 = por %p6960_p8, %p6959_p6 }
  0x32   : > { %p6955_p4 = pneg %p6954_p1 }
  0x34   : > { %p6962_p10 = pnand %p6961_p9, %p6955_p4 }
  0x36   : > { %6965 = shalt.err (!%p6962_p10)
}
  0x37   : > { %s7015_s23 = smov 64   ;;  %s7016_s20 = smov 4  }
  0x38   : > { %6568 = dma.hbm_to_vmem [thread:$0]  (!%p7108_p5), %s8000_s2, 8192, %s7104_s24, [#allocation4], %s7015_s23, %s7015_s23, %s7016_s20  }
  0x39   : > { %s6966_s12 = scalar_lea.hbm %s8005_s7, 9216 }
  0x3a   : > { %p6967_p11 = scmp.ne.s32.totalorder %s8005_s7, %s6966_s12  ;;  %p6973_p0 = scmp.lt.u32.totalorder %s6966_s12, %s8005_s7 }
  0x3c   : > { %p6969_p12 = pnand %p6967_p11, %p7122_p7 }
  0x3e   : > { %p6970_p13 = pneg %p6969_p12 }
  0x40   : > { %p6975_p1 = pnand %p6973_p0, %p6970_p13 }
  0x42   : > { %6978 = shalt.err (!%p6975_p1)
}
  0x43   : > { %s6979_s19 = scalar_lea.vmem %s343_s27, 9216  ;;  %p6987_p9 = scmp.lt.s32.totalorder %s343_s27, %s343_s27 }
  0x44   : > { %p6980_p4 = scmp.ne.s32.totalorder %s343_s27, %s6979_s19  ;;  %p6988_p10 = scmp.lt.s32.totalorder %s6979_s19, %s6979_s19 }
  0x46   : > { %p6982_p6 = pnand %p6980_p4, %p7122_p7  ;;  %p6989_p2 = por %p6988_p10, %p6987_p9 }
  0x48   : > { %p6983_p8 = pneg %p6982_p6 }
  0x4a   : > { %p6990_p3 = pnand %p6989_p2, %p6983_p8 }
  0x4c   : > { %6993 = shalt.err (!%p6990_p3)
}
  0x4d   : > { %6574 = dma.hbm_to_vmem [thread:$0]  (!%p7108_p5), %s8005_s7, 9216, %s343_s27, [#allocation6], %s7015_s23, %s7015_s23, %s7016_s20  }
  0x4e   : > { %p8018_p11 = scmp.ne.s32.totalorder %s8015_s22, 0 }
  0x4f   : > { %p8019_p12 = scmp.ne.s32.totalorder (!%p8018_p11), %s8014_s21, 0 }
  0x50   : > { %385 = sbr.rel (%p8018_p11) target bundleno = 2938 (0xb7a), region = 64 }
  0x57   : > { %6999 = dma.done.wait (%p8019_p12), [#allocation4], 8192  }
  0x58   : > { %7001 = vsyncadd (%p8019_p12), [#allocation4], 4294959104 }
  0x59   : > { %7003 = dma.done.wait (%p8019_p12), [#allocation6], 13312  }
  0x5a   : > { %7005 = vsyncadd (%p8019_p12), [#allocation6], 4294953984  ;;  %s8020_s25 = sadd.s32 4294967295, %s7008_s17   ;;  %v476_v0 = vlaneseq  ;;  %v7017_v1 = vmov 1966171168   ;;  %v7018_v3 = vmov 0.0  }
  0x5b   : > { %s5752_s14 = sshll.u32 %s8020_s25, 2  ;;  %v474_v2 = vunpack.c.l.s4 %v7017_v1  ;;  %6345 = vmatprep.subr.bf16.mxu0 %v7018_v3  ;;  %6365 = vmatprep.subr.bf16.mxu1 %v7018_v3  ;;  %vm496_vm0 = vcmask 1043456   ;;  %v6603_v15 = vld [vmem:[#allocation3] sm:$0xff]   ;;  %v6604_v23 = vld [vmem:[#allocation3 + $0x8] sm:$0xff]   ;;  %v6605_v24 = vld [vmem:[#allocation3 + $0x10] sm:$0xff]   ;;  %vm7019_vm1 = vmmov 0  }
  0x5c   : > { %p440_p2 = scmp.lt.s32.totalorder %s5752_s14, 7  ;;  %v7201_v5 = vshrl.u32 %v476_v0, 7  ;;  %6346 = vmatpush3.bf16.msra.mxu0 %v6603_v15  ;;  %v6606_v25 = vld [vmem:[#allocation3 + $0x18] sm:$0xff]   ;;  %6361 = vmatprep.mubr.msk.bf16.mxu0 %vm7019_vm1, %v7018_v3  ;;  %v6607_v26 = vld [vmem:[#allocation3 + $0x20] sm:$0xff]   ;;  %v6608_v27 = vld [vmem:[#allocation3 + $0x28] sm:$0xff]   ;;  %vm565_vm2 = vcmask 1041409  }
  0x5d   : > { %v475_v4 = vunpack.c.0.s8 %v474_v2  ;;  %6347 = vmatprep.subr.bf16.mxu0 %v7018_v3  ;;  %6381 = vmatprep.mubr.msk.bf16.mxu1 %vm7019_vm1, %v7018_v3  ;;  %v6609_v28 = vld [vmem:[#allocation3 + $0x30] sm:$0xff]   ;;  %v6610_v29 = vld [vmem:[#allocation3 + $0x38] sm:$0xff]   ;;  %v6611_v30 = vld [vmem:[#allocation3 + $0x40] sm:$0xff]   ;;  %vm568_vm3 = vcmask 1042434   ;;  %vm571_vm4 = vcmask 1043459   ;;  %vm2455_vm5 = vcmask 1042432  }
  0x5e   : > { %s8024_s14 = smov (!%p440_p2, %s5752_s14), 7  ;;  %6366 = vmatpush3.bf16.msra.mxu1 %v6611_v30  ;;  %v6612_v31 = vld [vmem:[#allocation3 + $0x48] sm:$0xff]   ;;  %v6613_v32 = vld [vmem:[#allocation3 + $0x50] sm:$0xff]   ;;  %v6614_v33 = vld [vmem:[#allocation3 + $0x58] sm:$0xff]   ;;  %v7248_v39 = vsub.s32 0, %v7201_v5  ;;  %v511_v40 = vsub.s32 1, %v7201_v5 }
  0x5f   : > { %s442_s27 = scalar_lea.vmem %s7998_s0, %s8024_s14  ;;  %v7222_v13 = vsub.s32 %v475_v4, %v7201_v5  ;;  %6367 = vmatprep.subr.bf16.mxu1 %v7018_v3  ;;  %v6615_v34 = vld [vmem:[#allocation3 + $0x60] sm:$0xff]   ;;  %v6616_v35 = vld [vmem:[#allocation3 + $0x68] sm:$0xff]   ;;  %v515_v41 = vsub.s32 2, %v7201_v5  ;;  %v519_v42 = vsub.s32 3, %v7201_v5  ;;  %v6617_v4 = vld [vmem:[#allocation3 + $0x70] sm:$0xff]   ;;  %s6087_s26 = sshll.u32 %s8024_s14, 4 }
  0x60   : > { %v7207_v6 = vld [vmem:[%s442_s27] sm:$0x1]  ;;  %v7209_v7 = vld [vmem:[%s442_s27 + $0x1] sm:$0x1]  ;;  %v7211_v8 = vld [vmem:[%s442_s27 + $0x2] sm:$0x1]  ;;  %6348 = vmatpush3.bf16.msra.mxu0 %v6604_v23  ;;  %s7373_s22 = scalar_lea.vmem %s7999_s1, %s6087_s26 }
  0x61   : > { %v7213_v9 = vld [vmem:[%s442_s27 + $0x3] sm:$0x1]  ;;  %v463_v10 = vmul.f32 %v7207_v6, %v7207_v6  ;;  %v464_v11 = vmul.f32 %v7209_v7, %v7209_v7  ;;  %v465_v12 = vmul.f32 %v7211_v8, %v7211_v8  ;;  %6349 = vmatprep.subr.bf16.mxu0 %v7018_v3  ;;  %v6625_v23 = vld [vmem:[#allocation3 + $0xb0] sm:$0xff]   ;;  %v6632_v30 = vld [vmem:[#allocation3 + $0xe8] sm:$0xff]   ;;  %vm2456_vm6 = vsmask.f32 2306  ;;  %s456_s27 = scalar_lea.vmem %s8009_s11, %s6087_s26 }
  0x62   : > { %v466_v14 = vmul.f32 %v7213_v9, %v7213_v9  ;;  %6368 = vmatpush3.bf16.msra.mxu1 %v6612_v31  ;;  %v5769_v31 = vld [vmem:[%s8001_s3 + $0x1] ss:$0 sm:$0xff]  ;;  %vm7571_vm7 = vmand %vm2455_vm5, %vm2456_vm6 }
  0x63   : > { %v471_v16 = vcombine.low %v463_v10, %v464_v11  ;;  %6369 = vmatprep.subr.bf16.mxu1 %v7018_v3  ;;  %v6622_v10 = vld [vmem:[#allocation3 + $0x98] sm:$0xff]   ;;  %v6623_v11 = vld [vmem:[#allocation3 + $0xa0] sm:$0xff]  }
  0x64   : > { %v472_v17 = vcombine.low %v465_v12, %v466_v14  ;;  %6350 = vmatpush3.bf16.msra.mxu0 %v6605_v24  ;;  %v6624_v12 = vld [vmem:[#allocation3 + $0xa8] sm:$0xff]   ;;  %v5759_v14 = vld [vmem:[%s8001_s3] ss:$0 sm:$0xff]  ;;  %v6626_v24 = vld [vmem:[#allocation3 + $0xb8] sm:$0xff]  }
  0x65   : > { %v479_v18 = vrot.slane %v471_v16, %v7222_v13  ;;  %6351 = vmatprep.subr.bf16.mxu0 %v7018_v3 }
  0x66   : > { %v486_v19 = vrot.slane %v472_v17, %v7222_v13  ;;  %6370 = vmatpush3.bf16.msra.mxu1 %v6613_v32 }
  0x67   : > { %6371 = vmatprep.subr.bf16.mxu1 %v7018_v3 }
  0x68   : > { %v487_v20 = vcombine.low %v479_v18, %v486_v19  ;;  %6352 = vmatpush3.bf16.msra.mxu0 %v6606_v25  ;;  %v6627_v25 = vld [vmem:[#allocation3 + $0xc0] sm:$0xff]  }
  0x69   : > { %6353 = vmatprep.subr.bf16.mxu0 %v7018_v3 }
  0x6a   : > { %v494_v21 = vrot.slane %v487_v20, %v7222_v13  ;;  %6372 = vmatpush3.bf16.msra.mxu1 %v6614_v33 }
  0x6b   : > { %6373 = vmatprep.subr.bf16.mxu1 %v7018_v3 }
  0x6c   : > { %v497_v22 = vsel %vm496_vm0, %v494_v21, 0.0  ;;  %6354 = vmatpush3.bf16.msra.mxu0 %v6607_v26  ;;  %v6628_v26 = vld [vmem:[#allocation3 + $0xc8] sm:$0xff]  }
  0x6d   : > { %498 = vadd.xlane.f32.xlu0 %v497_v22  ;;  %6355 = vmatprep.subr.bf16.mxu0 %v7018_v3 }
  0x6e   : > { %6374 = vmatpush3.bf16.msra.mxu1 %v6615_v34 }
  0x6f   : > { %6375 = vmatprep.subr.bf16.mxu1 %v7018_v3 }
  0x70   : > { %6356 = vmatpush3.bf16.msra.mxu0 %v6608_v27  ;;  %v6629_v27 = vld [vmem:[#allocation3 + $0xd0] sm:$0xff]  }
  0x71   : > { %6357 = vmatprep.subr.bf16.mxu0 %v7018_v3 }
  0x72   : > { %6376 = vmatpush3.bf16.msra.mxu1 %v6616_v35 }
  0x73   : > { %6377 = vmatprep.subr.bf16.mxu1 %v7018_v3 }
  0x74   : > { %6358 = vmatpush3.bf16.msra.mxu0 %v6609_v28  ;;  %v6630_v28 = vld [vmem:[#allocation3 + $0xd8] sm:$0xff]  }
  0x75   : > { %6359 = vmatprep.subr.bf16.mxu0 %v7018_v3 }
  0x76   : > { %6378 = vmatpush3.bf16.msra.mxu1 %v6617_v4  ;;  %v6647_v4 = vld [vmem:[#allocation3 + $0x160] sm:$0xff]  }
  0x77   : > { %6379 = vmatprep.subr.bf16.mxu1 %v7018_v3 }
  0x78   : > { %6360 = vmatpush3.bf16.msra.mxu0 %v6610_v29  ;;  %v6631_v29 = vld [vmem:[#allocation3 + $0xe0] sm:$0xff]  }
  0x79   : > { %6385 = vmatprep.subr.bf16.mxu0 %v7018_v3 }
  0xfa   : > { %v499_v36 = vpop.xlane.xlu0 %498 }
  0xfb   : > { %v501_v37 = vmul.f32 0.0078125, %v499_v36 }
  0xfd   : > { %v502_v38 = vadd.f32 1e-08, %v501_v37 }
  0xff   : > { %6891 = vrsqrt.f32 %v502_v38 }
 0x109   : > { %v6892_v43 = vpop.eup %6891 }
 0x10a   : > { %v508_v44 = vrot.slane %v6892_v43, %v7248_v39  ;;  %v512_v45 = vrot.slane %v6892_v43, %v511_v40  ;;  %v516_v46 = vrot.slane %v6892_v43, %v515_v41  ;;  %v520_v47 = vrot.slane %v6892_v43, %v519_v42 }
 0x10c   : > { %v525_v48 = vmul.f32 %v508_v44, %v7207_v6  ;;  %v526_v49 = vmul.f32 %v512_v45, %v7209_v7  ;;  %v527_v50 = vmul.f32 %v516_v46, %v7211_v8  ;;  %v528_v51 = vmul.f32 %v520_v47, %v7213_v9  ;;  %v6618_v6 = vld [vmem:[#allocation3 + $0x78] sm:$0xff]   ;;  %v6619_v7 = vld [vmem:[#allocation3 + $0x80] sm:$0xff]   ;;  %v6620_v8 = vld [vmem:[#allocation3 + $0x88] sm:$0xff]  }
 0x10d   : > { %6380 = vmatpush3.bf16.msra.mxu1 %v6618_v6  ;;  %v6621_v9 = vld [vmem:[#allocation3 + $0x90] sm:$0xff]   ;;  %v6634_v45 = vld [vmem:[#allocation3 + $0xf8] sm:$0xff]   ;;  %v6635_v46 = vld [vmem:[#allocation3 + $0x100] sm:$0xff]  }
 0x10e   : > { %v529_v52 = vpack.c.bf16 %v525_v48, %v525_v48  ;;  %v530_v53 = vpack.c.bf16 %v526_v49, %v526_v49  ;;  %v531_v54 = vpack.c.bf16 %v527_v50, %v527_v50  ;;  %v532_v55 = vpack.c.bf16 %v528_v51, %v528_v51  ;;  %6405 = vmatprep.subr.bf16.mxu1 %v7018_v3  ;;  %v6633_v44 = vld [vmem:[#allocation3 + $0xf0] sm:$0xff]   ;;  %v6636_v47 = vld [vmem:[#allocation3 + $0x108] sm:$0xff]   ;;  %v6638_v49 = vld [vmem:[#allocation3 + $0x118] sm:$0xff]  }
 0x10f   : > { %v6637_v48 = vld [vmem:[#allocation3 + $0x110] sm:$0xff]   ;;  %v6639_v50 = vld [vmem:[#allocation3 + $0x120] sm:$0xff]   ;;  %v6640_v51 = vld [vmem:[#allocation3 + $0x128] sm:$0xff]  }
 0x110   : > { %v561_v56 = vunpack.c.l.b16 %v530_v53  ;;  %v562_v57 = vunpack.c.l.b16 %v531_v54  ;;  %v563_v58 = vunpack.c.l.b16 %v532_v55  ;;  %v560_v59 = vunpack.c.l.b16 %v529_v52  ;;  %v5779_v52 = vld [vmem:[%s8001_s3 + $0x2] ss:$0 sm:$0xff]  ;;  %v6648_v6 = vld [vmem:[#allocation3 + $0x168] sm:$0xff]  }
 0x112   : > { %v564_v60 = vrot.slane %v561_v56, 7  ;;  %v567_v61 = vrot.slane %v562_v57, 6  ;;  %v570_v63 = vrot.slane %v563_v58, 5 }
 0x114   : > { %v566_v62 = vsel %vm565_vm2, %v564_v60, %v560_v59 }
 0x115   : > { %v569_v0 = vsel %vm568_vm3, %v567_v61, %v566_v62  ;;  %v6641_v61 = vld [vmem:[#allocation3 + $0x130] sm:$0xff]   ;;  %v6642_v62 = vld [vmem:[#allocation3 + $0x138] sm:$0xff]  }
 0x116   : > { %v572_v1 = vsel %vm571_vm4, %v570_v63, %v569_v0  ;;  %v6643_v63 = vld [vmem:[#allocation3 + $0x140] sm:$0xff]   ;;  %v6644_v0 = vld [vmem:[#allocation3 + $0x148] sm:$0xff]  }
 0x117   : > { %v573_v2 = vpack.c.b16 %v572_v1, %v572_v1  ;;  %v6645_v1 = vld [vmem:[#allocation3 + $0x150] sm:$0xff]  }
 0x119   : > { %6362 = vmatmul.mubr.bf16.vlgmr.msra.gmra.mrb[0].mxu0 %v573_v2  ;;  %v6646_v2 = vld [vmem:[#allocation3 + $0x158] sm:$0xff]  }
 0x11a   : > { %6401 = vmatprep.mubr.msk.bf16.mxu0 %vm7019_vm1, %v7018_v3  ;;  %6386 = vmatpush3.bf16.msra.mxu0 %v6619_v7  ;;  %v5789_v7 = vld [vmem:[%s8001_s3 + $0x3] ss:$0 sm:$0xff] }
 0x11b   : > { %6387 = vmatprep.subr.bf16.mxu0 %v7018_v3 }
 0x11e   : > { %6388 = vmatpush3.bf16.msra.mxu0 %v6620_v8 }
 0x11f   : > { %6389 = vmatprep.subr.bf16.mxu0 %v7018_v3 }
 0x122   : > { %6390 = vmatpush3.bf16.msra.mxu0 %v6621_v9 }
 0x123   : > { %6391 = vmatprep.subr.bf16.mxu0 %v7018_v3 }
 0x126   : > { %6392 = vmatpush3.bf16.msra.mxu0 %v6622_v10 }
 0x127   : > { %6393 = vmatprep.subr.bf16.mxu0 %v7018_v3 }
 0x12a   : > { %6394 = vmatpush3.bf16.msra.mxu0 %v6623_v11 }
 0x12b   : > { %6395 = vmatprep.subr.bf16.mxu0 %v7018_v3 }
 0x12e   : > { %6396 = vmatpush3.bf16.msra.mxu0 %v6624_v12 }
 0x12f   : > { %6397 = vmatprep.subr.bf16.mxu0 %v7018_v3 }
 0x132   : > { %6398 = vmatpush3.bf16.msra.mxu0 %v6625_v23  ;;  %v6655_v23 = vld [vmem:[#allocation3 + $0x1a0] sm:$0xff]  }
 0x133   : > { %6399 = vmatprep.subr.bf16.mxu0 %v7018_v3 }
 0x136   : > { %6400 = vmatpush3.bf16.msra.mxu0 %v6626_v24  ;;  %v6656_v24 = vld [vmem:[#allocation3 + $0x1a8] sm:$0xff]  }
 0x137   : > { %6425 = vmatprep.subr.bf16.mxu0 %v7018_v3 }
 0x1ec   : > { %v657_v15 = vpop.f32.mrb[0].mxu0 }
 0x1ed   : > { %v658_v16 = vadd.f32 %v5759_v14, %v657_v15  ;;  %v6363_v17 = vpop.f32.mrb[1].mxu0 }
 0x1ee   : > { %v660_v18 = vpop.f32.mrb[2].mxu0  ;;  %v6649_v17 = vld [vmem:[#allocation3 + $0x170] sm:$0xff]  }
 0x1ef   : > { %v663_v19 = vmul.f32 0.2, %v658_v16  ;;  %v6364_v20 = vpop.f32.mrb[3].mxu0  ;;  %v6650_v18 = vld [vmem:[#allocation3 + $0x178] sm:$0xff]  }
 0x1f0   : > { %v6652_v20 = vld [vmem:[#allocation3 + $0x188] sm:$0xff]  }
 0x1f1   : > { %v664_v21 = vmax.f32 %v658_v16, %v663_v19  ;;  %v6651_v19 = vld [vmem:[#allocation3 + $0x180] sm:$0xff]  }
 0x1f3   : > { %v665_v22 = vpack.c.bf16 %v664_v21, %v664_v21  ;;  %v6653_v21 = vld [vmem:[#allocation3 + $0x190] sm:$0xff]  }
 0x1f5   : > { %6382 = vmatmul.mubr.bf16.vlgmr.msra.gmra.mrb[0].mxu1 %v665_v22  ;;  %v6654_v22 = vld [vmem:[#allocation3 + $0x198] sm:$0xff]  }
 0x1f6   : > { %6421 = vmatprep.mubr.msk.bf16.mxu1 %vm7019_vm1, %v7018_v3  ;;  %6406 = vmatpush3.bf16.msra.mxu1 %v6627_v25  ;;  %v5799_v25 = vld [vmem:[%s8001_s3 + $0x4] ss:$0 sm:$0xff] }
 0x1f7   : > { %6407 = vmatprep.subr.bf16.mxu1 %v7018_v3 }
 0x1fa   : > { %6408 = vmatpush3.bf16.msra.mxu1 %v6628_v26 }
 0x1fb   : > { %6409 = vmatprep.subr.bf16.mxu1 %v7018_v3 }
 0x1fe   : > { %6410 = vmatpush3.bf16.msra.mxu1 %v6629_v27 }
 0x1ff   : > { %6411 = vmatprep.subr.bf16.mxu1 %v7018_v3 }
 0x202   : > { %6412 = vmatpush3.bf16.msra.mxu1 %v6630_v28 }
 0x203   : > { %6413 = vmatprep.subr.bf16.mxu1 %v7018_v3 }
 0x206   : > { %6414 = vmatpush3.bf16.msra.mxu1 %v6631_v29 }
 0x207   : > { %6415 = vmatprep.subr.bf16.mxu1 %v7018_v3 }
 0x20a   : > { %6416 = vmatpush3.bf16.msra.mxu1 %v6632_v30 }
 0x20b   : > { %6417 = vmatprep.subr.bf16.mxu1 %v7018_v3 }
 0x20e   : > { %6418 = vmatpush3.bf16.msra.mxu1 %v6633_v44  ;;  %v6663_v44 = vld [vmem:[#allocation3 + $0x1e0] sm:$0xff]  }
 0x20f   : > { %6419 = vmatprep.subr.bf16.mxu1 %v7018_v3 }
 0x212   : > { %6420 = vmatpush3.bf16.msra.mxu1 %v6634_v45  ;;  %v6664_v45 = vld [vmem:[#allocation3 + $0x1e8] sm:$0xff]  }
 0x213   : > { %6445 = vmatprep.subr.bf16.mxu1 %v7018_v3 }
 0x2c8   : > { %v773_v32 = vpop.f32.mrb[0].mxu1 }
 0x2c9   : > { %v774_v33 = vadd.f32 %v5769_v31, %v773_v32  ;;  %v6383_v34 = vpop.f32.mrb[1].mxu1 }
 0x2ca   : > { %v776_v35 = vpop.f32.mrb[2].mxu1  ;;  %v6657_v34 = vld [vmem:[#allocation3 + $0x1b0] sm:$0xff]  }
 0x2cb   : > { %v779_v36 = vmul.f32 0.2, %v774_v33  ;;  %v6384_v37 = vpop.f32.mrb[3].mxu1  ;;  %v6658_v35 = vld [vmem:[#allocation3 + $0x1b8] sm:$0xff]  }
 0x2cc   : > { %v6660_v37 = vld [vmem:[#allocation3 + $0x1c8] sm:$0xff]  }
 0x2cd   : > { %v780_v38 = vmax.f32 %v774_v33, %v779_v36  ;;  %v6659_v36 = vld [vmem:[#allocation3 + $0x1c0] sm:$0xff]  }
 0x2cf   : > { %v781_v43 = vpack.c.bf16 %v780_v38, %v780_v38  ;;  %v6661_v38 = vld [vmem:[#allocation3 + $0x1d0] sm:$0xff]  }
 0x2d1   : > { %6402 = vmatmul.mubr.bf16.vlgmr.msra.gmra.mrb[4].mxu0 %v781_v43  ;;  %v6662_v43 = vld [vmem:[#allocation3 + $0x1d8] sm:$0xff]  }
 0x2d2   : > { %6441 = vmatprep.mubr.msk.bf16.mxu0 %vm7019_vm1, %v7018_v3  ;;  %6426 = vmatpush3.bf16.msra.mxu0 %v6635_v46  ;;  %v5809_v46 = vld [vmem:[%s8001_s3 + $0x5] ss:$0 sm:$0xff] }
 0x2d3   : > { %6427 = vmatprep.subr.bf16.mxu0 %v7018_v3 }
 0x2d6   : > { %6428 = vmatpush3.bf16.msra.mxu0 %v6636_v47 }
 0x2d7   : > { %6429 = vmatprep.subr.bf16.mxu0 %v7018_v3 }
 0x2da   : > { %6430 = vmatpush3.bf16.msra.mxu0 %v6637_v48 }
 0x2db   : > { %6431 = vmatprep.subr.bf16.mxu0 %v7018_v3 }
 0x2de   : > { %6432 = vmatpush3.bf16.msra.mxu0 %v6638_v49 }
 0x2df   : > { %6433 = vmatprep.subr.bf16.mxu0 %v7018_v3 }
 0x2e2   : > { %6434 = vmatpush3.bf16.msra.mxu0 %v6639_v50 }
 0x2e3   : > { %6435 = vmatprep.subr.bf16.mxu0 %v7018_v3 }
 0x2e6   : > { %6436 = vmatpush3.bf16.msra.mxu0 %v6640_v51 }
 0x2e7   : > { %6437 = vmatprep.subr.bf16.mxu0 %v7018_v3 }
 0x2ea   : > { %6438 = vmatpush3.bf16.msra.mxu0 %v6641_v61  ;;  %v6675_v61 = vld [vmem:[#allocation5 + $0x24] ss:$16 sps:$4 sm:$0xff]  }
 0x2eb   : > { %6439 = vmatprep.subr.bf16.mxu0 %v7018_v3 }
 0x2ee   : > { %6440 = vmatpush3.bf16.msra.mxu0 %v6642_v62  ;;  %v1876_v62 = vld [vmem:[%s7373_s22 + $0x10] sm:$0xff] }
 0x2ef   : > { %6465 = vmatprep.subr.bf16.mxu0 %v7018_v3 }
 0x3a4   : > { %v889_v53 = vpop.f32.mrb[4].mxu0 }
 0x3a5   : > { %v890_v54 = vadd.f32 %v5779_v52, %v889_v53  ;;  %v6403_v55 = vpop.f32.mrb[5].mxu0 }
 0x3a6   : > { %v892_v56 = vpop.f32.mrb[6].mxu0  ;;  %v6665_v55 = vld [vmem:[#allocation3 + $0x1f0] sm:$0xff]  }
 0x3a7   : > { %v895_v57 = vmul.f32 0.2, %v890_v54  ;;  %v6404_v58 = vpop.f32.mrb[7].mxu0  ;;  %v6666_v56 = vld [vmem:[#allocation3 + $0x1f8] sm:$0xff]  }
 0x3a8   : > { %v6669_v58 = vld [vmem:[#allocation5 + $0x4] ss:$16 sps:$4 sm:$0xff]  }
 0x3a9   : > { %v896_v59 = vmax.f32 %v890_v54, %v895_v57  ;;  %v6667_v57 = vld [vmem:[#allocation5] ss:$16 sps:$4 sm:$0xff]  }
 0x3ab   : > { %v897_v60 = vpack.c.bf16 %v896_v59, %v896_v59  ;;  %v7020_v59 = vmov 0  }
 0x3ac   : > { %6602 = vset.pattern.permute.xlu1 %v7020_v59  ;;  %2114 = vst [vmem:[#allocation2] sm:$0x7] %v7020_v59  ;;  %2115 = vst [vmem:[#allocation2 + $0x4] sm:$0x7] %v7020_v59  ;;  %6601 = vset.pattern.permute.xlu0 %v7020_v59 }
 0x3ad   : > { %6422 = vmatmul.mubr.bf16.vlgmr.msra.gmra.mrb[4].mxu1 %v897_v60  ;;  %2116 = vst [vmem:[#allocation2 + $0x8] sm:$0x7] %v7020_v59  ;;  %2117 = vst [vmem:[#allocation2 + $0xc] sm:$0x7] %v7020_v59  ;;  %v1875_v60 = vld [vmem:[%s7373_s22 + $0x8] sm:$0xff] }
 0x3ae   : > { %6461 = vmatprep.mubr.msk.bf16.mxu1 %vm7019_vm1, %v7018_v3  ;;  %6446 = vmatpush3.bf16.msra.mxu1 %v6643_v63  ;;  %2118 = vst [vmem:[#allocation2 + $0x10] sm:$0x7] %v7020_v59  ;;  %2119 = vst [vmem:[#allocation2 + $0x14] sm:$0x7] %v7020_v59  ;;  %v6673_v63 = vld [vmem:[#allocation5 + $0x20] ss:$16 sps:$4 sm:$0xff]  }
 0x3af   : > { %6447 = vmatprep.subr.bf16.mxu1 %v7018_v3  ;;  %2120 = vst [vmem:[#allocation2 + $0x18] sm:$0x7] %v7020_v59  ;;  %2121 = vst [vmem:[#allocation2 + $0x1c] sm:$0x7] %v7020_v59  ;;  %1896 = vperm.xlu1 %6602, %v1875_v60  }
 0x3b0   : > { %2122 = vst [vmem:[#allocation2 + $0x20] sm:$0x7] %v7020_v59  ;;  %2123 = vst [vmem:[#allocation2 + $0x24] sm:$0x7] %v7020_v59 }
 0x3b1   : > { %2124 = vst [vmem:[#allocation2 + $0x28] sm:$0x7] %v7020_v59  ;;  %2125 = vst [vmem:[#allocation2 + $0x2c] sm:$0x7] %v7020_v59 }
 0x3b2   : > { %6448 = vmatpush3.bf16.msra.mxu1 %v6644_v0  ;;  %2126 = vst [vmem:[#allocation2 + $0x30] sm:$0x7] %v7020_v59  ;;  %2127 = vst [vmem:[#allocation2 + $0x34] sm:$0x7] %v7020_v59  ;;  %v6681_v0 = vld [vmem:[#allocation5 + $0x44] ss:$16 sps:$4 sm:$0xff]  }
 0x3b3   : > { %6449 = vmatprep.subr.bf16.mxu1 %v7018_v3  ;;  %2128 = vst [vmem:[#allocation2 + $0x38] sm:$0x7] %v7020_v59  ;;  %2129 = vst [vmem:[#allocation2 + $0x3c] sm:$0x7] %v7020_v59  ;;  %1901 = vperm.xlu1 %6602, %v1876_v62  }
 0x3b4   : > { %2130 = vst [vmem:[#allocation2 + $0x40] sm:$0x7] %v7020_v59  ;;  %2131 = vst [vmem:[#allocation2 + $0x44] sm:$0x7] %v7020_v59 }
 0x3b5   : > { %2132 = vst [vmem:[#allocation2 + $0x48] sm:$0x7] %v7020_v59  ;;  %2133 = vst [vmem:[#allocation2 + $0x4c] sm:$0x7] %v7020_v59 }
 0x3b6   : > { %6450 = vmatpush3.bf16.msra.mxu1 %v6645_v1  ;;  %2134 = vst [vmem:[#allocation2 + $0x50] sm:$0x7] %v7020_v59  ;;  %2135 = vst [vmem:[#allocation2 + $0x54] sm:$0x7] %v7020_v59  ;;  %v1877_v1 = vld [vmem:[%s7373_s22 + $0x18] sm:$0xff] }
 0x3b7   : > { %6451 = vmatprep.subr.bf16.mxu1 %v7018_v3  ;;  %2136 = vst [vmem:[#allocation2 + $0x58] sm:$0x7] %v7020_v59  ;;  %2137 = vst [vmem:[#allocation2 + $0x5c] sm:$0x7] %v7020_v59  ;;  %1906 = vperm.xlu1 %6602, %v1877_v1  }
 0x3ba   : > { %6452 = vmatpush3.bf16.msra.mxu1 %v6646_v2  ;;  %v6679_v2 = vld [vmem:[#allocation5 + $0x40] ss:$16 sps:$4 sm:$0xff]  }
 0x3bb   : > { %6453 = vmatprep.subr.bf16.mxu1 %v7018_v3 }
 0x3be   : > { %6454 = vmatpush3.bf16.msra.mxu1 %v6647_v4  ;;  %v6687_v4 = vld [vmem:[#allocation5 + $0x64] ss:$16 sps:$4 sm:$0xff]  }
 0x3bf   : > { %6455 = vmatprep.subr.bf16.mxu1 %v7018_v3 }
 0x3c2   : > { %6456 = vmatpush3.bf16.msra.mxu1 %v6648_v6  ;;  %v1878_v6 = vld [vmem:[%s7373_s22 + $0x20] sm:$0xff] }
 0x3c3   : > { %6457 = vmatprep.subr.bf16.mxu1 %v7018_v3  ;;  %1911 = vperm.xlu1 %6602, %v1878_v6  }
 0x3c6   : > { %6458 = vmatpush3.bf16.msra.mxu1 %v6649_v17  ;;  %v5819_v17 = vld [vmem:[%s8001_s3 + $0x6] ss:$0 sm:$0xff] }
 0x3c7   : > { %6459 = vmatprep.subr.bf16.mxu1 %v7018_v3 }
 0x3ca   : > { %6460 = vmatpush3.bf16.msra.mxu1 %v6650_v18 }
 0x3cb   : > { %6485 = vmatprep.subr.bf16.mxu1 %v7018_v3 }
 0x480   : > { %v1005_v8 = vpop.f32.mrb[4].mxu1 }
 0x481   : > { %v1006_v9 = vadd.f32 %v5789_v7, %v1005_v8  ;;  %v6423_v10 = vpop.f32.mrb[5].mxu1  ;;  %v6685_v7 = vld [vmem:[#allocation5 + $0x60] ss:$16 sps:$4 sm:$0xff]   ;;  %v6693_v8 = vld [vmem:[#allocation5 + $0x84] ss:$16 sps:$4 sm:$0xff]  }
 0x482   : > { %v1008_v11 = vpop.f32.mrb[6].mxu1  ;;  %v6691_v10 = vld [vmem:[#allocation5 + $0x80] ss:$16 sps:$4 sm:$0xff]  }
 0x483   : > { %v1011_v12 = vmul.f32 0.2, %v1006_v9  ;;  %v6424_v14 = vpop.f32.mrb[7].mxu1  ;;  %v6699_v11 = vld [vmem:[#allocation5 + $0xa4] ss:$16 sps:$4 sm:$0xff]  }
 0x484   : > { %v6697_v14 = vld [vmem:[#allocation5 + $0xa0] ss:$16 sps:$4 sm:$0xff]  }
 0x485   : > { %v1012_v15 = vmax.f32 %v1006_v9, %v1011_v12  ;;  %v1879_v9 = vld [vmem:[%s7373_s22 + $0x28] sm:$0xff]  ;;  %v1880_v12 = vld [vmem:[%s7373_s22 + $0x30] sm:$0xff] }
 0x486   : > { %1916 = vperm.xlu1 %6602, %v1879_v9  }
 0x487   : > { %v1013_v16 = vpack.c.bf16 %v1012_v15, %v1012_v15  ;;  %v1874_v15 = vld [vmem:[%s7373_s22] sm:$0xff] }
 0x488   : > { %1891 = vperm.xlu0 %6601, %v1874_v15  }
 0x489   : > { %6442 = vmatmul.mubr.bf16.vlgmr.msra.gmra.mrb[8].mxu0 %v1013_v16  ;;  %v1881_v16 = vld [vmem:[%s7373_s22 + $0x38] sm:$0xff] }
 0x48a   : > { %6481 = vmatprep.mubr.msk.bf16.mxu0 %vm7019_vm1, %v7018_v3  ;;  %6466 = vmatpush3.bf16.msra.mxu0 %v6651_v19 }
 0x48b   : > { %6467 = vmatprep.subr.bf16.mxu0 %v7018_v3  ;;  %1921 = vperm.xlu1 %6602, %v1880_v12  }
 0x48e   : > { %6468 = vmatpush3.bf16.msra.mxu0 %v6652_v20 }
 0x48f   : > { %6469 = vmatprep.subr.bf16.mxu0 %v7018_v3  ;;  %1926 = vperm.xlu1 %6602, %v1881_v16  }
 0x492   : > { %6470 = vmatpush3.bf16.msra.mxu0 %v6653_v21 }
 0x493   : > { %6471 = vmatprep.subr.bf16.mxu0 %v7018_v3 }
 0x496   : > { %6472 = vmatpush3.bf16.msra.mxu0 %v6654_v22 }
 0x497   : > { %6473 = vmatprep.subr.bf16.mxu0 %v7018_v3 }
 0x49a   : > { %6474 = vmatpush3.bf16.msra.mxu0 %v6655_v23 }
 0x49b   : > { %6475 = vmatprep.subr.bf16.mxu0 %v7018_v3 }
 0x49e   : > { %6476 = vmatpush3.bf16.msra.mxu0 %v6656_v24 }
 0x49f   : > { %6477 = vmatprep.subr.bf16.mxu0 %v7018_v3 }
 0x4a2   : > { %6478 = vmatpush3.bf16.msra.mxu0 %v6657_v34  ;;  %v6694_v34 = vld [vmem:[#allocation5 + $0x88] ss:$16 sps:$4 sm:$0xff]  }
 0x4a3   : > { %6479 = vmatprep.subr.bf16.mxu0 %v7018_v3 }
 0x4a6   : > { %6480 = vmatpush3.bf16.msra.mxu0 %v6658_v35  ;;  %v6702_v35 = vld [vmem:[#allocation5 + $0xac] ss:$16 sps:$4 sm:$0xff]  }
 0x4a7   : > { %1692 = vmatprep.subr.bf16.mxu0 %v6669_v58  ;;  %v1897_v58 = vpop.permute.xlu1 %1896 }
 0x55c   : > { %v1121_v26 = vpop.f32.mrb[8].mxu0 }
 0x55d   : > { %v1122_v27 = vadd.f32 %v5799_v25, %v1121_v26  ;;  %v6443_v28 = vpop.f32.mrb[9].mxu0  ;;  %v6670_v25 = vld [vmem:[#allocation5 + $0x8] ss:$16 sps:$4 sm:$0xff]  }
 0x55e   : > { %v1124_v29 = vpop.f32.mrb[10].mxu0  ;;  %v6676_v28 = vld [vmem:[#allocation5 + $0x28] ss:$16 sps:$4 sm:$0xff]  }
 0x55f   : > { %v1127_v30 = vmul.f32 0.2, %v1122_v27  ;;  %v6444_v31 = vpop.f32.mrb[11].mxu0  ;;  %v6684_v29 = vld [vmem:[#allocation5 + $0x4c] ss:$16 sps:$4 sm:$0xff]  }
 0x560   : > { %v6690_v31 = vld [vmem:[#allocation5 + $0x6c] ss:$16 sps:$4 sm:$0xff]  }
 0x561   : > { %v1128_v32 = vmax.f32 %v1122_v27, %v1127_v30  ;;  %v6678_v27 = vld [vmem:[#allocation5 + $0x2c] ss:$16 sps:$4 sm:$0xff]   ;;  %v6682_v30 = vld [vmem:[#allocation5 + $0x48] ss:$16 sps:$4 sm:$0xff]  }
 0x563   : > { %v1129_v33 = vpack.c.bf16 %v1128_v32, %v1128_v32  ;;  %v6688_v32 = vld [vmem:[#allocation5 + $0x68] ss:$16 sps:$4 sm:$0xff]  }
 0x565   : > { %6462 = vmatmul.mubr.bf16.vlgmr.msra.gmra.mrb[8].mxu1 %v1129_v33  ;;  %v6696_v33 = vld [vmem:[#allocation5 + $0x8c] ss:$16 sps:$4 sm:$0xff]  }
 0x566   : > { %6501 = vmatprep.mubr.msk.bf16.mxu1 %vm7019_vm1, %v7018_v3  ;;  %6486 = vmatpush3.bf16.msra.mxu1 %v6659_v36  ;;  %v6700_v36 = vld [vmem:[#allocation5 + $0xa8] ss:$16 sps:$4 sm:$0xff]  }
 0x567   : > { %6487 = vmatprep.subr.bf16.mxu1 %v7018_v3 }
 0x56a   : > { %6488 = vmatpush3.bf16.msra.mxu1 %v6660_v37  ;;  %v6705_v37 = vld [vmem:[#allocation5 + $0xc4] ss:$16 sps:$4 sm:$0xff]  }
 0x56b   : > { %6489 = vmatprep.subr.bf16.mxu1 %v7018_v3 }
 0x56e   : > { %6490 = vmatpush3.bf16.msra.mxu1 %v6661_v38  ;;  %v6708_v38 = vld [vmem:[#allocation5 + $0xcc] ss:$16 sps:$4 sm:$0xff]  }
 0x56f   : > { %6491 = vmatprep.subr.bf16.mxu1 %v7018_v3 }
 0x572   : > { %6492 = vmatpush3.bf16.msra.mxu1 %v6662_v43  ;;  %v6703_v43 = vld [vmem:[#allocation5 + $0xc0] ss:$16 sps:$4 sm:$0xff]  }
 0x573   : > { %6493 = vmatprep.subr.bf16.mxu1 %v7018_v3 }
 0x576   : > { %6494 = vmatpush3.bf16.msra.mxu1 %v6663_v44  ;;  %v6706_v44 = vld [vmem:[#allocation5 + $0xc8] ss:$16 sps:$4 sm:$0xff]  }
 0x577   : > { %6495 = vmatprep.subr.bf16.mxu1 %v7018_v3 }
 0x57a   : > { %6496 = vmatpush3.bf16.msra.mxu1 %v6664_v45  ;;  %v6711_v45 = vld [vmem:[#allocation5 + $0xe4] ss:$16 sps:$4 sm:$0xff]  }
 0x57b   : > { %6497 = vmatprep.subr.bf16.mxu1 %v7018_v3 }
 0x57e   : > { %6498 = vmatpush3.bf16.msra.mxu1 %v6665_v55 }
 0x57f   : > { %6499 = vmatprep.subr.bf16.mxu1 %v7018_v3  ;;  %v6672_v3 = vld [vmem:[#allocation5 + $0xc] ss:$16 sps:$4 sm:$0xff]  }
 0x582   : > { %6500 = vmatpush3.bf16.msra.mxu1 %v6666_v56 }
 0x583   : > { %1733 = vmatprep.subr.bf16.mxu1 %v6672_v3 }
 0x638   : > { %v1237_v47 = vpop.f32.mrb[8].mxu1 }
 0x639   : > { %v1238_v48 = vadd.f32 %v5809_v46, %v1237_v47  ;;  %v6463_v49 = vpop.f32.mrb[9].mxu1  ;;  %v6714_v46 = vld [vmem:[#allocation5 + $0xec] ss:$16 sps:$4 sm:$0xff]   ;;  %v6709_v47 = vld [vmem:[#allocation5 + $0xe0] ss:$16 sps:$4 sm:$0xff]  }
 0x63a   : > { %v1240_v50 = vpop.f32.mrb[10].mxu1  ;;  %v5829_v49 = vld [vmem:[%s8001_s3 + $0x7] ss:$0 sm:$0xff] }
 0x63b   : > { %v1243_v51 = vmul.f32 0.2, %v1238_v48  ;;  %v6464_v52 = vpop.f32.mrb[11].mxu1 }
 0x63d   : > { %v1244_v53 = vmax.f32 %v1238_v48, %v1243_v51  ;;  %v6712_v48 = vld [vmem:[#allocation5 + $0xe8] ss:$16 sps:$4 sm:$0xff]  }
 0x63f   : > { %v1245_v54 = vpack.c.bf16 %v1244_v53, %v1244_v53 }
 0x641   : > { %6482 = vmatmul.mubr.bf16.vlgmr.msra.gmra.mrb[12].mxu0 %v1245_v54 }
 0x642   : > { %1724 = vmatprep.mubr.bf16.mxu0 %v7020_v59  ;;  %1693 = vmatpush1.bf16.msra.mxu0 %v6667_v57 }
 0x643   : > { %1694 = vmatprep.subr.bf16.mxu0 %v6675_v61 }
 0x646   : > { %1695 = vmatpush1.bf16.msra.mxu0 %v6673_v63  ;;  %v5870_v63 = vld [vmem:[%s8004_s6] ss:$0 sm:$0xff] }
 0x647   : > { %1696 = vmatprep.subr.bf16.mxu0 %v6681_v0  ;;  %v1892_v0 = vpop.permute.xlu0 %1891  ;;  %v1930_v1 = vmul.f32 %v5870_v63, %v1897_v58  ;;  %v6729_v58 = vld [vmem:[#allocation7 + $0x58] sm:$0xff]  }
 0x649   : > { %v7395_v12 = vadd.f32 1.0, %v1930_v1  ;;  %v6733_v1 = vld [vmem:[#allocation7 + $0x60] sm:$0xff]  }
 0x64a   : > { %1697 = vmatpush1.bf16.msra.mxu0 %v6679_v2 }
 0x64b   : > { %1698 = vmatprep.subr.bf16.mxu0 %v6687_v4  ;;  %v1929_v4 = vmul.f32 %v5870_v63, %v1892_v0  ;;  %v6731_v0 = vld [vmem:[#allocation7 + $0xe0] sm:$0xff]  }
 0x64e   : > { %1699 = vmatpush1.bf16.msra.mxu0 %v6685_v7 }
 0x64f   : > { %1700 = vmatprep.subr.bf16.mxu0 %v6693_v8 }
 0x652   : > { %1701 = vmatpush1.bf16.msra.mxu0 %v6691_v10 }
 0x653   : > { %1702 = vmatprep.subr.bf16.mxu0 %v6699_v11 }
 0x656   : > { %1703 = vmatpush1.bf16.msra.mxu0 %v6697_v14  ;;  %v7397_v14 = vadd.f32 1.0, %v1929_v4 }
 0x657   : > { %1704 = vmatprep.subr.bf16.mxu0 %v6705_v37  ;;  %v6718_v37 = vld [vmem:[#allocation7] sm:$0xff]  }
 0x65a   : > { %1705 = vmatpush1.bf16.msra.mxu0 %v6703_v43 }
 0x65b   : > { %1706 = vmatprep.subr.bf16.mxu0 %v6711_v45 }
 0x65e   : > { %1707 = vmatpush1.bf16.msra.mxu0 %v6709_v47  ;;  %v6722_v47 = vld [vmem:[#allocation7 + $0x8] sm:$0xff]  }
 0x714   : > { %v1353_v18 = vpop.f32.mrb[12].mxu0 }
 0x715   : > { %v1354_v19 = vadd.f32 %v5819_v17, %v1353_v18  ;;  %v6483_v20 = vpop.f32.mrb[13].mxu0 }
 0x716   : > { %v1356_v21 = vpop.f32.mrb[14].mxu0 }
 0x717   : > { %v1359_v22 = vmul.f32 0.2, %v1354_v19  ;;  %v6484_v23 = vpop.f32.mrb[15].mxu0  ;;  %v1945_v21 = vadd.f32 %v7395_v12, %v7397_v14 }
 0x719   : > { %v1360_v24 = vmax.f32 %v1354_v19, %v1359_v22 }
 0x71b   : > { %v1361_v26 = vpack.c.bf16 %v1360_v24, %v1360_v24 }
 0x71d   : > { %6502 = vmatmul.mubr.bf16.vlgmr.msra.gmra.mrb[12].mxu1 %v1361_v26 }
 0x71e   : > { %1734 = vmatpush1.bf16.msra.mxu1 %v6670_v25  ;;  %1765 = vmatprep.mubr.bf16.mxu1 %v7020_v59  ;;  %v1902_v59 = vpop.permute.xlu1 %1901  ;;  %v1946_v25 = vrot.slane %v1945_v21, 4 }
 0x71f   : > { %1735 = vmatprep.subr.bf16.mxu1 %v6678_v27  ;;  %v1931_v6 = vmul.f32 %v5870_v63, %v1902_v59 }
 0x721   : > { %v7399_v15 = vadd.f32 1.0, %v1931_v6 }
 0x722   : > { %1736 = vmatpush1.bf16.msra.mxu1 %v6676_v28  ;;  %v1907_v3 = vpop.permute.xlu1 %1906 }
 0x723   : > { %1737 = vmatprep.subr.bf16.mxu1 %v6684_v29  ;;  %v1932_v7 = vmul.f32 %v5870_v63, %v1907_v3  ;;  %v1947_v29 = vadd.f32 %v1946_v25, %v1945_v21  ;;  %v6738_v25 = vld [vmem:[#allocation7 + $0x28] sm:$0xff]  }
 0x725   : > { %v7401_v16 = vadd.f32 1.0, %v1932_v7  ;;  %v6732_v7 = vld [vmem:[#allocation7 + $0xa0] sm:$0xff]  }
 0x726   : > { %1738 = vmatpush1.bf16.msra.mxu1 %v6682_v30  ;;  %v1912_v60 = vpop.permute.xlu1 %1911 }
 0x727   : > { %1739 = vmatprep.subr.bf16.mxu1 %v6690_v31  ;;  %v1933_v8 = vmul.f32 %v5870_v63, %v1912_v60  ;;  %v1952_v22 = vadd.f32 %v7401_v16, %v7399_v15 }
 0x729   : > { %v7403_v17 = vadd.f32 1.0, %v1933_v8  ;;  %v1953_v26 = vrot.slane %v1952_v22, 4  ;;  %v6734_v8 = vld [vmem:[#allocation7 + $0x20] sm:$0xff]  }
 0x72a   : > { %1740 = vmatpush1.bf16.msra.mxu1 %v6688_v32  ;;  %v1917_v61 = vpop.permute.xlu1 %1916 }
 0x72b   : > { %1741 = vmatprep.subr.bf16.mxu1 %v6696_v33  ;;  %v1934_v9 = vmul.f32 %v5870_v63, %v1917_v61  ;;  %v1954_v30 = vadd.f32 %v1953_v26, %v1952_v22  ;;  %v6715_v33 = vld [vmem:[#allocation7 + $0xc0] sm:$0xff]   ;;  %v6728_v61 = vld [vmem:[#allocation7 + $0x98] sm:$0xff]  }
 0x72d   : > { %v7405_v18 = vadd.f32 1.0, %v1934_v9  ;;  %v1955_v43 = vrot.slane %v1954_v30, 2 }
 0x72e   : > { %1742 = vmatpush1.bf16.msra.mxu1 %v6694_v34  ;;  %v1922_v62 = vpop.permute.xlu1 %1921  ;;  %v6716_v34 = vld [vmem:[#allocation7 + $0x80] sm:$0xff]  }
 0x72f   : > { %1743 = vmatprep.subr.bf16.mxu1 %v6702_v35  ;;  %v1935_v10 = vmul.f32 %v5870_v63, %v1922_v62  ;;  %v1959_v23 = vadd.f32 %v7405_v18, %v7403_v17  ;;  %v6717_v35 = vld [vmem:[#allocation7 + $0x40] sm:$0xff]   ;;  %v6730_v62 = vld [vmem:[#allocation7 + $0x18] sm:$0xff]  }
 0x730   : > { %6161 = vmatprep.subr.bf16.mxu0 %v6717_v35  ;;  %v6740_v35 = vld [vmem:[#allocation7 + $0xb0] sm:$0xff]  }
 0x731   : > { %v7407_v19 = vadd.f32 1.0, %v1935_v10  ;;  %v1960_v27 = vrot.slane %v1959_v23, 4  ;;  %v6735_v10 = vld [vmem:[#allocation7 + $0xe8] sm:$0xff]  }
 0x732   : > { %1744 = vmatpush1.bf16.msra.mxu1 %v6700_v36  ;;  %v1927_v2 = vpop.permute.xlu1 %1926  ;;  %v1948_v36 = vrot.slane %v1947_v29, 2 }
 0x733   : > { %1745 = vmatprep.subr.bf16.mxu1 %v6708_v38  ;;  %v1936_v11 = vmul.f32 %v5870_v63, %v1927_v2  ;;  %v1961_v31 = vadd.f32 %v1960_v27, %v1959_v23  ;;  %v6719_v38 = vld [vmem:[#allocation7 + $0xc8] sm:$0xff]   ;;  %v6739_v27 = vld [vmem:[#allocation7 + $0xf0] sm:$0xff]  }
 0x735   : > { %v7409_v20 = vadd.f32 1.0, %v1936_v11  ;;  %v1962_v45 = vrot.slane %v1961_v31, 2  ;;  %v6737_v11 = vld [vmem:[#allocation7 + $0x68] sm:$0xff]  }
 0x736   : > { %1746 = vmatpush1.bf16.msra.mxu1 %v6706_v44  ;;  %v6721_v44 = vld [vmem:[#allocation7 + $0x48] sm:$0xff]  }
 0x737   : > { %1747 = vmatprep.subr.bf16.mxu1 %v6714_v46  ;;  %v1966_v24 = vadd.f32 %v7409_v20, %v7407_v19  ;;  %v6720_v46 = vld [vmem:[#allocation7 + $0x88] sm:$0xff]  }
 0x739   : > { %v1967_v28 = vrot.slane %v1966_v24, 4 }
 0x73a   : > { %1748 = vmatpush1.bf16.msra.mxu1 %v6712_v48 }
 0x73b   : > { %v1968_v32 = vadd.f32 %v1967_v28, %v1966_v24  ;;  %6201 = vmatprep.subr.bf16.mxu1 %v6715_v33  ;;  %v6736_v24 = vld [vmem:[#allocation7 + $0xa8] sm:$0xff]   ;;  %v6741_v28 = vld [vmem:[#allocation7 + $0x70] sm:$0xff]  }
 0x73d   : > { %v1969_v48 = vrot.slane %v1968_v32, 2 }
 0x7f0   : > { %v1469_v50 = vpop.f32.mrb[12].mxu1 }
 0x7f1   : > { %v1470_v51 = vadd.f32 %v5829_v49, %v1469_v50  ;;  %v6503_v52 = vpop.f32.mrb[13].mxu1  ;;  %v6723_v49 = vld [vmem:[#allocation7 + $0xd0] sm:$0xff]  }
 0x7f2   : > { %v1472_v53 = vpop.f32.mrb[14].mxu1  ;;  %v6725_v50 = vld [vmem:[#allocation7 + $0x50] sm:$0xff]   ;;  %v1956_v52 = vadd.f32 %v1955_v43, %v1954_v30  ;;  %v6744_v43 = vld [vmem:[#allocation7 + $0xb8] sm:$0xff]  }
 0x7f3   : > { %v1475_v54 = vmul.f32 0.2, %v1470_v51  ;;  %v6504_v55 = vpop.f32.mrb[15].mxu1  ;;  %v1963_v53 = vadd.f32 %v1962_v45, %v1961_v31 }
 0x7f4   : > { %v6726_v55 = vld [vmem:[#allocation7 + $0x10] sm:$0xff]   ;;  %v1957_v3 = vrot.slane %v1956_v52, 1 }
 0x7f5   : > { %v1476_v56 = vmax.f32 %v1470_v51, %v1475_v54  ;;  %v1949_v51 = vadd.f32 %v1948_v36, %v1947_v29  ;;  %v6724_v54 = vld [vmem:[#allocation7 + $0x90] sm:$0xff]   ;;  %v1964_v60 = vrot.slane %v1963_v53, 1 }
 0x7f6   : > { %v1958_v4 = vadd.f32 %v1957_v3, %v1956_v52 }
 0x7f7   : > { %v1477_v57 = vpack.c.bf16 %v1476_v56, %v1476_v56  ;;  %v1970_v56 = vadd.f32 %v1969_v48, %v1968_v32  ;;  %v1950_v59 = vrot.slane %v1949_v51, 1  ;;  %v1965_v6 = vadd.f32 %v1964_v60, %v1963_v53  ;;  %v6761_v53 = vld [vmem:[#allocation7 + $0x140] sm:$0xff]  }
 0x7f8   : > { %v1975_v22 = vmul.f32 0.0625, %v1958_v4 }
 0x7f9   : > { %1725 = vmatmul.mubr.bf16.vlgmr.msra.gmra.mrb[16].mxu0 %v1477_v57  ;;  %1766 = vmatmul.mubr.bf16.vlgmr.msra.gmra.mrb[16].mxu1 %v1477_v57  ;;  %v6727_v57 = vld [vmem:[#allocation7 + $0xd8] sm:$0xff]   ;;  %v1971_v63 = vrot.slane %v1970_v56, 1  ;;  %v1951_v2 = vadd.f32 %v1950_v59, %v1949_v51  ;;  %v1976_v23 = vmul.f32 0.0625, %v1965_v6 }
 0x7fa   : > { %6202 = vmatpush3.bf16.msra.mxu1 %v6716_v34  ;;  %6162 = vmatpush3.bf16.msra.mxu0 %v6718_v37  ;;  %v7426_v31 = vsub.f32 %v7399_v15, %v1975_v22  ;;  %v7429_v32 = vsub.f32 %v7401_v16, %v1975_v22  ;;  %v6743_v15 = vld [vmem:[#allocation7 + $0xf8] sm:$0xff]  }
 0x7fb   : > { %6203 = vmatprep.subr.bf16.mxu1 %v6719_v38  ;;  %6163 = vmatprep.subr.bf16.mxu0 %v6721_v44  ;;  %v1972_v9 = vadd.f32 %v1971_v63, %v1970_v56  ;;  %v1974_v21 = vmul.f32 0.0625, %v1951_v2  ;;  %v7432_v33 = vsub.f32 %v7403_v17, %v1976_v23  ;;  %v7435_v34 = vsub.f32 %v7405_v18, %v1976_v23  ;;  %v6745_v16 = vld [vmem:[#allocation7 + $0x78] sm:$0xff]  }
 0x7fc   : > { %v1988_v37 = vmul.f32 %v7426_v31, %v7426_v31  ;;  %v6750_v44 = vld [vmem:[#allocation7 + $0x38] sm:$0xff]  }
 0x7fd   : > { %v1977_v26 = vmul.f32 0.0625, %v1972_v9  ;;  %v7420_v29 = vsub.f32 %v7397_v14, %v1974_v21  ;;  %v7423_v30 = vsub.f32 %v7395_v12, %v1974_v21  ;;  %v6742_v14 = vld [vmem:[#allocation7 + $0x30] sm:$0xff]   ;;  %v1991_v38 = vmul.f32 %v7435_v34, %v7435_v34 }
 0x7fe   : > { %6204 = vmatpush3.bf16.msra.mxu1 %v6720_v46  ;;  %6164 = vmatpush3.bf16.msra.mxu0 %v6722_v47  ;;  %v6751_v47 = vld [vmem:[#allocation7 + $0x1c0] sm:$0xff]  }
 0x7ff   : > { %6205 = vmatprep.subr.bf16.mxu1 %v6723_v49  ;;  %6165 = vmatprep.subr.bf16.mxu0 %v6725_v50  ;;  %v7438_v36 = vsub.f32 %v7407_v19, %v1977_v26  ;;  %v7441_v12 = vsub.f32 %v7409_v20, %v1977_v26  ;;  %v1986_v17 = vmul.f32 %v7420_v29, %v7420_v29 }
 0x800   : > { %v1987_v18 = vmul.f32 %v7423_v30, %v7423_v30  ;;  %v1989_v19 = vmul.f32 %v7429_v32, %v7429_v32  ;;  %v1990_v20 = vmul.f32 %v7432_v33, %v7432_v33 }
 0x801   : > { %v1992_v45 = vmul.f32 %v7438_v36, %v7438_v36  ;;  %v1993_v46 = vmul.f32 %v7441_v12, %v7441_v12 }
 0x802   : > { %6206 = vmatpush3.bf16.msra.mxu1 %v6724_v54  ;;  %6166 = vmatpush3.bf16.msra.mxu0 %v6726_v55  ;;  %v1994_v48 = vadd.f32 %v1987_v18, %v1986_v17  ;;  %v2001_v49 = vadd.f32 %v1989_v19, %v1988_v37  ;;  %v2008_v50 = vadd.f32 %v1991_v38, %v1990_v20  ;;  %v6757_v17 = vld [vmem:[#allocation2] ss:$0 sps:$4 sm:$0x77]   ;;  %v6764_v19 = vld [vmem:[#allocation2 + $0x18] ss:$0 sps:$4 sm:$0x77]  }
 0x803   : > { %6207 = vmatprep.subr.bf16.mxu1 %v6727_v57  ;;  %6167 = vmatprep.subr.bf16.mxu0 %v6729_v58  ;;  %v2015_v51 = vadd.f32 %v1993_v46, %v1992_v45  ;;  %v1510_v18 = vld [vmem:[%s8003_s5] sm:$0xf]  ;;  %v2702_v38 = vshll.u32 %v6757_v17, 16  ;;  %v7465_v46 = vld [vmem:[#allocation2 + $0x30] ss:$0 sps:$4 sm:$0x77]  }
 0x804   : > { %v1995_v52 = vrot.slane %v1994_v48, 4  ;;  %v2002_v54 = vrot.slane %v2001_v49, 4  ;;  %v2009_v55 = vrot.slane %v2008_v50, 4  ;;  %v1515_v20 = vrot.slane %v1510_v18, %v7248_v39 }
 0x805   : > { %v2016_v56 = vrot.slane %v2015_v51, 4 }
 0x806   : > { %6208 = vmatpush3.bf16.msra.mxu1 %v6728_v61  ;;  %6168 = vmatpush3.bf16.msra.mxu0 %v6730_v62  ;;  %v1996_v57 = vadd.f32 %v1995_v52, %v1994_v48  ;;  %v2003_v58 = vadd.f32 %v2002_v54, %v2001_v49  ;;  %v2010_v59 = vadd.f32 %v2009_v55, %v2008_v50 }
 0x807   : > { %6209 = vmatprep.subr.bf16.mxu1 %v6731_v0  ;;  %6169 = vmatprep.subr.bf16.mxu0 %v6733_v1  ;;  %v2017_v3 = vadd.f32 %v2016_v56, %v2015_v51  ;;  %v2730_v51 = vshll.u32 %v6764_v19, 16 }
 0x808   : > { %v1997_v60 = vrot.slane %v1996_v57, 2  ;;  %v2004_v61 = vrot.slane %v2003_v58, 2  ;;  %v2011_v62 = vrot.slane %v2010_v59, 2 }
 0x809   : > { %v2018_v63 = vrot.slane %v2017_v3, 2 }
 0x80a   : > { %6210 = vmatpush3.bf16.msra.mxu1 %v6732_v7  ;;  %6170 = vmatpush3.bf16.msra.mxu0 %v6734_v8  ;;  %v1998_v0 = vadd.f32 %v1997_v60, %v1996_v57  ;;  %v2005_v1 = vadd.f32 %v2004_v61, %v2003_v58  ;;  %v2012_v2 = vadd.f32 %v2011_v62, %v2010_v59  ;;  %v2700_v57 = vshrl.u32 %v6757_v17, 16 }
 0x80b   : > { %6211 = vmatprep.subr.bf16.mxu1 %v6735_v10  ;;  %6171 = vmatprep.subr.bf16.mxu0 %v6737_v11  ;;  %v2019_v4 = vadd.f32 %v2018_v63, %v2017_v3  ;;  %v7478_v63 = vld [vmem:[#allocation2 + $0x48] ss:$0 sps:$4 sm:$0x77]  }
 0x80c   : > { %v1999_v6 = vrot.slane %v1998_v0, 1  ;;  %v2006_v7 = vrot.slane %v2005_v1, 1  ;;  %v2013_v8 = vrot.slane %v2012_v2, 1 }
 0x80d   : > { %v2020_v9 = vrot.slane %v2019_v4, 1 }
 0x80e   : > { %6212 = vmatpush3.bf16.msra.mxu1 %v6736_v24  ;;  %6172 = vmatpush3.bf16.msra.mxu0 %v6738_v25  ;;  %v2000_v10 = vadd.f32 %v1999_v6, %v1998_v0  ;;  %v2007_v11 = vadd.f32 %v2006_v7, %v2005_v1  ;;  %v2014_v21 = vadd.f32 %v2013_v8, %v2012_v2  ;;  %v2758_v6 = vshll.u32 %v7465_v46, 16 }
 0x80f   : > { %6213 = vmatprep.subr.bf16.mxu1 %v6739_v27  ;;  %6173 = vmatprep.subr.bf16.mxu0 %v6741_v28  ;;  %v2021_v22 = vadd.f32 %v2020_v9, %v2019_v4  ;;  %v2732_v7 = vrot.slane %v2730_v51, 1 }
 0x810   : > { %v2022_v23 = vmul.f32 0.0625, %v2000_v10  ;;  %v2023_v24 = vmul.f32 0.0625, %v2007_v11  ;;  %v2024_v25 = vmul.f32 0.0625, %v2014_v21  ;;  %v2756_v21 = vshrl.u32 %v7465_v46, 16 }
 0x811   : > { %v2025_v26 = vmul.f32 0.0625, %v2021_v22  ;;  %v2786_v22 = vshll.u32 %v7478_v63, 16 }
 0x812   : > { %6214 = vmatpush3.bf16.msra.mxu1 %v6740_v35  ;;  %6174 = vmatpush3.bf16.msra.mxu0 %v6742_v14  ;;  %v2026_v27 = vadd.f32 1e-05, %v2022_v23  ;;  %v2027_v28 = vadd.f32 1e-05, %v2023_v24  ;;  %v2028_v35 = vadd.f32 1e-05, %v2024_v25 }
 0x813   : > { %6215 = vmatprep.subr.bf16.mxu1 %v6743_v15  ;;  %6175 = vmatprep.subr.bf16.mxu0 %v6745_v16  ;;  %v2029_v14 = vadd.f32 1e-05, %v2025_v26  ;;  %v7021_v15 = vmov 1983009808   ;;  %v2760_v25 = vrot.slane %v2758_v6, 1 }
 0x814   : > { %6893 = vrsqrt.f32 %v2026_v27  ;;  %v2148_v16 = vunpack.c.l.s4 %v7021_v15 }
 0x815   : > { %6895 = vrsqrt.f32 %v2027_v28  ;;  %v2784_v28 = vshrl.u32 %v7478_v63, 16 }
 0x816   : > { %6216 = vmatpush3.bf16.msra.mxu1 %v6744_v43  ;;  %6176 = vmatpush3.bf16.msra.mxu0 %v6750_v44  ;;  %6897 = vrsqrt.f32 %v2028_v35  ;;  %v2149_v37 = vunpack.c.0.s8 %v2148_v16  ;;  %v1519_v44 = vrot.slane %v1510_v18, %v511_v40  ;;  %v2704_v40 = vrot.slane %v2702_v38, 1 }
 0x817   : > { %6281 = vmatprep.subr.bf16.mxu1 %v6751_v47  ;;  %6241 = vmatprep.subr.bf16.mxu0 %v6761_v53  ;;  %6899 = vrsqrt.f32 %v2029_v14 }
 0x818   : > { %v7468_v48 = vsub.s32 %v2149_v37, %v7201_v5 }
 0x81e   : > { %v6894_v43 = vpop.eup %6893 }
 0x81f   : > { %v6896_v45 = vpop.eup %6895  ;;  %v2034_v53 = vmul.f32 %v6894_v43, %v7420_v29  ;;  %v2035_v3 = vmul.f32 %v6894_v43, %v7423_v30  ;;  %v2728_v30 = vshrl.u32 %v6764_v19, 16  ;;  %v7502_v19 = vrot.slane %v2786_v22, 1 }
 0x820   : > { %v6898_v47 = vpop.eup %6897  ;;  %v2036_v58 = vmul.f32 %v6896_v45, %v7426_v31  ;;  %v2037_v59 = vmul.f32 %v6896_v45, %v7429_v32 }
 0x821   : > { %v6900_v52 = vpop.eup %6899  ;;  %v2038_v0 = vmul.f32 %v6898_v47, %v7432_v33  ;;  %v2039_v29 = vmul.f32 %v6898_v47, %v7435_v34  ;;  %v7488_v33 = vor.u32 %v2704_v40, %v2700_v57  ;;  %v7496_v27 = vor.u32 %v2732_v7, %v2728_v30 }
 0x822   : > { %v2040_v31 = vmul.f32 %v6900_v52, %v7438_v36  ;;  %v2041_v8 = vmul.f32 %v6900_v52, %v7441_v12 }
 0x8cc   : > { %v1726_v49 = vpop.f32.mrb[16].mxu0  ;;  %v7470_v50 = vpop.f32.mrb[16].mxu1 }
 0x8cd   : > { %v1727_v54 = vadd.f32 %v1726_v49, %v1515_v20  ;;  %v1728_v55 = vpop.f32.mrb[17].mxu0  ;;  %v7473_v56 = vpop.f32.mrb[17].mxu1 }
 0x8ce   : > { %v1729_v60 = vadd.f32 %v1728_v55, %v1519_v44  ;;  %v1730_v61 = vpop.f32.mrb[18].mxu0  ;;  %v1771_v62 = vpop.f32.mrb[18].mxu1 }
 0x8cf   : > { %v1781_v1 = vrot.slane %v1727_v54, %v7222_v13  ;;  %v1731_v2 = vpop.f32.mrb[19].mxu0  ;;  %v1772_v4 = vpop.f32.mrb[19].mxu1 }
 0x8d0   : > { %v1806_v32 = vrot.slane %v1729_v60, %v7222_v13  ;;  %v7508_v60 = vld [vmem:[#allocation2 + $0x14] ss:$0 sps:$4 sm:$0x77]   ;;  %v7510_v2 = vor.u32 %v2760_v25, %v2756_v21 }
 0x8d1   : > { %v1782_v9 = vcombine.high %v1781_v1, %v1781_v1  ;;  %v1789_v10 = vrot.slane %v1781_v1, %v7222_v13  ;;  %v3171_v22 = vshll.u32 %v7508_v60, 16 }
 0x8d2   : > { %v1807_v34 = vcombine.high %v1806_v32, %v1806_v32  ;;  %v1814_v11 = vrot.slane %v1806_v32, %v7222_v13 }
 0x8d3   : > { %v1796_v36 = vrot.slane %v1782_v9, %v7222_v13  ;;  %v1797_v23 = vcombine.high %v1789_v10, %v1789_v10  ;;  %v2045_v24 = vrot.slane %v1789_v10, %v7248_v39 }
 0x8d4   : > { %v1821_v12 = vrot.slane %v1807_v34, %v7222_v13  ;;  %v1822_v26 = vcombine.high %v1814_v11, %v1814_v11  ;;  %v2073_v37 = vrot.slane %v1814_v11, %v7248_v39 }
 0x8d5   : > { %v1798_v35 = vcombine.high %v1796_v36, %v1796_v36  ;;  %v2049_v14 = vrot.slane %v1796_v36, %v7248_v39  ;;  %v2053_v15 = vrot.slane %v1797_v23, %v7248_v39  ;;  %v2062_v16 = vmul.f32 %v2045_v24, %v2034_v53 }
 0x8d6   : > { %v2063_v17 = vmul.f32 %v2045_v24, %v2035_v3  ;;  %v1823_v18 = vcombine.high %v1821_v12, %v1821_v12  ;;  %v2077_v46 = vrot.slane %v1821_v12, %v7248_v39  ;;  %v2081_v47 = vrot.slane %v1822_v26, %v7248_v39 }
 0x8d7   : > { %v2057_v20 = vrot.slane %v1798_v35, %v7248_v39  ;;  %v2064_v38 = vmul.f32 %v2049_v14, %v2036_v58  ;;  %v2065_v43 = vmul.f32 %v2049_v14, %v2037_v59  ;;  %v2066_v44 = vmul.f32 %v2053_v15, %v2038_v0 }
 0x8d8   : > { %v2067_v45 = vmul.f32 %v2053_v15, %v2039_v29  ;;  %v2085_v49 = vrot.slane %v1823_v18, %v7248_v39  ;;  %v2090_v53 = vadd.f32 %v2073_v37, %v2062_v16  ;;  %v2091_v54 = vadd.f32 %v2073_v37, %v2063_v17 }
 0x8d9   : > { %v2068_v51 = vmul.f32 %v2057_v20, %v2040_v31  ;;  %v2069_v52 = vmul.f32 %v2057_v20, %v2041_v8  ;;  %v2092_v55 = vadd.f32 %v2077_v46, %v2064_v38  ;;  %v2093_v57 = vadd.f32 %v2077_v46, %v2065_v43 }
 0x8da   : > { %v2094_v40 = vadd.f32 %v2081_v47, %v2066_v44  ;;  %v2095_v3 = vadd.f32 %v2081_v47, %v2067_v45  ;;  %v2098_v61 = vmul.f32 0.2, %v2090_v53  ;;  %v2099_v62 = vmul.f32 0.2, %v2091_v54 }
 0x8db   : > { %v2096_v58 = vadd.f32 %v2085_v49, %v2068_v51  ;;  %v2097_v59 = vadd.f32 %v2085_v49, %v2069_v52  ;;  %v2100_v0 = vmul.f32 0.2, %v2092_v55  ;;  %v2101_v29 = vmul.f32 0.2, %v2093_v57 }
 0x8dc   : > { %v2102_v1 = vmul.f32 0.2, %v2094_v40  ;;  %v2103_v4 = vmul.f32 0.2, %v2095_v3  ;;  %v2106_v32 = vmax.f32 %v2090_v53, %v2098_v61  ;;  %v2107_v30 = vmax.f32 %v2091_v54, %v2099_v62 }
 0x8dd   : > { %v2104_v6 = vmul.f32 0.2, %v2096_v58  ;;  %v2105_v31 = vmul.f32 0.2, %v2097_v59  ;;  %v2108_v7 = vmax.f32 %v2092_v55, %v2100_v0  ;;  %v2109_v8 = vmax.f32 %v2093_v57, %v2101_v29 }
 0x8de   : > { %v2110_v9 = vmax.f32 %v2094_v40, %v2102_v1  ;;  %v2111_v10 = vmax.f32 %v2095_v3, %v2103_v4  ;;  %v2138_v36 = vpack.c.bf16 %v2107_v30, %v2106_v32  ;;  %v5871_v24 = vpack.c.bf16 %v2107_v30, %v2107_v30 }
 0x8df   : > { %v2112_v34 = vmax.f32 %v2096_v58, %v2104_v6  ;;  %v2113_v11 = vmax.f32 %v2097_v59, %v2105_v31  ;;  %v2139_v23 = vpack.c.bf16 %v2109_v8, %v2108_v7  ;;  %v5872_v12 = vpack.c.bf16 %v2109_v8, %v2109_v8 }
 0x8e0   : > { %v2140_v26 = vpack.c.bf16 %v2111_v10, %v2110_v9  ;;  %v5873_v25 = vpack.c.bf16 %v2111_v10, %v2111_v10  ;;  %v2153_v14 = vrot.slane %v2138_v36, %v7468_v48  ;;  %v2160_v15 = vrot.slane %v5871_v24, %v7468_v48 }
 0x8e1   : > { %v2141_v21 = vpack.c.bf16 %v2113_v11, %v2112_v34  ;;  %v5874_v35 = vpack.c.bf16 %v2113_v11, %v2113_v11  ;;  %v2170_v16 = vrot.slane %v2139_v23, %v7468_v48  ;;  %v2177_v17 = vrot.slane %v5872_v12, %v7468_v48 }
 0x8e2   : > { %v2187_v18 = vrot.slane %v2140_v26, %v7468_v48  ;;  %v2194_v37 = vrot.slane %v5873_v25, %v7468_v48  ;;  %v2161_v43 = vcombine.high %v2153_v14, %v2153_v14  ;;  %v2162_v44 = vcombine.high %v2160_v15, %v2160_v15 }
 0x8e3   : > { %v2204_v20 = vrot.slane %v2141_v21, %v7468_v48  ;;  %v2211_v38 = vrot.slane %v5874_v35, %v7468_v48  ;;  %v2178_v45 = vcombine.high %v2170_v16, %v2170_v16  ;;  %v2179_v46 = vcombine.high %v2177_v17, %v2177_v17 }
 0x8e4   : > { %v2195_v47 = vcombine.high %v2187_v18, %v2187_v18  ;;  %v2196_v49 = vcombine.high %v2194_v37, %v2194_v37  ;;  %v2220_v53 = vrot.slane %v2153_v14, %v7468_v48  ;;  %v2227_v54 = vrot.slane %v2161_v43, %v7468_v48 }
 0x8e5   : > { %v2212_v51 = vcombine.high %v2204_v20, %v2204_v20  ;;  %v2213_v52 = vcombine.high %v2211_v38, %v2211_v38  ;;  %v2234_v55 = vrot.slane %v2160_v15, %v7468_v48  ;;  %v2241_v57 = vrot.slane %v2162_v44, %v7468_v48 }
 0x8e6   : > { %v2248_v40 = vrot.slane %v2170_v16, %v7468_v48  ;;  %v2255_v3 = vrot.slane %v2178_v45, %v7468_v48  ;;  %v2262_v58 = vrot.slane %v2177_v17, %v7468_v48  ;;  %v2269_v59 = vrot.slane %v2179_v46, %v7468_v48 }
 0x8e7   : > { %v2276_v61 = vrot.slane %v2187_v18, %v7468_v48  ;;  %v2283_v62 = vrot.slane %v2195_v47, %v7468_v48  ;;  %v7532_v0 = vrot.slane %v2194_v37, %v7468_v48  ;;  %v7535_v29 = vrot.slane %v2196_v49, %v7468_v48 }
 0x8e8   : > { %v7538_v1 = vrot.slane %v2204_v20, %v7468_v48  ;;  %v7541_v4 = vrot.slane %v2212_v51, %v7468_v48  ;;  %v7544_v6 = vrot.slane %v2211_v38, %v7468_v48  ;;  %v7547_v31 = vrot.slane %v2213_v52, %v7468_v48 }
 0x8e9   : > { %v2327_v32 = vshrl.u32 %v2220_v53, 16  ;;  %v2330_v30 = vshll.u32 %v2220_v53, 16  ;;  %v2334_v7 = vshrl.u32 %v2227_v54, 16  ;;  %v2337_v8 = vshll.u32 %v2227_v54, 16 }
 0x8ea   : > { %v2341_v9 = vshrl.u32 %v2234_v55, 16  ;;  %v2344_v10 = vshll.u32 %v2234_v55, 16  ;;  %v2348_v34 = vshrl.u32 %v2241_v57, 16  ;;  %v2351_v11 = vshll.u32 %v2241_v57, 16 }
 0x8eb   : > { %v2329_v36 = vrot.slane %v2327_v32, 7  ;;  %v2336_v23 = vrot.slane %v2334_v7, 7  ;;  %v2355_v24 = vshrl.u32 %v2248_v40, 16  ;;  %v2358_v12 = vshll.u32 %v2248_v40, 16 }
 0x8ec   : > { %v2343_v26 = vrot.slane %v2341_v9, 7  ;;  %v2350_v21 = vrot.slane %v2348_v34, 7  ;;  %v2362_v25 = vshrl.u32 %v2255_v3, 16  ;;  %v2365_v35 = vshll.u32 %v2255_v3, 16  ;;  %v2461_v9 = vld [vmem:[#allocation2 + $0x8] sm:$0x7] }
 0x8ed   : > { %v7549_v14 = vor.u32 %v2330_v30, %v2329_v36  ;;  %v7551_v15 = vor.u32 %v2337_v8, %v2336_v23  ;;  %v2357_v16 = vrot.slane %v2355_v24, 7  ;;  %v2369_v17 = vshrl.u32 %v2262_v58, 16  ;;  %v2458_v30 = vld [vmem:[#allocation2 + $0x4] sm:$0x7]  ;;  %v2467_v23 = vld [vmem:[#allocation2 + $0x10] sm:$0x7] }
 0x8ee   : > { %v7553_v18 = vor.u32 %v2344_v10, %v2343_v26  ;;  %v7555_v37 = vor.u32 %v2351_v11, %v2350_v21  ;;  %v2364_v20 = vrot.slane %v2362_v25, 7  ;;  %v2372_v38 = vshll.u32 %v2262_v58, 16  ;;  %v2464_v10 = vld [vmem:[#allocation2 + $0xc] sm:$0x7]  ;;  %v2470_v24 = vld [vmem:[#allocation2 + $0x1c] sm:$0x7] }
 0x8ef   : > { %v7557_v43 = vor.u32 %v2358_v12, %v2357_v16  ;;  %v2371_v44 = vrot.slane %v2369_v17, 7  ;;  %v2376_v45 = vshrl.u32 %v2269_v59, 16  ;;  %v2379_v46 = vshll.u32 %v2269_v59, 16  ;;  %v2473_v12 = vld [vmem:[#allocation2 + $0x20] sm:$0x7] }
 0x8f0   : > { %v7559_v47 = vor.u32 %v2365_v35, %v2364_v20  ;;  %v2383_v49 = vshrl.u32 %v2276_v61, 16  ;;  %v2386_v51 = vshll.u32 %v2276_v61, 16  ;;  %v2390_v52 = vshrl.u32 %v2283_v62, 16  ;;  %v2476_v35 = vld [vmem:[#allocation2 + $0x24] sm:$0x7] }
 0x8f1   : > { %v7561_v53 = vor.u32 %v2372_v38, %v2371_v44  ;;  %v2378_v54 = vrot.slane %v2376_v45, 7  ;;  %v2393_v55 = vshll.u32 %v2283_v62, 16  ;;  %v2397_v57 = vshrl.u32 %v7532_v0, 16  ;;  %v2479_v16 = vld [vmem:[#allocation2 + $0x28] sm:$0x7] }
 0x8f2   : > { %v2385_v40 = vrot.slane %v2383_v49, 7  ;;  %v2392_v3 = vrot.slane %v2390_v52, 7  ;;  %v2400_v58 = vshll.u32 %v7532_v0, 16  ;;  %v2404_v32 = vshrl.u32 %v7535_v29, 16  ;;  %v2482_v44 = vld [vmem:[#allocation2 + $0x34] sm:$0x7] }
 0x8f3   : > { %v2381_v7 = vor.u32 %v2379_v46, %v2378_v54  ;;  %v2399_v59 = vrot.slane %v2397_v57, 7  ;;  %v2407_v8 = vshll.u32 %v7535_v29, 16  ;;  %v2411_v61 = vshrl.u32 %v7538_v1, 16  ;;  %v2485_v45 = vld [vmem:[#allocation2 + $0x38] sm:$0x7] }
 0x8f4   : > { %v2388_v34 = vor.u32 %v2386_v51, %v2385_v40  ;;  %v2395_v11 = vor.u32 %v2393_v55, %v2392_v3  ;;  %v2406_v62 = vrot.slane %v2404_v32, 7  ;;  %v2414_v36 = vshll.u32 %v7538_v1, 16  ;;  %v2488_v46 = vld [vmem:[#allocation2 + $0x3c] sm:$0x7]  ;;  %v2491_v49 = vld [vmem:[#allocation2 + $0x40] sm:$0x7] }
 0x8f5   : > { %v2402_v26 = vor.u32 %v2400_v58, %v2399_v59  ;;  %v2413_v29 = vrot.slane %v2411_v61, 7  ;;  %v2418_v21 = vshrl.u32 %v7541_v4, 16  ;;  %v2421_v25 = vshll.u32 %v7541_v4, 16  ;;  %v2494_v55 = vld [vmem:[#allocation2 + $0x4c] sm:$0x7] }
 0x8f6   : > { %v2409_v17 = vor.u32 %v2407_v8, %v2406_v62  ;;  %v2425_v1 = vshrl.u32 %v7544_v6, 16  ;;  %v2428_v20 = vshll.u32 %v7544_v6, 16  ;;  %v2432_v38 = vshrl.u32 %v7547_v31, 16  ;;  %v2497_v57 = vld [vmem:[#allocation2 + $0x50] sm:$0x7] }
 0x8f7   : > { %v2416_v51 = vor.u32 %v2414_v36, %v2413_v29  ;;  %v2420_v52 = vrot.slane %v2418_v21, 7  ;;  %v2435_v54 = vshll.u32 %v7547_v31, 16  ;;  %v2459_v4 = vsel %vm7571_vm7, %v7549_v14, %v2458_v30  ;;  %v2500_v40 = vld [vmem:[#allocation2 + $0x54] sm:$0x7]  ;;  %v2503_v3 = vld [vmem:[#allocation2 + $0x58] sm:$0x7] }
 0x8f8   : > { %v2427_v58 = vrot.slane %v2425_v1, 7  ;;  %v2434_v6 = vrot.slane %v2432_v38, 7  ;;  %2460 = vst [vmem:[#allocation2 + $0x4] sm:$0x7] %v2459_v4  ;;  %v2462_v32 = vsel %vm7571_vm7, %v7551_v15, %v2461_v9  ;;  %v2465_v59 = vsel %vm7571_vm7, %v7553_v18, %v2464_v10  ;;  %v2510_v29 = vld [vmem:[#allocation2 + $0x18] sm:$0x3] }
 0x8f9   : > { %v7590_v31 = vld [vmem:[#allocation2] ss:$0 sps:$4 sm:$0x66]   ;;  %v2423_v8 = vor.u32 %v2421_v25, %v2420_v52  ;;  %2463 = vst [vmem:[#allocation2 + $0x8] sm:$0x7] %v2462_v32  ;;  %v2468_v14 = vsel %vm7571_vm7, %v7555_v37, %v2467_v23  ;;  %v2471_v30 = vsel %vm7571_vm7, %v7557_v43, %v2470_v24  ;;  %v2474_v15 = vsel %vm7571_vm7, %v7559_v47, %v2473_v12 }
 0x8fa   : > { %2466 = vst [vmem:[#allocation2 + $0xc] sm:$0x7] %v2465_v59  ;;  %v7601_v61 = vld [vmem:[#allocation2 + $0x18] ss:$0 sps:$4 sm:$0x66]   ;;  %v2430_v9 = vor.u32 %v2428_v20, %v2427_v58  ;;  %v2437_v10 = vor.u32 %v2435_v54, %v2434_v6  ;;  %v2477_v37 = vsel %vm7571_vm7, %v7561_v53, %v2476_v35  ;;  %v2480_v43 = vsel %vm7571_vm7, %v2381_v7, %v2479_v16 }
 0x8fb   : > { %v7603_v18 = vld [vmem:[#allocation2 + $0x2c] ss:$0 sps:$4 sm:$0x77]   ;;  %2469 = vst [vmem:[#allocation2 + $0x10] sm:$0x7] %v2468_v14  ;;  %v2483_v47 = vsel %vm7571_vm7, %v2388_v34, %v2482_v44  ;;  %v2486_v23 = vsel %vm7571_vm7, %v2395_v11, %v2485_v45  ;;  %v2489_v24 = vsel %vm7571_vm7, %v2402_v26, %v2488_v46  ;;  %v2492_v53 = vsel %vm7571_vm7, %v2409_v17, %v2491_v49 }
 0x8fc   : > { %2472 = vst [vmem:[#allocation2 + $0x1c] sm:$0x7] %v2471_v30  ;;  %2475 = vst [vmem:[#allocation2 + $0x20] sm:$0x7] %v2474_v15  ;;  %v2495_v7 = vsel %vm7571_vm7, %v2416_v51, %v2494_v55  ;;  %v2498_v12 = vsel %vm7571_vm7, %v2423_v8, %v2497_v57  ;;  %v2501_v34 = vsel %vm7571_vm7, %v2430_v9, %v2500_v40  ;;  %v2506_v26 = vld [vmem:[#allocation2] sm:$0x3] }
 0x8fd   : > { %v7610_v62 = vld [vmem:[#allocation2 + $0x30] ss:$0 sps:$4 sm:$0x66]   ;;  %v7612_v36 = vld [vmem:[#allocation2 + $0x48] ss:$0 sps:$4 sm:$0x66]   ;;  %v2504_v11 = vsel %vm7571_vm7, %v2437_v10, %v2503_v3  ;;  %v3371_v45 = vcombine.low %v2506_v26, %v7488_v33  ;;  %v3535_v51 = vcombine.low %v2510_v29, %v7496_v27 }
 0x8fe   : > { %2478 = vst [vmem:[#allocation2 + $0x24] sm:$0x7] %v2477_v37  ;;  %2481 = vst [vmem:[#allocation2 + $0x28] sm:$0x7] %v2480_v43  ;;  %v2514_v21 = vld [vmem:[#allocation2 + $0x30] sm:$0x3] }
 0x8ff   : > { %2484 = vst [vmem:[#allocation2 + $0x34] sm:$0x7] %v2483_v47  ;;  %2487 = vst [vmem:[#allocation2 + $0x38] sm:$0x7] %v2486_v23  ;;  %v3169_v25 = vshrl.u32 %v7508_v60, 16  ;;  %v3173_v35 = vrot.slane %v3171_v22, 1  ;;  %v2789_v60 = vor.u32 %v7502_v19, %v2784_v28  ;;  %v3699_v52 = vcombine.low %v2514_v21, %v7510_v2 }
 0x900   : > { %2490 = vst [vmem:[#allocation2 + $0x3c] sm:$0x7] %v2489_v24  ;;  %2493 = vst [vmem:[#allocation2 + $0x40] sm:$0x7] %v2492_v53  ;;  %v3199_v16 = vshll.u32 %v7603_v18, 16  ;;  %v2859_v1 = vrot.slane %v7590_v31, 1  ;;  %v7651_v19 = vrot.slane %v3371_v45, %v7468_v48  ;;  %v7655_v31 = vrot.slane %v3535_v51, %v7468_v48 }
 0x901   : > { %2496 = vst [vmem:[#allocation2 + $0x4c] sm:$0x7] %v2495_v7  ;;  %2499 = vst [vmem:[#allocation2 + $0x50] sm:$0x7] %v2498_v12  ;;  %v2863_v0 = vrot.slane %v7601_v61, 1  ;;  %v2867_v20 = vrot.slane %v7610_v62, 1  ;;  %v3174_v55 = vor.u32 %v3173_v35, %v3169_v25  ;;  %v7658_v8 = vrot.slane %v3699_v52, %v7468_v48 }
 0x902   : > { %2502 = vst [vmem:[#allocation2 + $0x54] sm:$0x7] %v2501_v34  ;;  %2505 = vst [vmem:[#allocation2 + $0x58] sm:$0x7] %v2504_v11  ;;  %v2871_v38 = vrot.slane %v7612_v36, 1  ;;  %v3197_v22 = vshrl.u32 %v7603_v18, 16 }
 0x903   : > { %v7634_v17 = vld [vmem:[#allocation2 + $0x44] ss:$0 sps:$4 sm:$0x77]   ;;  %v2518_v44 = vld [vmem:[#allocation2 + $0x48] sm:$0x3]  ;;  %v3201_v57 = vrot.slane %v3199_v16, 1 }
 0x904   : > { %v7645_v46 = vld [vmem:[#allocation2 + $0x5c] ss:$0 sps:$4 sm:$0x77]   ;;  %v2554_v49 = vld [vmem:[#allocation2 + $0x4] sm:$0x3]  ;;  %v3227_v40 = vshll.u32 %v7634_v17, 16  ;;  %v3863_v6 = vcombine.low %v2518_v44, %v2789_v60 }
 0x905   : > { %v2606_v54 = vld [vmem:[#allocation2 + $0x14] sm:$0x3]  ;;  %v2555_v4 = vld [vmem:[#allocation2 + $0x8] sm:$0x3]  ;;  %v2557_v33 = vld [vmem:[#allocation2 + $0x10] sm:$0x3]  ;;  %v3372_v28 = vcombine.low %v2859_v1, %v2554_v49  ;;  %v7665_v24 = vor.u32 %v3201_v57, %v3197_v22 }
 0x906   : > { %v6747_v3 = vld [vmem:[#allocation2 + $0x4] ss:$0 sps:$4 sm:$0x66]   ;;  %v6748_v63 = vld [vmem:[#allocation2 + $0x8] ss:$0 sps:$4 sm:$0x66]   ;;  %v3512_v61 = vcombine.low %v2606_v54, %v3174_v55  ;;  %v7670_v29 = vrot.slane %v3863_v6, %v7468_v48 }
 0x907   : > { %v6749_v58 = vld [vmem:[#allocation2 + $0xc] ss:$0 sps:$4 sm:$0x66]   ;;  %v3255_v32 = vshll.u32 %v7645_v46, 16  ;;  %v2860_v27 = vrot.slane %v6747_v3, 1  ;;  %v2861_v59 = vrot.slane %v6748_v63, 1  ;;  %v3386_v7 = vrot.slane %v3372_v28, %v7468_v48 }
 0x908   : > { %v2558_v2 = vld [vmem:[#allocation2 + $0x1c] sm:$0x3]  ;;  %v7660_v14 = vld [vmem:[#allocation2 + $0x14] ss:$0 sps:$4 sm:$0x66]   ;;  %v2862_v15 = vrot.slane %v6749_v58, 1  ;;  %v7678_v22 = vrot.slane %v3512_v61, %v7468_v48 }
 0x909   : > { %v2556_v30 = vld [vmem:[#allocation2 + $0xc] sm:$0x3]  ;;  %v3225_v9 = vshrl.u32 %v7634_v17, 16  ;;  %v3229_v10 = vrot.slane %v3227_v40, 1  ;;  %v3413_v37 = vcombine.low %v2860_v27, %v2555_v4  ;;  %v2559_v47 = vld [vmem:[#allocation2 + $0x20] sm:$0x3]  ;;  %v3536_v26 = vcombine.low %v2863_v0, %v2558_v2 }
 0x90a   : > { %v7662_v18 = vld [vmem:[#allocation2 + $0x2c] sm:$0x3]  ;;  %v3454_v43 = vcombine.low %v2861_v59, %v2556_v30  ;;  %v6753_v23 = vld [vmem:[#allocation2 + $0x1c] ss:$0 sps:$4 sm:$0x66]   ;;  %v3253_v53 = vshrl.u32 %v7645_v46, 16  ;;  %v3495_v12 = vcombine.low %v2862_v15, %v2557_v33 }
 0x90b   : > { %v6754_v34 = vld [vmem:[#allocation2 + $0x20] ss:$0 sps:$4 sm:$0x66]   ;;  %v6755_v11 = vld [vmem:[#allocation2 + $0x24] ss:$0 sps:$4 sm:$0x66]   ;;  %v3427_v21 = vrot.slane %v3413_v37, %v7468_v48  ;;  %v3676_v52 = vcombine.low %v7662_v18, %v7665_v24  ;;  %v3550_v55 = vrot.slane %v3536_v26, %v7468_v48 }
 0x90c   : > { %v3468_v25 = vrot.slane %v3454_v43, %v7468_v48  ;;  %v2560_v35 = vld [vmem:[#allocation2 + $0x24] sm:$0x3]  ;;  %v2561_v16 = vld [vmem:[#allocation2 + $0x28] sm:$0x3]  ;;  %v2864_v17 = vrot.slane %v6753_v23, 1  ;;  %v7674_v1 = vrot.slane %v3255_v32, 1  ;;  %v3509_v44 = vrot.slane %v3495_v12, %v7468_v48 }
 0x90d   : > { %v2865_v45 = vrot.slane %v6754_v34, 1  ;;  %v2866_v60 = vrot.slane %v6755_v11, 1  ;;  %v5973_v0 = vcombine.low %v3386_v7, %v3427_v21  ;;  %v6758_v51 = vld [vmem:[#allocation2 + $0x4] ss:$0 sps:$4 sm:$0x77]   ;;  %v3310_v54 = vrot.slane %v7660_v14, 1 }
 0x90e   : > { %v3577_v49 = vcombine.low %v2864_v17, %v2559_v47  ;;  %v5975_v4 = vcombine.low %v3468_v25, %v3509_v44  ;;  %v6759_v33 = vld [vmem:[#allocation2 + $0x8] ss:$0 sps:$4 sm:$0x77]   ;;  %v6760_v3 = vld [vmem:[#allocation2 + $0xc] ss:$0 sps:$4 sm:$0x77]   ;;  %v7692_v17 = vor.u32 %v3229_v10, %v3225_v9 }
 0x90f   : > { %v3618_v57 = vcombine.low %v2865_v45, %v2560_v35  ;;  %v3659_v40 = vcombine.low %v2866_v60, %v2561_v16  ;;  %v4195_v63 = vrot.slane %v5973_v0, %v7468_v48  ;;  %v2707_v28 = vshrl.u32 %v6758_v51, 16  ;;  %v6756_v2 = vld [vmem:[#allocation7 + $0x180] sm:$0xff]   ;;  %v6763_v47 = vld [vmem:[#allocation7 + $0x1c8] sm:$0xff]   ;;  %v6765_v26 = vld [vmem:[#allocation2 + $0x1c] ss:$0 sps:$4 sm:$0x77]  }
 0x910   : > { %v3591_v58 = vrot.slane %v3577_v49, %v7468_v48  ;;  %v2709_v6 = vshll.u32 %v6758_v51, 16  ;;  %v4209_v32 = vrot.slane %v5975_v4, %v7468_v48  ;;  %v2714_v30 = vshrl.u32 %v6759_v33, 16  ;;  %v2507_v34 = vld [vmem:[#allocation2 + $0x4] sm:$0x3]  ;;  %v6768_v51 = vld [vmem:[#allocation7 + $0x188] sm:$0xff]  }
 0x911   : > { %v3632_v27 = vrot.slane %v3618_v57, %v7468_v48  ;;  %v3673_v59 = vrot.slane %v3659_v40, %v7468_v48  ;;  %v2716_v37 = vshll.u32 %v6759_v33, 16  ;;  %v2721_v43 = vshrl.u32 %v6760_v3, 16  ;;  %v6766_v16 = vld [vmem:[#allocation2 + $0x20] ss:$0 sps:$4 sm:$0x77]   ;;  %v6771_v33 = vld [vmem:[#allocation7 + $0x1d0] sm:$0xff]  }
 0x912   : > { %v5981_v15 = vcombine.low %v3550_v55, %v3591_v58  ;;  %v2711_v61 = vrot.slane %v2709_v6, 1  ;;  %v4213_v23 = vcombine.high %v4195_v63, %v4209_v32  ;;  %v4212_v7 = vcombine.low %v4195_v63, %v4209_v32  ;;  %v6767_v60 = vld [vmem:[#allocation2 + $0x24] ss:$0 sps:$4 sm:$0x77]   ;;  %v2508_v63 = vld [vmem:[#allocation2 + $0x8] sm:$0x3] }
 0x913   : > { %v5983_v12 = vcombine.low %v3632_v27, %v3673_v59  ;;  %v2723_v11 = vshll.u32 %v6760_v3, 16  ;;  %v2718_v35 = vrot.slane %v2716_v37, 1  ;;  %v2735_v0 = vshrl.u32 %v6765_v26, 16  ;;  %v2509_v6 = vld [vmem:[#allocation2 + $0xc] sm:$0x3] }
 0x914   : > { %v7690_v21 = vrot.slane %v5981_v15, %v7468_v48  ;;  %v2712_v25 = vor.u32 %v2711_v61, %v2707_v28  ;;  %5099 = vmatprep.mubr.bf16.mxu1 %v4213_v23  ;;  %v2737_v49 = vshll.u32 %v6765_v26, 16  ;;  %v2742_v57 = vshrl.u32 %v6766_v16, 16  ;;  %v2562_v28 = vld [vmem:[#allocation2 + $0x34] sm:$0x3]  ;;  %v2511_v59 = vld [vmem:[#allocation2 + $0x1c] sm:$0x3] }
 0x915   : > { %v4298_v44 = vrot.slane %v5983_v12, %v7468_v48  ;;  %v2725_v45 = vrot.slane %v2723_v11, 1  ;;  %5100 = vmatmul.mubr.bf16.vlgmr.msra.gmra.mrb[20].mxu1 %v4212_v7  ;;  %v2719_v4 = vor.u32 %v2718_v35, %v2714_v30  ;;  %v2744_v40 = vshll.u32 %v6766_v16, 16  ;;  %v2512_v37 = vld [vmem:[#allocation2 + $0x20] sm:$0x3]  ;;  %v2563_v35 = vld [vmem:[#allocation2 + $0x38] sm:$0x3] }
 0x916   : > { %v3412_v55 = vcombine.low %v2507_v34, %v2712_v25  ;;  %6282 = vmatpush3.bf16.msra.mxu1 %v6756_v2  ;;  %v2739_v10 = vrot.slane %v2737_v49, 1  ;;  %v2749_v58 = vshrl.u32 %v6767_v60, 16  ;;  %v2751_v30 = vshll.u32 %v6767_v60, 16  ;;  %v6773_v2 = vld [vmem:[#allocation2 + $0x34] ss:$0 sps:$4 sm:$0x66]  }
 0x917   : > { %v4302_v3 = vcombine.high %v7690_v21, %v4298_v44  ;;  %v2726_v9 = vor.u32 %v2725_v45, %v2721_v43  ;;  %v3453_v27 = vcombine.low %v2508_v63, %v2719_v4  ;;  %6283 = vmatprep.subr.bf16.mxu1 %v6763_v47  ;;  %v2746_v15 = vrot.slane %v2744_v40, 1  ;;  %v6774_v12 = vld [vmem:[#allocation2 + $0x38] ss:$0 sps:$4 sm:$0x66]   ;;  %v6776_v34 = vld [vmem:[#allocation7 + $0x190] sm:$0xff]  }
 0x918   : > { %v3420_v32 = vrot.slane %v3412_v55, %v7468_v48  ;;  %v2740_v23 = vor.u32 %v2739_v10, %v2735_v0  ;;  %v4301_v7 = vcombine.low %v7690_v21, %v4298_v44  ;;  %v3700_v43 = vcombine.low %v2867_v20, %v2562_v28  ;;  %v6775_v16 = vld [vmem:[#allocation2 + $0x3c] ss:$0 sps:$4 sm:$0x66]   ;;  %v2513_v60 = vld [vmem:[#allocation2 + $0x24] sm:$0x3] }
 0x919   : > { %5107 = vmatprep.mubr.bf16.mxu1 %v4302_v3  ;;  %v3494_v61 = vcombine.low %v2509_v6, %v2726_v9  ;;  %v3461_v11 = vrot.slane %v3453_v27, %v7468_v48  ;;  %v2747_v47 = vor.u32 %v2746_v15, %v2742_v57  ;;  %v2753_v25 = vrot.slane %v2751_v30, 1  ;;  %v2564_v21 = vld [vmem:[#allocation2 + $0x3c] sm:$0x3]  ;;  %v2565_v44 = vld [vmem:[#allocation2 + $0x40] sm:$0x3] }
 0x91a   : > { %v5972_v26 = vcombine.low %v7651_v19, %v3420_v32  ;;  %v3576_v0 = vcombine.low %v2511_v59, %v2740_v23  ;;  %6284 = vmatpush3.bf16.msra.mxu1 %v6768_v51  ;;  %v2868_v49 = vrot.slane %v6773_v2, 1  ;;  %v2869_v4 = vrot.slane %v6774_v12, 1  ;;  %v6779_v19 = vld [vmem:[#allocation7 + $0x1d8] sm:$0xff]   ;;  %v6781_v10 = vld [vmem:[#allocation2 + $0x34] ss:$0 sps:$4 sm:$0x77]  }
 0x91b   : > { %v3502_v45 = vrot.slane %v3494_v61, %v7468_v48  ;;  %v2754_v20 = vor.u32 %v2753_v25, %v2749_v58  ;;  %v3617_v55 = vcombine.low %v2512_v37, %v2747_v47  ;;  %6285 = vmatprep.subr.bf16.mxu1 %v6771_v33  ;;  %v2870_v40 = vrot.slane %v6775_v16, 1  ;;  %v7707_v27 = vld [vmem:[#allocation2 + $0x38] ss:$0 sps:$4 sm:$0x77]   ;;  %v6787_v12 = vld [vmem:[#allocation7 + $0x1e0] sm:$0xff]  }
 0x91c   : > { %v4188_v62 = vrot.slane %v5972_v26, %v7468_v48  ;;  %v3584_v3 = vrot.slane %v3576_v0, %v7468_v48  ;;  %v3714_v63 = vrot.slane %v3700_v43, %v7468_v48  ;;  %v3741_v9 = vcombine.low %v2868_v49, %v2563_v35  ;;  %v7709_v58 = vld [vmem:[#allocation2 + $0x3c] ss:$0 sps:$4 sm:$0x77]   ;;  %v6762_v26 = vld [vmem:[#allocation7 + $0x100] sm:$0xff]   ;;  %v6770_v49 = vld [vmem:[#allocation7 + $0x108] sm:$0xff]  }
 0x91d   : > { %v5974_v57 = vcombine.low %v3461_v11, %v3502_v45  ;;  %v3625_v51 = vrot.slane %v3617_v55, %v7468_v48  ;;  %v3658_v28 = vcombine.low %v2513_v60, %v2754_v20  ;;  %5108 = vmatmul.mubr.bf16.gmra.mrb[24].mxu1 %v4301_v7  ;;  %v3782_v6 = vcombine.low %v2869_v4, %v2564_v21  ;;  %v6784_v61 = vld [vmem:[#allocation7 + $0x198] sm:$0xff]   ;;  %v6789_v0 = vld [vmem:[#allocation2 + $0x4c] ss:$0 sps:$4 sm:$0x66]   ;;  %v6792_v21 = vld [vmem:[#allocation7 + $0x1a0] sm:$0xff]  }
 0x91e   : > { %v3823_v32 = vcombine.low %v2870_v40, %v2565_v44  ;;  %v5980_v59 = vcombine.low %v7655_v31, %v3584_v3  ;;  %v3755_v15 = vrot.slane %v3741_v9, %v7468_v48  ;;  %6286 = vmatpush3.bf16.msra.mxu1 %v6776_v34  ;;  %v2763_v30 = vshrl.u32 %v6781_v10, 16  ;;  %v6769_v31 = vld [vmem:[#allocation7 + $0x148] sm:$0xff]   ;;  %v6790_v40 = vld [vmem:[#allocation2 + $0x50] ss:$0 sps:$4 sm:$0x66]  }
 0x91f   : > { %v4202_v33 = vrot.slane %v5974_v57, %v7468_v48  ;;  %v3666_v37 = vrot.slane %v3658_v28, %v7468_v48  ;;  %v3796_v23 = vrot.slane %v3782_v6, %v7468_v48  ;;  %6287 = vmatprep.subr.bf16.mxu1 %v6779_v19  ;;  %v2765_v2 = vshll.u32 %v6781_v10, 16  ;;  %v2566_v34 = vld [vmem:[#allocation2 + $0x4c] sm:$0x3]  ;;  %v6777_v3 = vld [vmem:[#allocation7 + $0x150] sm:$0xff]  }
 0x920   : > { %v3837_v7 = vrot.slane %v3823_v32, %v7468_v48  ;;  %v7718_v47 = vrot.slane %v5980_v59, %v7468_v48  ;;  %v5989_v25 = vcombine.low %v3714_v63, %v3755_v15  ;;  %v2770_v60 = vshrl.u32 %v7707_v27, 16  ;;  %v7721_v44 = vld [vmem:[#allocation2 + $0x2c] ss:$0 sps:$4 sm:$0x66]   ;;  %v2515_v63 = vld [vmem:[#allocation2 + $0x34] sm:$0x3] }
 0x921   : > { %v4211_v43 = vcombine.high %v4188_v62, %v4202_v33  ;;  %v4210_v11 = vcombine.low %v4188_v62, %v4202_v33  ;;  %v5982_v35 = vcombine.low %v3625_v51, %v3666_v37  ;;  %v2767_v45 = vrot.slane %v2765_v2, 1  ;;  %v6791_v10 = vld [vmem:[#allocation2 + $0x54] ss:$0 sps:$4 sm:$0x66]   ;;  %v6795_v28 = vld [vmem:[#allocation7 + $0x1e8] sm:$0xff]  }
 0x922   : > { %v5991_v16 = vcombine.low %v3796_v23, %v3837_v7  ;;  %v4373_v4 = vrot.slane %v5989_v25, %v7468_v48  ;;  %v2772_v62 = vshll.u32 %v7707_v27, 16  ;;  %v2777_v20 = vshrl.u32 %v7709_v58, 16  ;;  %6288 = vmatpush3.bf16.msra.mxu1 %v6784_v61  ;;  %v2567_v27 = vld [vmem:[#allocation2 + $0x50] sm:$0x3]  ;;  %v6800_v59 = vld [vmem:[#allocation7 + $0x1a8] sm:$0xff]  }
 0x923   : > { %5034 = vmatprep.mubr.bf16.mxu0 %v4211_v43  ;;  %v2779_v55 = vshll.u32 %v7709_v58, 16  ;;  %v4291_v19 = vrot.slane %v5982_v35, %v7468_v48  ;;  %v2768_v9 = vor.u32 %v2767_v45, %v2763_v30  ;;  %6289 = vmatprep.subr.bf16.mxu1 %v6787_v12  ;;  %v2872_v51 = vrot.slane %v6789_v0, 1  ;;  %v2516_v30 = vld [vmem:[#allocation2 + $0x38] sm:$0x3]  ;;  %v2517_v23 = vld [vmem:[#allocation2 + $0x3c] sm:$0x3] }
 0x924   : > { %5035 = vmatmul.mubr.bf16.vlgmr.msra.gmra.mrb[20].mxu0 %v4210_v11  ;;  %v4387_v57 = vrot.slane %v5991_v16, %v7468_v48  ;;  %v2774_v6 = vrot.slane %v2772_v62, 1  ;;  %v2873_v33 = vrot.slane %v6790_v40, 1  ;;  %v3864_v58 = vcombine.low %v2871_v38, %v2566_v34  ;;  %v2569_v2 = vld [vmem:[#allocation2 + $0x58] sm:$0x3]  ;;  %v6803_v12 = vld [vmem:[#allocation7 + $0x1f0] sm:$0xff]  }
 0x925   : > { %6242 = vmatpush3.bf16.msra.mxu0 %v6762_v26  ;;  %v2781_v32 = vrot.slane %v2779_v55, 1  ;;  %v4300_v15 = vcombine.high %v7718_v47, %v4291_v19  ;;  %v4299_v37 = vcombine.low %v7718_v47, %v4291_v19  ;;  %v3740_v7 = vcombine.low %v2515_v63, %v2768_v9  ;;  %v6797_v35 = vld [vmem:[#allocation2 + $0x4c] ss:$0 sps:$4 sm:$0x77]   ;;  %v2568_v38 = vld [vmem:[#allocation2 + $0x54] sm:$0x3] }
 0x926   : > { %6243 = vmatprep.subr.bf16.mxu0 %v6769_v31  ;;  %v4391_v61 = vcombine.high %v4373_v4, %v4387_v57  ;;  %v2775_v43 = vor.u32 %v2774_v6, %v2770_v60  ;;  %v4390_v26 = vcombine.low %v4373_v4, %v4387_v57  ;;  %v2874_v25 = vrot.slane %v6791_v10, 1  ;;  %6290 = vmatpush3.bf16.msra.mxu1 %v6792_v21  ;;  %v7735_v47 = vld [vmem:[#allocation2 + $0x50] ss:$0 sps:$4 sm:$0x77]   ;;  %v6785_v55 = vld [vmem:[#allocation7 + $0x158] sm:$0xff]  }
 0x927   : > { %v2782_v11 = vor.u32 %v2781_v32, %v2777_v20  ;;  %5042 = vmatprep.mubr.bf16.mxu0 %v4300_v15  ;;  %v3748_v36 = vrot.slane %v3740_v7, %v7468_v48  ;;  %v3878_v31 = vrot.slane %v3864_v58, %v7468_v48  ;;  %v3905_v34 = vcombine.low %v2872_v51, %v2567_v27  ;;  %v6778_v45 = vld [vmem:[#allocation7 + $0x110] sm:$0xff]   ;;  %v6786_v10 = vld [vmem:[#allocation7 + $0x118] sm:$0xff]   ;;  %v6805_v58 = vld [vmem:[#allocation2 + $0x8] ss:$0 sps:$4 sm:$0x77]  }
 0x928   : > { %5115 = vmatprep.mubr.bf16.mxu1 %v4391_v61  ;;  %v3314_v16 = vrot.slane %v7721_v44, 1  ;;  %v3781_v60 = vcombine.low %v2516_v30, %v2775_v43  ;;  %v3946_v4 = vcombine.low %v2873_v33, %v2568_v38  ;;  %v6799_v21 = vld [vmem:[#allocation2 + $0x54] ss:$0 sps:$4 sm:$0x77]   ;;  %v2791_v62 = vshrl.u32 %v6797_v35, 16  ;;  %6291 = vmatprep.subr.bf16.mxu1 %v6795_v28  ;;  %v6793_v28 = vld [vmem:[#allocation7 + $0x160] sm:$0xff]  }
 0x929   : > { %6244 = vmatpush3.bf16.msra.mxu0 %v6770_v49  ;;  %v3822_v0 = vcombine.low %v2517_v23, %v2782_v11  ;;  %5116 = vmatmul.mubr.bf16.gmra.mrb[28].mxu1 %v4390_v26  ;;  %v5988_v20 = vcombine.low %v7658_v8, %v3748_v36  ;;  %v3919_v40 = vrot.slane %v3905_v34, %v7468_v48  ;;  %v2793_v57 = vshll.u32 %v6797_v35, 16  ;;  %v6804_v63 = vld [vmem:[#allocation7 + $0x1b0] sm:$0xff]   ;;  %v2519_v61 = vld [vmem:[#allocation2 + $0x4c] sm:$0x3] }
 0x92a   : > { %6245 = vmatprep.subr.bf16.mxu0 %v6777_v3  ;;  %v3987_v19 = vcombine.low %v2874_v25, %v2569_v2  ;;  %v3789_v9 = vrot.slane %v3781_v60, %v7468_v48  ;;  %v3960_v51 = vrot.slane %v3946_v4, %v7468_v48  ;;  %v2798_v6 = vshrl.u32 %v7735_v47, 16  ;;  %6292 = vmatpush3.bf16.msra.mxu1 %v6800_v59  ;;  %v6811_v3 = vld [vmem:[#allocation7 + $0x1f8] sm:$0xff]   ;;  %v6806_v2 = vld [vmem:[#allocation2 + $0xc] ss:$0 sps:$4 sm:$0x77]  }
 0x92b   : > { %v3830_v49 = vrot.slane %v3822_v0, %v7468_v48  ;;  %v4366_v8 = vrot.slane %v5988_v20, %v7468_v48  ;;  %v5997_v27 = vcombine.low %v3878_v31, %v3919_v40  ;;  %v2795_v33 = vrot.slane %v2793_v57, 1  ;;  %6293 = vmatprep.subr.bf16.mxu1 %v6803_v12  ;;  %v7748_v11 = vld [vmem:[#allocation2 + $0x10] ss:$0 sps:$4 sm:$0x77]   ;;  %v6794_v12 = vld [vmem:[#allocation7 + $0x120] sm:$0xff]   ;;  %v6820_v31 = vld [vmem:[#allocation7 + $0x1b8] sm:$0xff]  }
 0x92c   : > { %5043 = vmatmul.mubr.bf16.gmra.mrb[24].mxu0 %v4299_v37  ;;  %v4001_v32 = vrot.slane %v3987_v19, %v7468_v48  ;;  %v2800_v30 = vshll.u32 %v7735_v47, 16  ;;  %v2805_v23 = vshrl.u32 %v6799_v21, 16  ;;  %v2807_v7 = vshll.u32 %v6799_v21, 16  ;;  %v2520_v47 = vld [vmem:[#allocation2 + $0x50] sm:$0x3]  ;;  %v6801_v60 = vld [vmem:[#allocation7 + $0x168] sm:$0xff]  }
 0x92d   : > { %6246 = vmatpush3.bf16.msra.mxu0 %v6778_v45  ;;  %v5990_v15 = vcombine.low %v3789_v9, %v3830_v49  ;;  %v4462_v37 = vrot.slane %v5997_v27, %v7468_v48  ;;  %v2796_v43 = vor.u32 %v2795_v33, %v2791_v62  ;;  %v3148_v26 = vshrl.u32 %v6805_v58, 16  ;;  %v2521_v19 = vld [vmem:[#allocation2 + $0x54] sm:$0x3]  ;;  %v6812_v49 = vld [vmem:[#allocation2 + $0x4] ss:$0 sps:$4 sm:$0x77]  }
 0x92e   : > { %6247 = vmatprep.subr.bf16.mxu0 %v6785_v55  ;;  %v5999_v59 = vcombine.low %v3960_v51, %v4001_v32  ;;  %v2802_v35 = vrot.slane %v2800_v30, 1  ;;  %v2809_v36 = vrot.slane %v2807_v7, 1  ;;  %6294 = vmatpush3.bf16.msra.mxu1 %v6804_v63  ;;  %v3150_v38 = vshll.u32 %v6805_v58, 16  ;;  %v2603_v27 = vld [vmem:[#allocation2 + $0x8] sm:$0x3] }
 0x92f   : > { %v4380_v25 = vrot.slane %v5990_v15, %v7468_v48  ;;  %v3904_v45 = vcombine.low %v2519_v61, %v2796_v43  ;;  %v3155_v0 = vshrl.u32 %v6806_v2, 16  ;;  %v3157_v4 = vshll.u32 %v6806_v2, 16  ;;  %6295 = vmatprep.subr.bf16.mxu1 %v6811_v3  ;;  %v6813_v58 = vld [vmem:[#allocation2 + $0x8] ss:$0 sps:$4 sm:$0x77]  }
 0x930   : > { %v4476_v34 = vrot.slane %v5999_v59, %v7468_v48  ;;  %v2803_v20 = vor.u32 %v2802_v35, %v2798_v6  ;;  %v2810_v55 = vor.u32 %v2809_v36, %v2805_v23  ;;  %v3152_v9 = vrot.slane %v3150_v38, 1  ;;  %v6802_v6 = vld [vmem:[#allocation7 + $0x128] sm:$0xff]   ;;  %v6815_v59 = vld [vmem:[#allocation2 + $0x10] ss:$0 sps:$4 sm:$0x77]  }
 0x931   : > { %v4389_v21 = vcombine.high %v4366_v8, %v4380_v25  ;;  %6248 = vmatpush3.bf16.msra.mxu0 %v6786_v10  ;;  %v4388_v62 = vcombine.low %v4366_v8, %v4380_v25  ;;  %v3912_v57 = vrot.slane %v3904_v45, %v7468_v48  ;;  %v3159_v33 = vrot.slane %v3157_v4, 1  ;;  %v6814_v15 = vld [vmem:[#allocation2 + $0xc] ss:$0 sps:$4 sm:$0x77]   ;;  %v6810_v4 = vld [vmem:[#allocation7 + $0x130] sm:$0xff]  }
 0x932   : > { %v4480_v40 = vcombine.high %v4462_v37, %v4476_v34  ;;  %6249 = vmatprep.subr.bf16.mxu0 %v6793_v28  ;;  %v4479_v63 = vcombine.low %v4462_v37, %v4476_v34  ;;  %v3945_v51 = vcombine.low %v2520_v47, %v2803_v20  ;;  %v3986_v32 = vcombine.low %v2521_v19, %v2810_v55  ;;  %v2604_v7 = vld [vmem:[#allocation2 + $0xc] sm:$0x3]  ;;  %v6817_v34 = vld [vmem:[#allocation2 + $0x8] ss:$0 sps:$4 sm:$0x66]  }
 0x933   : > { %5050 = vmatprep.mubr.bf16.mxu0 %v4389_v21  ;;  %v3162_v3 = vshrl.u32 %v7748_v11, 16  ;;  %6296 = vmatpush3.bf16.msra.mxu1 %v6820_v31  ;;  %v5996_v10 = vcombine.low %v7670_v29, %v3912_v57  ;;  %v3153_v8 = vor.u32 %v3152_v9, %v3148_v26  ;;  %v3164_v28 = vshll.u32 %v7748_v11, 16  ;;  %v6809_v26 = vld [vmem:[#allocation7 + $0x170] sm:$0xff]   ;;  %v6816_v11 = vld [vmem:[#allocation2 + $0x4] ss:$0 sps:$4 sm:$0x66]  }
 0x934   : > { %5123 = vmatprep.mubr.bf16.mxu1 %v4480_v40  ;;  %5051 = vmatmul.mubr.bf16.gmra.mrb[28].mxu0 %v4388_v62  ;;  %v2924_v61 = vshrl.u32 %v6812_v49, 16  ;;  %v3953_v30 = vrot.slane %v3945_v51, %v7468_v48  ;;  %v3994_v23 = vrot.slane %v3986_v32, %v7468_v48  ;;  %v3160_v2 = vor.u32 %v3159_v33, %v3155_v0  ;;  %v7759_v47 = vld [vmem:[#allocation2 + $0x44] ss:$0 sps:$4 sm:$0x66]   ;;  %v2605_v55 = vld [vmem:[#allocation2 + $0x10] sm:$0x3] }
 0x935   : > { %6250 = vmatpush3.bf16.msra.mxu0 %v6794_v12  ;;  %5124 = vmatmul.mubr.bf16.gmra.mrb[32].mxu1 %v4479_v63  ;;  %v2926_v37 = vshll.u32 %v6812_v49, 16  ;;  %v4455_v43 = vrot.slane %v5996_v10, %v7468_v48  ;;  %v3166_v29 = vrot.slane %v3164_v28, 1  ;;  %v3389_v25 = vcombine.low %v2603_v27, %v3153_v8  ;;  %v6818_v20 = vld [vmem:[#allocation2 + $0xc] ss:$0 sps:$4 sm:$0x66]   ;;  %v6821_v27 = vld [vmem:[#allocation7 + $0x178] sm:$0xff]  }
 0x936   : > { %6251 = vmatprep.subr.bf16.mxu0 %v6801_v60  ;;  %v2931_v35 = vshrl.u32 %v6813_v58, 16  ;;  %v5998_v36 = vcombine.low %v3953_v30, %v3994_v23  ;;  %v3430_v38 = vcombine.low %v2604_v7, %v3160_v2  ;;  %v2933_v31 = vshll.u32 %v6813_v58, 16  ;;  %v6819_v63 = vld [vmem:[#allocation2 + $0x10] ss:$0 sps:$4 sm:$0x66]   ;;  %v6822_v8 = vld [vmem:[#allocation7 + $0x138] sm:$0xff]  }
 0x937   : > { %v2928_v12 = vrot.slane %v2926_v37, 1  ;;  %v3167_v45 = vor.u32 %v3166_v29, %v3162_v3  ;;  %v3403_v0 = vrot.slane %v3389_v25, %v7468_v48  ;;  %v2938_v21 = vshrl.u32 %v6814_v15, 16  ;;  %v6823_v23 = vld [vmem:[#allocation2 + $0x20] ss:$0 sps:$4 sm:$0x77]  }
 0x938   : > { %v2940_v62 = vshll.u32 %v6814_v15, 16  ;;  %v4469_v60 = vrot.slane %v5998_v36, %v7468_v48  ;;  %v3444_v40 = vrot.slane %v3430_v38, %v7468_v48  ;;  %v2935_v57 = vrot.slane %v2933_v31, 1  ;;  %v6824_v37 = vld [vmem:[#allocation2 + $0x24] ss:$0 sps:$4 sm:$0x77]  }
 0x939   : > { %6252 = vmatpush3.bf16.msra.mxu0 %v6802_v6  ;;  %v2929_v19 = vor.u32 %v2928_v12, %v2924_v61  ;;  %v3471_v9 = vcombine.low %v2605_v55, %v3167_v45  ;;  %v2945_v51 = vshrl.u32 %v6815_v59, 16  ;;  %v2947_v32 = vshll.u32 %v6815_v59, 16  ;;  %v7765_v61 = vld [vmem:[#allocation7 + $0x200] sm:$0xff]  }
 0x93a   : > { %6253 = vmatprep.subr.bf16.mxu0 %v6809_v26  ;;  %v2942_v49 = vrot.slane %v2940_v62, 1  ;;  %v4478_v33 = vcombine.high %v4455_v43, %v4469_v60  ;;  %v5977_v3 = vcombine.low %v3403_v0, %v3444_v40  ;;  %v4477_v58 = vcombine.low %v4455_v43, %v4469_v60  ;;  %v7770_v45 = vld [vmem:[#allocation2 + $0x44] sm:$0x3] }
 0x93b   : > { %v2936_v10 = vor.u32 %v2935_v57, %v2931_v35  ;;  %v3485_v28 = vrot.slane %v3471_v9, %v7468_v48  ;;  %v2949_v15 = vrot.slane %v2947_v32, 1  ;;  %v3083_v30 = vrot.slane %v6816_v11, 1  ;;  %v6825_v11 = vld [vmem:[#allocation2 + $0x28] ss:$0 sps:$4 sm:$0x77]  }
 0x93c   : > { %v2943_v6 = vor.u32 %v2942_v49, %v2938_v21  ;;  %5058 = vmatprep.mubr.bf16.mxu0 %v4478_v33  ;;  %v4231_v7 = vrot.slane %v5977_v3, %v7468_v48  ;;  %v3084_v2 = vrot.slane %v6817_v34, 1  ;;  %v3085_v59 = vrot.slane %v6818_v20, 1  ;;  %v6828_v9 = vld [vmem:[#allocation2 + $0x1c] ss:$0 sps:$4 sm:$0x77]  }
 0x93d   : > { %6254 = vmatpush3.bf16.msra.mxu0 %v6810_v4  ;;  %v3318_v29 = vrot.slane %v7759_v47, 1  ;;  %v5979_v43 = vcombine.low %v3485_v28, %v7678_v22  ;;  %v2950_v25 = vor.u32 %v2949_v15, %v2945_v51  ;;  %v3086_v26 = vrot.slane %v6819_v63, 1  ;;  %v2608_v32 = vld [vmem:[#allocation2 + $0x24] sm:$0x3] }
 0x93e   : > { %5059 = vmatmul.mubr.bf16.gmra.mrb[32].mxu0 %v4477_v58  ;;  %v3388_v35 = vcombine.low %v2929_v19, %v3083_v30  ;;  %6255 = vmatprep.subr.bf16.mxu0 %v6821_v27  ;;  %v3429_v36 = vcombine.low %v2936_v10, %v3084_v2  ;;  %v3470_v38 = vcombine.low %v2943_v6, %v3085_v59  ;;  %v3176_v12 = vshrl.u32 %v6823_v23, 16  ;;  %v2607_v19 = vld [vmem:[#allocation2 + $0x20] sm:$0x3]  ;;  %v6830_v28 = vld [vmem:[#allocation2 + $0x24] ss:$0 sps:$4 sm:$0x77]  }
 0x93f   : > { %v3178_v31 = vshll.u32 %v6823_v23, 16  ;;  %v4245_v34 = vrot.slane %v5979_v43, %v7468_v48  ;;  %v3511_v0 = vcombine.low %v2950_v25, %v3086_v26  ;;  %v3183_v4 = vshrl.u32 %v6824_v37, 16  ;;  %v6829_v3 = vld [vmem:[#allocation2 + $0x20] ss:$0 sps:$4 sm:$0x77]  }
 0x940   : > { %v3185_v21 = vshll.u32 %v6824_v37, 16  ;;  %v3396_v62 = vrot.slane %v3388_v35, %v7468_v48  ;;  %v3437_v22 = vrot.slane %v3429_v36, %v7468_v48  ;;  %v3478_v20 = vrot.slane %v3470_v38, %v7468_v48  ;;  %v6831_v6 = vld [vmem:[#allocation2 + $0x28] ss:$0 sps:$4 sm:$0x77]  }
 0x941   : > { %6256 = vmatpush3.bf16.msra.mxu0 %v6822_v8  ;;  %v3180_v60 = vrot.slane %v3178_v31, 1  ;;  %v4249_v55 = vcombine.high %v4231_v7, %v4245_v34  ;;  %v3519_v40 = vrot.slane %v3511_v0, %v7468_v48  ;;  %v3190_v63 = vshrl.u32 %v6825_v11, 16  ;;  %v6832_v59 = vld [vmem:[#allocation2 + $0x1c] ss:$0 sps:$4 sm:$0x66]  }
 0x942   : > { %v3187_v57 = vrot.slane %v3185_v21, 1  ;;  %6505 = vmatprep.subr.bf16.mxu0 %v7765_v61  ;;  %v4248_v49 = vcombine.low %v4231_v7, %v4245_v34  ;;  %v5976_v51 = vcombine.low %v3396_v62, %v3437_v22  ;;  %v3192_v33 = vshll.u32 %v6825_v11, 16  ;;  %v6833_v35 = vld [vmem:[#allocation2 + $0x20] ss:$0 sps:$4 sm:$0x66]  }
 0x943   : > { %v3181_v27 = vor.u32 %v3180_v60, %v3176_v12  ;;  %5229 = vmatprep.mubr.bf16.mxu1 %v4249_v55  ;;  %v5978_v58 = vcombine.low %v3478_v20, %v3519_v40  ;;  %v3690_v8 = vrot.slane %v3676_v52, %v7468_v48  ;;  %v3840_v15 = vcombine.low %v7770_v45, %v7692_v17  ;;  %v6834_v36 = vld [vmem:[#allocation2 + $0x24] ss:$0 sps:$4 sm:$0x66]   ;;  %v2609_v31 = vld [vmem:[#allocation2 + $0x28] sm:$0x3] }
 0x944   : > { %v3188_v10 = vor.u32 %v3187_v57, %v3183_v4  ;;  %v4224_v30 = vrot.slane %v5976_v51, %v7468_v48  ;;  %5230 = vmatmul.mubr.bf16.vlgmr.msra.gmra.mrb[36].mxu1 %v4248_v49  ;;  %v3194_v23 = vrot.slane %v3192_v33, 1  ;;  %v2952_v2 = vshrl.u32 %v6828_v9, 16  ;;  %v6835_v4 = vld [vmem:[#allocation2 + $0x28] ss:$0 sps:$4 sm:$0x66]  }
 0x945   : > { %v3553_v7 = vcombine.low %v2607_v19, %v3181_v27  ;;  %v4238_v37 = vrot.slane %v5978_v58, %v7468_v48  ;;  %v2954_v25 = vshll.u32 %v6828_v9, 16  ;;  %v2959_v26 = vshrl.u32 %v6829_v3, 16  ;;  %v6836_v60 = vld [vmem:[#allocation7 + $0x208] sm:$0xff]   ;;  %v6845_v17 = vld [vmem:[#allocation2 + $0x40] ss:$0 sps:$4 sm:$0x77]  }
 0x946   : > { %v3594_v43 = vcombine.low %v2608_v32, %v3188_v10  ;;  %v3195_v18 = vor.u32 %v3194_v23, %v3190_v63  ;;  %v2961_v52 = vshll.u32 %v6829_v3, 16  ;;  %v2966_v11 = vshrl.u32 %v6830_v28, 16  ;;  %v6837_v32 = vld [vmem:[#allocation2 + $0x38] ss:$0 sps:$4 sm:$0x77]  }
 0x947   : > { %v3567_v24 = vrot.slane %v3553_v7, %v7468_v48  ;;  %v4246_v38 = vcombine.low %v4224_v30, %v4238_v37  ;;  %v4247_v12 = vcombine.high %v4224_v30, %v4238_v37  ;;  %v2956_v0 = vrot.slane %v2954_v25, 1  ;;  %v6838_v10 = vld [vmem:[#allocation2 + $0x3c] ss:$0 sps:$4 sm:$0x77]   ;;  %v2613_v45 = vld [vmem:[#allocation2 + $0x40] sm:$0x3] }
 0x948   : > { %v3608_v34 = vrot.slane %v3594_v43, %v7468_v48  ;;  %v3635_v21 = vcombine.low %v2609_v31, %v3195_v18  ;;  %v2963_v62 = vrot.slane %v2961_v52, 1  ;;  %v2968_v22 = vshll.u32 %v6830_v28, 16  ;;  %v6839_v7 = vld [vmem:[#allocation2 + $0x40] ss:$0 sps:$4 sm:$0x77]  }
 0x949   : > { %v2973_v20 = vshrl.u32 %v6831_v6, 16  ;;  %5164 = vmatprep.mubr.bf16.mxu0 %v4247_v12  ;;  %v2957_v40 = vor.u32 %v2956_v0, %v2952_v2  ;;  %v2975_v19 = vshll.u32 %v6831_v6, 16  ;;  %v3087_v57 = vrot.slane %v6832_v59, 1  ;;  %v6841_v2 = vld [vmem:[#allocation7 + $0x210] sm:$0xff]   ;;  %v2611_v0 = vld [vmem:[#allocation2 + $0x38] sm:$0x3] }
 0x94a   : > { %v5985_v55 = vcombine.low %v3567_v24, %v3608_v34  ;;  %v3649_v63 = vrot.slane %v3635_v21, %v7468_v48  ;;  %5165 = vmatmul.mubr.bf16.vlgmr.msra.gmra.mrb[36].mxu0 %v4246_v38  ;;  %v2964_v9 = vor.u32 %v2963_v62, %v2959_v26  ;;  %v2970_v49 = vrot.slane %v2968_v22, 1 }
 0x94b   : > { %v3088_v51 = vrot.slane %v6833_v35, 1  ;;  %6506 = vmatpush3.bf16.msra.mxu0 %v7765_v61  ;;  %v2977_v33 = vrot.slane %v2975_v19, 1  ;;  %v3089_v3 = vrot.slane %v6834_v36, 1  ;;  %v3090_v58 = vrot.slane %v6835_v4, 1  ;;  %v6850_v36 = vld [vmem:[#allocation7 + $0x218] sm:$0xff]  }
 0x94c   : > { %v4320_v27 = vrot.slane %v5985_v55, %v7468_v48  ;;  %v5987_v28 = vcombine.low %v3649_v63, %v3690_v8  ;;  %v2971_v30 = vor.u32 %v2970_v49, %v2966_v11  ;;  %v3552_v23 = vcombine.low %v2957_v40, %v3087_v57  ;;  %6507 = vmatprep.subr.bf16.mxu0 %v6836_v60  ;;  %v6843_v40 = vld [vmem:[#allocation2 + $0x38] ss:$0 sps:$4 sm:$0x77]   ;;  %v6844_v19 = vld [vmem:[#allocation2 + $0x3c] ss:$0 sps:$4 sm:$0x77]  }
 0x94d   : > { %v3593_v6 = vcombine.low %v2964_v9, %v3088_v51  ;;  %v2978_v59 = vor.u32 %v2977_v33, %v2973_v20  ;;  %v3204_v37 = vshrl.u32 %v6837_v32, 16  ;;  %v3206_v43 = vshll.u32 %v6837_v32, 16  ;;  %v6842_v20 = vld [vmem:[#allocation2 + $0x34] ss:$0 sps:$4 sm:$0x77]   ;;  %v6855_v9 = vld [vmem:[#allocation7 + $0x220] sm:$0xff]  }
 0x94e   : > { %v3211_v25 = vshrl.u32 %v6838_v10, 16  ;;  %v4334_v26 = vrot.slane %v5987_v28, %v7468_v48  ;;  %v3560_v35 = vrot.slane %v3552_v23, %v7468_v48  ;;  %v3634_v18 = vcombine.low %v2971_v30, %v3089_v3  ;;  %v7803_v57 = vld [vmem:[#allocation2 + $0x5c] sm:$0x3]  ;;  %v6846_v30 = vld [vmem:[#allocation2 + $0x34] ss:$0 sps:$4 sm:$0x66]  }
 0x94f   : > { %v3601_v61 = vrot.slane %v3593_v6, %v7468_v48  ;;  %v3675_v24 = vcombine.low %v2978_v59, %v3090_v58  ;;  %6508 = vmatpush3.bf16.msra.mxu0 %v6836_v60  ;;  %v3208_v8 = vrot.slane %v3206_v43, 1  ;;  %v3213_v52 = vshll.u32 %v6838_v10, 16  ;;  %v2612_v51 = vld [vmem:[#allocation2 + $0x3c] sm:$0x3] }
 0x950   : > { %v3218_v11 = vshrl.u32 %v6839_v7, 16  ;;  %v4338_v38 = vcombine.high %v4320_v27, %v4334_v26  ;;  %v3642_v12 = vrot.slane %v3634_v18, %v7468_v48  ;;  %v4337_v34 = vcombine.low %v4320_v27, %v4334_v26  ;;  %6509 = vmatprep.subr.bf16.mxu0 %v6841_v2  ;;  %v6847_v23 = vld [vmem:[#allocation2 + $0x38] ss:$0 sps:$4 sm:$0x66]  }
 0x951   : > { %v5984_v31 = vcombine.low %v3560_v35, %v3601_v61  ;;  %v3683_v4 = vrot.slane %v3675_v24, %v7468_v48  ;;  %v3209_v21 = vor.u32 %v3208_v8, %v3204_v37  ;;  %v3215_v62 = vrot.slane %v3213_v52, 1  ;;  %v6848_v26 = vld [vmem:[#allocation2 + $0x3c] ss:$0 sps:$4 sm:$0x66]  }
 0x952   : > { %v3220_v22 = vshll.u32 %v6839_v7, 16  ;;  %5237 = vmatprep.mubr.bf16.mxu1 %v4338_v38  ;;  %v7801_v55 = vrot.slane %v3840_v15, %v7468_v48  ;;  %v7808_v63 = vor.u32 %v7674_v1, %v3253_v53  ;;  %v2980_v15 = vshrl.u32 %v6842_v20, 16  ;;  %v6849_v35 = vld [vmem:[#allocation2 + $0x40] ss:$0 sps:$4 sm:$0x66]  }
 0x953   : > { %v4313_v60 = vrot.slane %v5984_v31, %v7468_v48  ;;  %v5986_v49 = vcombine.low %v3642_v12, %v3683_v4  ;;  %5238 = vmatmul.mubr.bf16.gmra.mrb[40].mxu1 %v4337_v34  ;;  %v3216_v32 = vor.u32 %v3215_v62, %v3211_v25  ;;  %v3717_v33 = vcombine.low %v2611_v0, %v3209_v21  ;;  %v6851_v0 = vld [vmem:[#allocation2 + $0x50] ss:$0 sps:$4 sm:$0x77]  }
 0x954   : > { %v3222_v27 = vrot.slane %v3220_v22, 1  ;;  %6510 = vmatpush3.bf16.msra.mxu0 %v6841_v2  ;;  %v2982_v3 = vshll.u32 %v6842_v20, 16  ;;  %v2987_v58 = vshrl.u32 %v6843_v40, 16  ;;  %v2989_v10 = vshll.u32 %v6843_v40, 16  ;;  %v6865_v20 = vld [vmem:[#allocation7 + $0x230] sm:$0xff]  }
 0x955   : > { %6511 = vmatprep.subr.bf16.mxu0 %v6850_v36  ;;  %v4327_v46 = vrot.slane %v5986_v49, %v7468_v48  ;;  %v3731_v53 = vrot.slane %v3717_v33, %v7468_v48  ;;  %v3758_v1 = vcombine.low %v2612_v51, %v3216_v32  ;;  %v2994_v59 = vshrl.u32 %v6844_v19, 16  ;;  %v6852_v22 = vld [vmem:[#allocation2 + $0x54] ss:$0 sps:$4 sm:$0x77]  }
 0x956   : > { %v3223_v28 = vor.u32 %v3222_v27, %v3218_v11  ;;  %v2984_v6 = vrot.slane %v2982_v3, 1  ;;  %v2991_v7 = vrot.slane %v2989_v10, 1  ;;  %v2996_v37 = vshll.u32 %v6844_v19, 16  ;;  %v6864_v11 = vld [vmem:[#allocation7 + $0x228] sm:$0xff]  }
 0x957   : > { %v4336_v2 = vcombine.high %v4313_v60, %v4327_v46  ;;  %v3772_v43 = vrot.slane %v3758_v1, %v7468_v48  ;;  %v4004_v61 = vcombine.low %v7803_v57, %v7808_v63  ;;  %v4335_v18 = vcombine.low %v4313_v60, %v4327_v46  ;;  %v6853_v63 = vld [vmem:[#allocation2 + $0x58] ss:$0 sps:$4 sm:$0x77]  }
 0x958   : > { %v3799_v25 = vcombine.low %v2613_v45, %v3223_v28  ;;  %6512 = vmatpush3.bf16.msra.mxu0 %v6850_v36  ;;  %v2985_v24 = vor.u32 %v2984_v6, %v2980_v15  ;;  %v2992_v8 = vor.u32 %v2991_v7, %v2987_v58  ;;  %v2998_v52 = vrot.slane %v2996_v37, 1  ;;  %v6857_v7 = vld [vmem:[#allocation2 + $0x50] ss:$0 sps:$4 sm:$0x77]  }
 0x959   : > { %6513 = vmatprep.subr.bf16.mxu0 %v6855_v9  ;;  %5172 = vmatprep.mubr.bf16.mxu0 %v4336_v2  ;;  %v5993_v12 = vcombine.low %v3731_v53, %v3772_v43  ;;  %v3003_v31 = vshll.u32 %v6845_v17, 16  ;;  %v3091_v34 = vrot.slane %v6846_v30, 1  ;;  %v3001_v21 = vshrl.u32 %v6845_v17, 16  ;;  %v2615_v53 = vld [vmem:[#allocation2 + $0x50] sm:$0x3] }
 0x95a   : > { %v3813_v38 = vrot.slane %v3799_v25, %v7468_v48  ;;  %5173 = vmatmul.mubr.bf16.gmra.mrb[40].mxu0 %v4335_v18  ;;  %v2999_v4 = vor.u32 %v2998_v52, %v2994_v59  ;;  %v3092_v36 = vrot.slane %v6847_v23, 1  ;;  %v3093_v62 = vrot.slane %v6848_v26, 1  ;;  %v6856_v30 = vld [vmem:[#allocation2 + $0x4c] ss:$0 sps:$4 sm:$0x77]   ;;  %v6870_v59 = vld [vmem:[#allocation7 + $0x238] sm:$0xff]  }
 0x95b   : > { %v4409_v40 = vrot.slane %v5993_v12, %v7468_v48  ;;  %v3005_v19 = vrot.slane %v3003_v31, 1  ;;  %v3716_v57 = vcombine.low %v2985_v24, %v3091_v34  ;;  %v3094_v49 = vrot.slane %v6849_v35, 1  ;;  %v2616_v43 = vld [vmem:[#allocation2 + $0x54] sm:$0x3]  ;;  %v2617_v12 = vld [vmem:[#allocation2 + $0x58] sm:$0x3] }
 0x95c   : > { %v5995_v60 = vcombine.low %v3813_v38, %v7801_v55  ;;  %6514 = vmatpush3.bf16.msra.mxu0 %v6855_v9  ;;  %v3757_v51 = vcombine.low %v2992_v8, %v3092_v36  ;;  %v3234_v32 = vshll.u32 %v6851_v0, 16  ;;  %v7821_v27 = vrot.slane %v3310_v54, %v7468_v48  ;;  %v6858_v35 = vld [vmem:[#allocation2 + $0x54] ss:$0 sps:$4 sm:$0x77]  }
 0x95d   : > { %6515 = vmatprep.subr.bf16.mxu0 %v6864_v11  ;;  %v3006_v17 = vor.u32 %v3005_v19, %v3001_v21  ;;  %v3798_v45 = vcombine.low %v2999_v4, %v3093_v62  ;;  %v3232_v55 = vshrl.u32 %v6851_v0, 16  ;;  %v3724_v15 = vrot.slane %v3716_v57, %v7468_v48  ;;  %v6860_v4 = vld [vmem:[#allocation2 + $0x4c] ss:$0 sps:$4 sm:$0x66]  }
 0x95e   : > { %v4423_v33 = vrot.slane %v5995_v60, %v7468_v48  ;;  %v3765_v3 = vrot.slane %v3757_v51, %v7468_v48  ;;  %v3236_v58 = vrot.slane %v3234_v32, 1  ;;  %v3241_v9 = vshll.u32 %v6852_v22, 16  ;;  %v6861_v21 = vld [vmem:[#allocation2 + $0x50] ss:$0 sps:$4 sm:$0x66]  }
 0x95f   : > { %v3839_v46 = vcombine.low %v3006_v17, %v3094_v49  ;;  %v3239_v1 = vshrl.u32 %v6852_v22, 16  ;;  %v3248_v6 = vshll.u32 %v6853_v63, 16  ;;  %v3806_v37 = vrot.slane %v3798_v45, %v7468_v48  ;;  %v6862_v60 = vld [vmem:[#allocation2 + $0x54] ss:$0 sps:$4 sm:$0x66]  }
 0x960   : > { %v4427_v10 = vcombine.high %v4409_v40, %v4423_v33  ;;  %v4426_v28 = vcombine.low %v4409_v40, %v4423_v33  ;;  %6516 = vmatpush3.bf16.msra.mxu0 %v6864_v11  ;;  %v5992_v14 = vcombine.low %v3724_v15, %v3765_v3  ;;  %v3237_v54 = vor.u32 %v3236_v58, %v3232_v55  ;;  %v6859_v11 = vld [vmem:[#allocation2 + $0x58] ss:$0 sps:$4 sm:$0x77]   ;;  %v6866_v3 = vld [vmem:[#allocation2 + $0x8] ss:$0 sps:$4 sm:$0x66]  }
 0x961   : > { %v3243_v23 = vrot.slane %v3241_v9, 1  ;;  %6517 = vmatprep.subr.bf16.mxu0 %v6865_v20  ;;  %v3847_v2 = vrot.slane %v3839_v46, %v7468_v48  ;;  %v3246_v25 = vshrl.u32 %v6853_v63, 16  ;;  %v4018_v26 = vrot.slane %v4004_v61, %v7468_v48  ;;  %v6863_v49 = vld [vmem:[#allocation2 + $0x58] ss:$0 sps:$4 sm:$0x66]  }
 0x962   : > { %5245 = vmatprep.mubr.bf16.mxu1 %v4427_v10  ;;  %v4402_v18 = vrot.slane %v5992_v14, %v7468_v48  ;;  %v3250_v8 = vrot.slane %v3248_v6, 1  ;;  %v3881_v52 = vcombine.low %v2615_v53, %v3237_v54  ;;  %v3008_v31 = vshrl.u32 %v6856_v30, 16  ;;  %v6868_v54 = vld [vmem:[#allocation2 + $0x10] ss:$0 sps:$4 sm:$0x66]  }
 0x963   : > { %5246 = vmatmul.mubr.bf16.gmra.mrb[44].mxu1 %v4426_v28  ;;  %v3244_v24 = vor.u32 %v3243_v23, %v3239_v1  ;;  %v5994_v38 = vcombine.low %v3806_v37, %v3847_v2  ;;  %v3010_v34 = vshll.u32 %v6856_v30, 16  ;;  %v3015_v0 = vshrl.u32 %v6857_v7, 16  ;;  %v6867_v28 = vld [vmem:[#allocation2 + $0xc] ss:$0 sps:$4 sm:$0x66]  }
 0x964   : > { %6518 = vmatpush3.bf16.msra.mxu0 %v6865_v20  ;;  %v3251_v36 = vor.u32 %v3250_v8, %v3246_v25  ;;  %v3895_v62 = vrot.slane %v3881_v52, %v7468_v48  ;;  %v3017_v22 = vshll.u32 %v6857_v7, 16  ;;  %v3022_v57 = vshrl.u32 %v6858_v35, 16  ;;  %v6871_v2 = vld [vmem:[#allocation2 + $0x20] ss:$0 sps:$4 sm:$0x66]  }
 0x965   : > { %v3922_v61 = vcombine.low %v2616_v43, %v3244_v24  ;;  %6519 = vmatprep.subr.bf16.mxu0 %v6870_v59  ;;  %v4416_v40 = vrot.slane %v5994_v38, %v7468_v48  ;;  %v3012_v19 = vrot.slane %v3010_v34, 1  ;;  %v3024_v63 = vshll.u32 %v6858_v35, 16  ;;  %v6873_v38 = vld [vmem:[#allocation2 + $0x28] ss:$0 sps:$4 sm:$0x66]  }
 0x966   : > { %v3963_v32 = vcombine.low %v2617_v12, %v3251_v36  ;;  %v3019_v33 = vrot.slane %v3017_v22, 1  ;;  %v3029_v17 = vshrl.u32 %v6859_v11, 16  ;;  %v3031_v46 = vshll.u32 %v6859_v11, 16 }
 0x967   : > { %v3936_v51 = vrot.slane %v3922_v61, %v7468_v48  ;;  %v4425_v45 = vcombine.high %v4402_v18, %v4416_v40  ;;  %v4424_v20 = vcombine.low %v4402_v18, %v4416_v40  ;;  %v3013_v55 = vor.u32 %v3012_v19, %v3008_v31  ;;  %v6872_v18 = vld [vmem:[#allocation2 + $0x24] ss:$0 sps:$4 sm:$0x66]   ;;  %v6876_v61 = vld [vmem:[#allocation2 + $0x3c] ss:$0 sps:$4 sm:$0x66]  }
 0x968   : > { %v3026_v15 = vrot.slane %v3024_v63, 1  ;;  %6520 = vmatpush3.bf16.msra.mxu0 %v6870_v59  ;;  %v3977_v58 = vrot.slane %v3963_v32, %v7468_v48  ;;  %v3020_v10 = vor.u32 %v3019_v33, %v3015_v0  ;;  %v3095_v1 = vrot.slane %v6860_v4, 1 }
 0x969   : > { %v6001_v9 = vcombine.low %v3895_v62, %v3936_v51  ;;  %5180 = vmatprep.mubr.bf16.mxu0 %v4425_v45  ;;  %v3096_v30 = vrot.slane %v6861_v21, 1  ;;  %v3097_v14 = vrot.slane %v6862_v60, 1  ;;  %v3033_v7 = vrot.slane %v3031_v46, 1  ;;  %v6875_v62 = vld [vmem:[#allocation2 + $0x38] ss:$0 sps:$4 sm:$0x66]  }
 0x96a   : > { %v3027_v53 = vor.u32 %v3026_v15, %v3022_v57  ;;  %v6003_v23 = vcombine.low %v3977_v58, %v4018_v26  ;;  %5181 = vmatmul.mubr.bf16.gmra.mrb[44].mxu0 %v4424_v20  ;;  %v3098_v37 = vrot.slane %v6863_v49, 1  ;;  %v3880_v59 = vcombine.low %v3013_v55, %v3095_v1  ;;  %v6877_v57 = vld [vmem:[#allocation2 + $0x40] ss:$0 sps:$4 sm:$0x66]  }
 0x96b   : > { %v4498_v6 = vrot.slane %v6001_v9, %v7468_v48  ;;  %v3921_v43 = vcombine.low %v3020_v10, %v3096_v30  ;;  %v3307_v35 = vrot.slane %v6866_v3, 1  ;;  %v3034_v8 = vor.u32 %v3033_v7, %v3029_v17  ;;  %v6882_v20 = vld [vmem:[#allocation2 + $0x5c] ss:$0 sps:$4 sm:$0x66]  }
 0x96c   : > { %v3962_v25 = vcombine.low %v3027_v53, %v3097_v14  ;;  %v4512_v24 = vrot.slane %v6003_v23, %v7468_v48  ;;  %v3308_v52 = vrot.slane %v6867_v28, 1  ;;  %v3309_v11 = vrot.slane %v6868_v54, 1  ;;  %v6879_v9 = vld [vmem:[#allocation2 + $0x50] ss:$0 sps:$4 sm:$0x66]  }
 0x96d   : > { %v3888_v12 = vrot.slane %v3880_v59, %v7468_v48  ;;  %v3929_v26 = vrot.slane %v3921_v43, %v7468_v48  ;;  %v3411_v34 = vrot.slane %v3307_v35, %v7468_v48  ;;  %v4003_v4 = vcombine.low %v3034_v8, %v3098_v37  ;;  %v6880_v14 = vld [vmem:[#allocation2 + $0x54] ss:$0 sps:$4 sm:$0x66]  }
 0x96e   : > { %v3970_v31 = vrot.slane %v3962_v25, %v7468_v48  ;;  %v4516_v0 = vcombine.high %v4498_v6, %v4512_v24  ;;  %v4515_v21 = vcombine.low %v4498_v6, %v4512_v24  ;;  %v3452_v36 = vrot.slane %v3308_v52, %v7468_v48 }
 0x96f   : > { %v6000_v22 = vcombine.low %v3888_v12, %v3929_v26  ;;  %v3493_v60 = vrot.slane %v3309_v11, %v7468_v48  ;;  %v3311_v40 = vrot.slane %v6871_v2, 1  ;;  %v3312_v19 = vrot.slane %v6872_v18, 1 }
 0x970   : > { %5253 = vmatprep.mubr.bf16.mxu1 %v4516_v0  ;;  %v4011_v63 = vrot.slane %v4003_v4, %v7468_v48  ;;  %v4250_v49 = vcombine.low %v3411_v34, %v3452_v36  ;;  %v3313_v51 = vrot.slane %v6873_v38, 1  ;;  %v3315_v32 = vrot.slane %v6875_v62, 1 }
 0x971   : > { %v4491_v33 = vrot.slane %v6000_v22, %v7468_v48  ;;  %5254 = vmatmul.mubr.bf16.gmra.mrb[48].mxu1 %v4515_v21  ;;  %v4251_v17 = vcombine.low %v3493_v60, %v7821_v27  ;;  %v3698_v45 = vrot.slane %v3314_v16, %v7468_v48  ;;  %v3575_v15 = vrot.slane %v3311_v40, %v7468_v48  ;;  %v6881_v27 = vld [vmem:[#allocation2 + $0x58] ss:$0 sps:$4 sm:$0x66]  }
 0x972   : > { %v6002_v55 = vcombine.low %v3970_v31, %v4011_v63  ;;  %v3657_v3 = vrot.slane %v3313_v51, %v7468_v48  ;;  %v3316_v58 = vrot.slane %v6876_v61, 1  ;;  %v3616_v10 = vrot.slane %v3312_v19, %v7468_v48 }
 0x973   : > { %v3317_v46 = vrot.slane %v6877_v57, 1  ;;  %v3862_v28 = vrot.slane %v3318_v29, %v7468_v48  ;;  %v4258_v44 = vrot.slane %v4250_v49, %v7468_v48  ;;  %v4265_v16 = vrot.slane %v4251_v17, %v7468_v48 }
 0x974   : > { %v4505_v53 = vrot.slane %v6002_v55, %v7468_v48  ;;  %v3739_v1 = vrot.slane %v3315_v32, %v7468_v48  ;;  %v4339_v23 = vcombine.low %v3575_v15, %v3616_v10  ;;  %v4340_v6 = vcombine.low %v3657_v3, %v3698_v45 }
 0x975   : > { %v3821_v30 = vrot.slane %v3317_v46, %v7468_v48  ;;  %v3780_v7 = vrot.slane %v3316_v58, %v7468_v48  ;;  %v3319_v47 = vrot.slane %v6879_v9, 1  ;;  %v3321_v29 = vrot.slane %v6881_v27, 1 }
 0x976   : > { %v4514_v54 = vcombine.high %v4491_v33, %v4505_v53  ;;  %v4513_v37 = vcombine.low %v4491_v33, %v4505_v53  ;;  %v3322_v2 = vrot.slane %v6882_v20, 1  ;;  %v4266_v59 = vcombine.low %v4258_v44, %v4265_v16  ;;  %v5971_v20 = vld [vmem:[%s8006_s8] ss:$0 sm:$0xff] }
 0x977   : > { %v4428_v43 = vcombine.low %v3739_v1, %v3780_v7  ;;  %v4429_v25 = vcombine.low %v3821_v30, %v3862_v28  ;;  %v3320_v35 = vrot.slane %v6880_v14, 1  ;;  %v4347_v18 = vrot.slane %v4339_v23, %v7468_v48 }
 0x978   : > { %5188 = vmatprep.mubr.bf16.mxu0 %v4514_v54  ;;  %v4354_v24 = vrot.slane %v4340_v6, %v7468_v48  ;;  %v3903_v8 = vrot.slane %v3319_v47, %v7468_v48  ;;  %v3985_v52 = vrot.slane %v3321_v29, %v7468_v48  ;;  %v4026_v11 = vrot.slane %v3322_v2, %v7468_v48 }
 0x979   : > { %5189 = vmatmul.mubr.bf16.gmra.mrb[48].mxu0 %v4513_v37  ;;  %v4436_v38 = vrot.slane %v4428_v43, %v7468_v48  ;;  %v4443_v12 = vrot.slane %v4429_v25, %v7468_v48  ;;  %v3944_v26 = vrot.slane %v3320_v35, %v7468_v48 }
 0x97a   : > { %6521 = vmatprep.mubr.bf16.mxu0 %v4266_v59  ;;  %v4355_v31 = vcombine.low %v4347_v18, %v4354_v24  ;;  %v4518_v0 = vcombine.low %v3985_v52, %v4026_v11 }
 0x97b   : > { %v4517_v34 = vcombine.low %v3903_v8, %v3944_v26  ;;  %v4444_v4 = vcombine.low %v4436_v38, %v4443_v12 }
 0x97c   : > { %v4532_v36 = vrot.slane %v4518_v0, %v7468_v48 }
 0x97d   : > { %v4525_v21 = vrot.slane %v4517_v34, %v7468_v48 }
 0x97f   : > { %v4533_v62 = vcombine.low %v4525_v21, %v4532_v36 }
 0x981   : > { %6522 = vmatmul.mubr.bf16.vlgmr.msra.gmra.mrb[52].mxu0 %v4355_v31 }
 0x982   : > { %6525 = vmatprep.mubr.bf16.mxu0 %v4444_v4 }
 0x989   : > { %6526 = vmatmul.mubr.bf16.gmra.mrb[56].mxu0 %v4533_v62 }
 0x9e8   : > { %v6217_v61 = vpop.f32.mrb[20].mxu1 }
 0x9e9   : > { %v6218_v22 = vpop.f32.mrb[21].mxu1 }
 0x9ea   : > { %v6219_v60 = vadd.f32 %v6218_v22, %v6217_v61  ;;  %v6220_v40 = vpop.f32.mrb[22].mxu1 }
 0x9eb   : > { %v6221_v19 = vpop.f32.mrb[23].mxu1 }
 0x9ec   : > { %v6222_v57 = vadd.f32 %v6221_v19, %v6220_v40 }
 0x9f0   : > { %v6223_v63 = vpop.f32.mrb[24].mxu1 }
 0x9f1   : > { %v6224_v49 = vpop.f32.mrb[25].mxu1 }
 0x9f2   : > { %v6225_v51 = vadd.f32 %v6224_v49, %v6223_v63  ;;  %v6226_v32 = vpop.f32.mrb[26].mxu1  ;;  %v6884_v63 = vld [vmem:[%s8007_s9 + $0x8] sm:$0xff]  }
 0x9f3   : > { %v6227_v33 = vpop.f32.mrb[27].mxu1 }
 0x9f4   : > { %v6228_v17 = vadd.f32 %v6227_v33, %v6226_v32 }
 0x9f7   : > { %v6177_v45 = vpop.f32.mrb[20].mxu0 }
 0x9f8   : > { %v6178_v48 = vpop.f32.mrb[21].mxu0 }
 0x9f9   : > { %v6179_v55 = vadd.f32 %v6178_v48, %v6177_v45  ;;  %v6180_v15 = vpop.f32.mrb[22].mxu0 }
 0x9fa   : > { %v6181_v3 = vpop.f32.mrb[23].mxu0 }
 0x9fb   : > { %v5037_v58 = vadd.f32 %v6179_v55, %v5971_v20  ;;  %v6182_v9 = vadd.f32 %v6181_v3, %v6180_v15  ;;  %v6885_v55 = vld [vmem:[%s8007_s9 + $0x10] sm:$0xff]  }
 0x9fc   : > { %v6229_v10 = vpop.f32.mrb[28].mxu1 }
 0x9fd   : > { %v5040_v46 = vadd.f32 %v6182_v9, %v5971_v20  ;;  %v6230_v28 = vpop.f32.mrb[29].mxu1  ;;  %v7873_v27 = vadd.f32 %v6219_v60, %v5037_v58 }
 0x9fe   : > { %v6231_v53 = vadd.f32 %v6230_v28, %v6229_v10  ;;  %v6232_v44 = vpop.f32.mrb[30].mxu1 }
 0x9ff   : > { %v6183_v16 = vpop.f32.mrb[24].mxu0  ;;  %v6233_v1 = vpop.f32.mrb[31].mxu1  ;;  %v5105_v30 = vadd.f32 %v6222_v57, %v5040_v46  ;;  %v6883_v57 = vld [vmem:[%s8007_s9] sm:$0xff]  }
 0xa00   : > { %v6184_v14 = vpop.f32.mrb[25].mxu0  ;;  %v6234_v54 = vadd.f32 %v6233_v1, %v6232_v44  ;;  %6529 = vmatprep.subr.bf16.mxu1 %v6883_v57 }
 0xa01   : > { %v6185_v23 = vadd.f32 %v6184_v14, %v6183_v16  ;;  %v6186_v6 = vpop.f32.mrb[26].mxu0  ;;  %6530 = vmatpush3.bf16.msra.mxu1 %v6883_v57  ;;  %v6887_v16 = vld [vmem:[%s8007_s9 + $0x20] sm:$0xff]  }
 0xa02   : > { %v6187_v7 = vpop.f32.mrb[27].mxu0  ;;  %6531 = vmatprep.subr.bf16.mxu1 %v6884_v63 }
 0xa03   : > { %v5045_v37 = vadd.f32 %v6185_v23, %v5971_v20  ;;  %v6188_v47 = vadd.f32 %v6187_v7, %v6186_v6  ;;  %v6888_v23 = vld [vmem:[%s8007_s9 + $0x28] sm:$0xff]  }
 0xa05   : > { %v5048_v29 = vadd.f32 %v6188_v47, %v5971_v20  ;;  %v7875_v2 = vadd.f32 %v6225_v51, %v5045_v37  ;;  %6532 = vmatpush3.bf16.msra.mxu1 %v6884_v63 }
 0xa06   : > { %6533 = vmatprep.subr.bf16.mxu1 %v6885_v55 }
 0xa07   : > { %v6189_v59 = vpop.f32.mrb[28].mxu0  ;;  %v7877_v43 = vadd.f32 %v6228_v17, %v5048_v29 }
 0xa08   : > { %v6190_v25 = vpop.f32.mrb[29].mxu0  ;;  %v6235_v35 = vpop.f32.mrb[32].mxu1 }
 0xa09   : > { %v6191_v18 = vadd.f32 %v6190_v25, %v6189_v59  ;;  %v6192_v24 = vpop.f32.mrb[30].mxu0  ;;  %v6236_v8 = vpop.f32.mrb[33].mxu1  ;;  %6534 = vmatpush3.bf16.msra.mxu1 %v6885_v55  ;;  %v6890_v25 = vld [vmem:[%s8007_s9 + $0x38] sm:$0xff]  }
 0xa0a   : > { %v6193_v52 = vpop.f32.mrb[31].mxu0  ;;  %v6237_v11 = vadd.f32 %v6236_v8, %v6235_v35  ;;  %v6238_v38 = vpop.f32.mrb[34].mxu1 }
 0xa0b   : > { %v5053_v12 = vadd.f32 %v6191_v18, %v5971_v20  ;;  %v6194_v26 = vadd.f32 %v6193_v52, %v6192_v24  ;;  %v6239_v31 = vpop.f32.mrb[35].mxu1 }
 0xa0c   : > { %v6240_v34 = vadd.f32 %v6239_v31, %v6238_v38 }
 0xa0d   : > { %v5056_v0 = vadd.f32 %v6194_v26, %v5971_v20  ;;  %v7879_v4 = vadd.f32 %v6231_v53, %v5053_v12 }
 0xa0f   : > { %v7881_v21 = vadd.f32 %v6234_v54, %v5056_v0 }
 0xa11   : > { %v6195_v36 = vpop.f32.mrb[32].mxu0 }
 0xa12   : > { %v6196_v62 = vpop.f32.mrb[33].mxu0 }
 0xa13   : > { %v6197_v61 = vadd.f32 %v6196_v62, %v6195_v36  ;;  %v6198_v22 = vpop.f32.mrb[34].mxu0 }
 0xa14   : > { %v6199_v60 = vpop.f32.mrb[35].mxu0 }
 0xa15   : > { %v5061_v40 = vadd.f32 %v6197_v61, %v5971_v20  ;;  %v6200_v19 = vadd.f32 %v6199_v60, %v6198_v22 }
 0xa17   : > { %v5064_v49 = vadd.f32 %v6200_v19, %v5971_v20  ;;  %v7889_v51 = vadd.f32 %v6237_v11, %v5061_v40  ;;  %v6297_v32 = vpop.f32.mrb[36].mxu1  ;;  %v6886_v20 = vld [vmem:[%s8007_s9 + $0x18] sm:$0xff]  }
 0xa18   : > { %v6298_v33 = vpop.f32.mrb[37].mxu1  ;;  %6535 = vmatprep.subr.bf16.mxu1 %v6886_v20 }
 0xa19   : > { %v7891_v17 = vadd.f32 %v6240_v34, %v5064_v49  ;;  %v6299_v45 = vadd.f32 %v6298_v33, %v6297_v32  ;;  %v6300_v48 = vpop.f32.mrb[38].mxu1  ;;  %6536 = vmatpush3.bf16.msra.mxu1 %v6886_v20 }
 0xa1a   : > { %v6301_v15 = vpop.f32.mrb[39].mxu1  ;;  %6537 = vmatprep.subr.bf16.mxu1 %v6887_v16 }
 0xa1b   : > { %v6302_v3 = vadd.f32 %v6301_v15, %v6300_v48 }
 0xa1d   : > { %v6257_v58 = vpop.f32.mrb[36].mxu0  ;;  %6538 = vmatpush3.bf16.msra.mxu1 %v6887_v16 }
 0xa1e   : > { %v6258_v9 = vpop.f32.mrb[37].mxu0  ;;  %6539 = vmatprep.subr.bf16.mxu1 %v6888_v23 }
 0xa1f   : > { %v6259_v10 = vadd.f32 %v6258_v9, %v6257_v58  ;;  %v6260_v46 = vpop.f32.mrb[38].mxu0 }
 0xa20   : > { %v6261_v28 = vpop.f32.mrb[39].mxu0 }
 0xa21   : > { %v5167_v53 = vadd.f32 %v6259_v10, %v7873_v27  ;;  %v6262_v44 = vadd.f32 %v6261_v28, %v6260_v46  ;;  %6540 = vmatpush3.bf16.msra.mxu1 %v6888_v23 }
 0xa23   : > { %v5170_v1 = vadd.f32 %v6262_v44, %v5105_v30  ;;  %v7903_v14 = vadd.f32 %v6299_v45, %v5167_v53  ;;  %v6889_v30 = vld [vmem:[%s8007_s9 + $0x30] sm:$0xff]  }
 0xa24   : > { %6541 = vmatprep.subr.bf16.mxu1 %v6889_v30 }
 0xa25   : > { %v7905_v54 = vadd.f32 %v6302_v3, %v5170_v1  ;;  %6542 = vmatpush3.bf16.msra.mxu1 %v6889_v30 }
 0xa26   : > { %v6303_v6 = vpop.f32.mrb[40].mxu1  ;;  %6543 = vmatprep.subr.bf16.mxu1 %v6890_v25 }
 0xa27   : > { %v6304_v7 = vpop.f32.mrb[41].mxu1 }
 0xa28   : > { %v6305_v27 = vadd.f32 %v6304_v7, %v6303_v6  ;;  %v6306_v37 = vpop.f32.mrb[42].mxu1 }
 0xa29   : > { %v6307_v47 = vpop.f32.mrb[43].mxu1  ;;  %6544 = vmatpush3.bf16.msra.mxu1 %v6890_v25 }
 0xa2a   : > { %v6308_v29 = vadd.f32 %v6307_v47, %v6306_v37 }
 0xa2d   : > { %v6263_v59 = vpop.f32.mrb[40].mxu0 }
 0xa2e   : > { %v6264_v35 = vpop.f32.mrb[41].mxu0 }
 0xa2f   : > { %v6265_v18 = vadd.f32 %v6264_v35, %v6263_v59  ;;  %v6266_v24 = vpop.f32.mrb[42].mxu0 }
 0xa30   : > { %v6267_v8 = vpop.f32.mrb[43].mxu0 }
 0xa31   : > { %v5175_v52 = vadd.f32 %v6265_v18, %v7875_v2  ;;  %v6268_v11 = vadd.f32 %v6267_v8, %v6266_v24 }
 0xa33   : > { %v5178_v38 = vadd.f32 %v6268_v11, %v7877_v43  ;;  %v5240_v12 = vadd.f32 %v6305_v27, %v5175_v52 }
 0xa35   : > { %v5243_v31 = vadd.f32 %v6308_v29, %v5178_v38 }
 0xa36   : > { %v6309_v26 = vpop.f32.mrb[44].mxu1 }
 0xa37   : > { %v6310_v34 = vpop.f32.mrb[45].mxu1 }
 0xa38   : > { %v6311_v0 = vadd.f32 %v6310_v34, %v6309_v26  ;;  %v6312_v36 = vpop.f32.mrb[46].mxu1 }
 0xa39   : > { %v6313_v62 = vpop.f32.mrb[47].mxu1 }
 0xa3a   : > { %v6314_v61 = vadd.f32 %v6313_v62, %v6312_v36 }
 0xa3d   : > { %v6269_v22 = vpop.f32.mrb[44].mxu0 }
 0xa3e   : > { %v6270_v60 = vpop.f32.mrb[45].mxu0 }
 0xa3f   : > { %v6271_v40 = vadd.f32 %v6270_v60, %v6269_v22  ;;  %v6272_v19 = vpop.f32.mrb[46].mxu0 }
 0xa40   : > { %v6273_v57 = vpop.f32.mrb[47].mxu0 }
 0xa41   : > { %v5183_v2 = vadd.f32 %v6271_v40, %v7879_v4  ;;  %v6274_v63 = vadd.f32 %v6273_v57, %v6272_v19 }
 0xa43   : > { %v5186_v49 = vadd.f32 %v6274_v63, %v7881_v21  ;;  %v5248_v43 = vadd.f32 %v6311_v0, %v5183_v2 }
 0xa44   : > { %v6315_v32 = vpop.f32.mrb[48].mxu1 }
 0xa45   : > { %v6316_v33 = vpop.f32.mrb[49].mxu1  ;;  %v5251_v45 = vadd.f32 %v6314_v61, %v5186_v49 }
 0xa46   : > { %v6317_v48 = vadd.f32 %v6316_v33, %v6315_v32  ;;  %v6318_v55 = vpop.f32.mrb[50].mxu1 }
 0xa47   : > { %v6319_v15 = vpop.f32.mrb[51].mxu1 }
 0xa48   : > { %v6320_v3 = vadd.f32 %v6319_v15, %v6318_v55 }
 0xa4c   : > { %v6275_v58 = vpop.f32.mrb[48].mxu0 }
 0xa4d   : > { %v6276_v20 = vpop.f32.mrb[49].mxu0 }
 0xa4e   : > { %v6277_v9 = vadd.f32 %v6276_v20, %v6275_v58  ;;  %v6278_v10 = vpop.f32.mrb[50].mxu0 }
 0xa4f   : > { %v6279_v46 = vpop.f32.mrb[51].mxu0 }
 0xa50   : > { %v5191_v28 = vadd.f32 %v6277_v9, %v7889_v51  ;;  %v6280_v53 = vadd.f32 %v6279_v46, %v6278_v10 }
 0xa52   : > { %v5194_v4 = vadd.f32 %v6280_v53, %v7891_v17  ;;  %v5256_v44 = vadd.f32 %v6317_v48, %v5191_v28 }
 0xa54   : > { %v6523_v21 = vpop.f32.mrb[52].mxu0  ;;  %v5259_v16 = vadd.f32 %v6320_v3, %v5194_v4 }
 0xa55   : > { %v5305_v1 = vadd.f32 %v6523_v21, %v5240_v12  ;;  %v5296_v23 = vpop.f32.mrb[53].mxu0 }
 0xa56   : > { %v5297_v6 = vadd.f32 %v5296_v23, %v7903_v14  ;;  %v6524_v7 = vpop.f32.mrb[54].mxu0 }
 0xa57   : > { %v5308_v27 = vadd.f32 %v6524_v7, %v5243_v31  ;;  %v5299_v37 = vpop.f32.mrb[55].mxu0 }
 0xa58   : > { %v5300_v47 = vadd.f32 %v5299_v37, %v7905_v54 }
 0xa59   : > { %v5334_v30 = vadd.f32 %v5308_v27, %v5305_v1 }
 0xa5a   : > { %v5327_v29 = vadd.f32 %v5300_v47, %v5297_v6 }
 0xa5b   : > { %v5335_v59 = vrot.slane %v5334_v30, 4 }
 0xa5c   : > { %v5328_v25 = vrot.slane %v5327_v29, 4  ;;  %v6527_v51 = vpop.f32.mrb[56].mxu0 }
 0xa5d   : > { %v5336_v35 = vadd.f32 %v5335_v59, %v5334_v30  ;;  %v5321_v18 = vadd.f32 %v6527_v51, %v5256_v44  ;;  %v5312_v17 = vpop.f32.mrb[57].mxu0 }
 0xa5e   : > { %v5329_v24 = vadd.f32 %v5328_v25, %v5327_v29  ;;  %v5313_v8 = vadd.f32 %v5312_v17, %v5248_v43  ;;  %v6528_v52 = vpop.f32.mrb[58].mxu0 }
 0xa5f   : > { %v5337_v11 = vrot.slane %v5336_v35, 2  ;;  %v5324_v38 = vadd.f32 %v6528_v52, %v5259_v16  ;;  %v5315_v12 = vpop.f32.mrb[59].mxu0 }
 0xa60   : > { %v5330_v14 = vrot.slane %v5329_v24, 2  ;;  %v5316_v26 = vadd.f32 %v5315_v12, %v5251_v45 }
 0xa61   : > { %v5338_v31 = vadd.f32 %v5337_v11, %v5336_v35  ;;  %v5348_v34 = vadd.f32 %v5324_v38, %v5321_v18 }
 0xa62   : > { %v5331_v0 = vadd.f32 %v5330_v14, %v5329_v24  ;;  %v5341_v54 = vadd.f32 %v5316_v26, %v5313_v8 }
 0xa63   : > { %v5339_v36 = vrot.slane %v5338_v31, 1  ;;  %v5349_v62 = vrot.slane %v5348_v34, 4 }
 0xa64   : > { %v5332_v61 = vrot.slane %v5331_v0, 1  ;;  %v5342_v22 = vrot.slane %v5341_v54, 4 }
 0xa65   : > { %v5340_v60 = vadd.f32 %v5339_v36, %v5338_v31  ;;  %v5350_v40 = vadd.f32 %v5349_v62, %v5348_v34 }
 0xa66   : > { %v5333_v19 = vadd.f32 %v5332_v61, %v5331_v0  ;;  %v5343_v57 = vadd.f32 %v5342_v22, %v5341_v54 }
 0xa67   : > { %v5356_v2 = vmul.f32 0.0625, %v5340_v60  ;;  %v5351_v63 = vrot.slane %v5350_v40, 2 }
 0xa68   : > { %v5355_v49 = vmul.f32 0.0625, %v5333_v19  ;;  %v5344_v43 = vrot.slane %v5343_v57, 2 }
 0xa69   : > { %v7924_v32 = vsub.f32 %v5305_v1, %v5356_v2  ;;  %v7926_v33 = vsub.f32 %v5308_v27, %v5356_v2  ;;  %v5352_v45 = vadd.f32 %v5351_v63, %v5350_v40 }
 0xa6a   : > { %v7928_v48 = vsub.f32 %v5297_v6, %v5355_v49  ;;  %v7930_v55 = vsub.f32 %v5300_v47, %v5355_v49  ;;  %v5345_v15 = vadd.f32 %v5344_v43, %v5343_v57 }
 0xa6b   : > { %v5369_v3 = vmul.f32 %v7924_v32, %v7924_v32  ;;  %v5370_v58 = vmul.f32 %v7926_v33, %v7926_v33  ;;  %v5353_v20 = vrot.slane %v5352_v45, 1 }
 0xa6c   : > { %v5367_v9 = vmul.f32 %v7928_v48, %v7928_v48  ;;  %v5368_v10 = vmul.f32 %v7930_v55, %v7930_v55  ;;  %v5346_v46 = vrot.slane %v5345_v15, 1 }
 0xa6d   : > { %v5382_v28 = vadd.f32 %v5370_v58, %v5369_v3  ;;  %v5354_v53 = vadd.f32 %v5353_v20, %v5352_v45 }
 0xa6e   : > { %v5375_v4 = vadd.f32 %v5368_v10, %v5367_v9  ;;  %v5347_v44 = vadd.f32 %v5346_v46, %v5345_v15 }
 0xa6f   : > { %v5383_v21 = vrot.slane %v5382_v28, 4  ;;  %v5358_v16 = vmul.f32 0.0625, %v5354_v53 }
 0xa70   : > { %v5376_v1 = vrot.slane %v5375_v4, 4  ;;  %v5357_v23 = vmul.f32 0.0625, %v5347_v44 }
 0xa71   : > { %v5384_v6 = vadd.f32 %v5383_v21, %v5382_v28  ;;  %v7940_v7 = vsub.f32 %v5321_v18, %v5358_v16  ;;  %v7942_v27 = vsub.f32 %v5324_v38, %v5358_v16 }
 0xa72   : > { %v5377_v37 = vadd.f32 %v5376_v1, %v5375_v4  ;;  %v7944_v47 = vsub.f32 %v5313_v8, %v5357_v23  ;;  %v7946_v30 = vsub.f32 %v5316_v26, %v5357_v23  ;;  %v6909_v8 = vld [vmem:[%s8003_s5] sm:$0xf] }
 0xa73   : > { %v5385_v29 = vrot.slane %v5384_v6, 2  ;;  %v5373_v59 = vmul.f32 %v7940_v7, %v7940_v7  ;;  %v5374_v25 = vmul.f32 %v7942_v27, %v7942_v27  ;;  %v1523_v52 = vrot.slane %v6909_v8, %v515_v41 }
 0xa74   : > { %v5378_v51 = vrot.slane %v5377_v37, 2  ;;  %v5371_v35 = vmul.f32 %v7944_v47, %v7944_v47  ;;  %v5372_v18 = vmul.f32 %v7946_v30, %v7946_v30  ;;  %v1527_v26 = vrot.slane %v6909_v8, %v519_v42 }
 0xa75   : > { %v5386_v17 = vadd.f32 %v5385_v29, %v5384_v6  ;;  %v5396_v24 = vadd.f32 %v5374_v25, %v5373_v59  ;;  %v1768_v36 = vadd.f32 %v7470_v50, %v1523_v52 }
 0xa76   : > { %v5379_v11 = vadd.f32 %v5378_v51, %v5377_v37  ;;  %v5389_v38 = vadd.f32 %v5372_v18, %v5371_v35  ;;  %v1770_v40 = vadd.f32 %v7473_v56, %v1527_v26 }
 0xa77   : > { %v5387_v12 = vrot.slane %v5386_v17, 1  ;;  %v5397_v14 = vrot.slane %v5396_v24, 4  ;;  %v1831_v63 = vrot.slane %v1768_v36, %v7222_v13 }
 0xa78   : > { %v5380_v31 = vrot.slane %v5379_v11, 1  ;;  %v5390_v34 = vrot.slane %v5389_v38, 4  ;;  %v1856_v43 = vrot.slane %v1770_v40, %v7222_v13 }
 0xa79   : > { %v5388_v0 = vadd.f32 %v5387_v12, %v5386_v17  ;;  %v5398_v54 = vadd.f32 %v5397_v14, %v5396_v24  ;;  %v1832_v15 = vcombine.high %v1831_v63, %v1831_v63  ;;  %v1839_v28 = vrot.slane %v1831_v63, %v7222_v13 }
 0xa7a   : > { %v5381_v62 = vadd.f32 %v5380_v31, %v5379_v11  ;;  %v5391_v61 = vadd.f32 %v5390_v34, %v5389_v38  ;;  %v1857_v20 = vcombine.high %v1856_v43, %v1856_v43  ;;  %v1864_v44 = vrot.slane %v1856_v43, %v7222_v13 }
 0xa7b   : > { %v5404_v22 = vmul.f32 0.0625, %v5388_v0  ;;  %v5399_v60 = vrot.slane %v5398_v54, 2  ;;  %v1846_v10 = vrot.slane %v1832_v15, %v7222_v13  ;;  %v5426_v6 = vrot.slane %v1839_v28, %v7248_v39 }
 0xa7c   : > { %v5403_v41 = vmul.f32 0.0625, %v5381_v62  ;;  %v5392_v19 = vrot.slane %v5391_v61, 2  ;;  %v1871_v53 = vrot.slane %v1857_v20, %v7222_v13  ;;  %v1847_v59 = vcombine.high %v1839_v28, %v1839_v28 }
 0xa7d   : > { %v5408_v57 = vadd.f32 1e-05, %v5404_v22  ;;  %v5400_v2 = vadd.f32 %v5399_v60, %v5398_v54  ;;  %v5430_v23 = vrot.slane %v1846_v10, %v7248_v39  ;;  %v1848_v18 = vcombine.high %v1846_v10, %v1846_v10 }
 0xa7e   : > { %v5407_v5 = vadd.f32 1e-05, %v5403_v41  ;;  %v5393_v42 = vadd.f32 %v5392_v19, %v5391_v61  ;;  %v5458_v25 = vrot.slane %v1871_v53, %v7248_v39  ;;  %v5454_v13 = vrot.slane %v1864_v44, %v7248_v39 }
 0xa7f   : > { %6901 = vrsqrt.f32 %v5408_v57  ;;  %v5401_v49 = vrot.slane %v5400_v2, 1  ;;  %v1872_v11 = vcombine.high %v1864_v44, %v1864_v44  ;;  %v1873_v38 = vcombine.high %v1871_v53, %v1871_v53 }
 0xa80   : > { %6903 = vrsqrt.f32 %v5407_v5  ;;  %v5394_v50 = vrot.slane %v5393_v42, 1  ;;  %v5434_v26 = vrot.slane %v1847_v59, %v7248_v39 }
 0xa81   : > { %v5402_v45 = vadd.f32 %v5401_v49, %v5400_v2  ;;  %v5466_v63 = vrot.slane %v1873_v38, %v7248_v39  ;;  %v5462_v5 = vrot.slane %v1872_v11, %v7248_v39 }
 0xa82   : > { %v5395_v3 = vadd.f32 %v5394_v50, %v5393_v42 }
 0xa83   : > { %v5406_v58 = vmul.f32 0.0625, %v5402_v45 }
 0xa84   : > { %v5405_v56 = vmul.f32 0.0625, %v5395_v3 }
 0xa85   : > { %v5410_v9 = vadd.f32 1e-05, %v5406_v58 }
 0xa86   : > { %v5409_v46 = vadd.f32 1e-05, %v5405_v56 }
 0xa87   : > { %6905 = vrsqrt.f32 %v5410_v9 }
 0xa88   : > { %6907 = vrsqrt.f32 %v5409_v46  ;;  %v6076_v46 = vld [vmem:[%s8008_s10] ss:$0 sm:$0xff] }
 0xa89   : > { %v6902_v4 = vpop.eup %6901 }
 0xa8a   : > { %v6904_v21 = vpop.eup %6903  ;;  %v5417_v16 = vmul.f32 %v6902_v4, %v7924_v32  ;;  %v5418_v1 = vmul.f32 %v6902_v4, %v7926_v33 }
 0xa8b   : > { %v5415_v37 = vmul.f32 %v6904_v21, %v7928_v48  ;;  %v5416_v29 = vmul.f32 %v6904_v21, %v7930_v55  ;;  %v5438_v55 = vrot.slane %v1848_v18, %v7248_v39 }
 0xa8c   : > { %v5445_v51 = vmul.f32 %v5430_v23, %v5417_v16  ;;  %v5446_v35 = vmul.f32 %v5430_v23, %v5418_v1 }
 0xa8d   : > { %v5444_v17 = vmul.f32 %v5426_v6, %v5416_v29  ;;  %v5443_v32 = vmul.f32 %v5426_v6, %v5415_v37 }
 0xa8e   : > { %v5473_v24 = vadd.f32 %v5458_v25, %v5445_v51  ;;  %v5474_v33 = vadd.f32 %v5458_v25, %v5446_v35 }
 0xa8f   : > { %v5471_v8 = vadd.f32 %v5454_v13, %v5443_v32  ;;  %v5472_v52 = vadd.f32 %v5454_v13, %v5444_v17 }
 0xa90   : > { %v5481_v12 = vmul.f32 0.2, %v5473_v24  ;;  %v5482_v48 = vmul.f32 0.2, %v5474_v33 }
 0xa91   : > { %v6906_v14 = vpop.eup %6905  ;;  %v5479_v31 = vmul.f32 0.2, %v5471_v8  ;;  %v5480_v34 = vmul.f32 0.2, %v5472_v52 }
 0xa92   : > { %v6908_v0 = vpop.eup %6907  ;;  %v5490_v54 = vmax.f32 %v5474_v33, %v5482_v48  ;;  %v5421_v36 = vmul.f32 %v6906_v14, %v7940_v7  ;;  %v5422_v62 = vmul.f32 %v6906_v14, %v7942_v27  ;;  %v5489_v61 = vmax.f32 %v5473_v24, %v5481_v12 }
 0xa93   : > { %v5419_v22 = vmul.f32 %v6908_v0, %v7944_v47  ;;  %v5420_v60 = vmul.f32 %v6908_v0, %v7946_v30  ;;  %v5487_v40 = vmax.f32 %v5471_v8, %v5479_v31  ;;  %v5488_v41 = vmax.f32 %v5472_v52, %v5480_v34 }
 0xa94   : > { %v5450_v19 = vmul.f32 %v5438_v55, %v5422_v62  ;;  %v5496_v57 = vpack.c.bf16 %v5490_v54, %v5489_v61  ;;  %v5449_v2 = vmul.f32 %v5438_v55, %v5421_v36 }
 0xa95   : > { %v5448_v42 = vmul.f32 %v5434_v26, %v5420_v60  ;;  %v5495_v49 = vpack.c.bf16 %v5488_v41, %v5487_v40  ;;  %v5447_v43 = vmul.f32 %v5434_v26, %v5419_v22 }
 0xa96   : > { %v5477_v7 = vadd.f32 %v5466_v63, %v5449_v2  ;;  %v5478_v50 = vadd.f32 %v5466_v63, %v5450_v19 }
 0xa97   : > { %6545 = vmatprep.mubr.bf16.mxu1 %v5495_v49  ;;  %v5475_v27 = vadd.f32 %v5462_v5, %v5447_v43  ;;  %v5476_v45 = vadd.f32 %v5462_v5, %v5448_v42 }
 0xa98   : > { %6546 = vmatmul.mubr.bf16.vlgmr.msra.gmra.mrb[52].mxu1 %v5496_v57  ;;  %v5485_v47 = vmul.f32 0.2, %v5477_v7  ;;  %v5486_v30 = vmul.f32 0.2, %v5478_v50 }
 0xa99   : > { %v5483_v15 = vmul.f32 0.2, %v5475_v27  ;;  %v5484_v3 = vmul.f32 0.2, %v5476_v45 }
 0xa9a   : > { %v5493_v58 = vmax.f32 %v5477_v7, %v5485_v47  ;;  %v5494_v20 = vmax.f32 %v5478_v50, %v5486_v30 }
 0xa9b   : > { %v5491_v56 = vmax.f32 %v5475_v27, %v5483_v15  ;;  %v5492_v9 = vmax.f32 %v5476_v45, %v5484_v3 }
 0xa9c   : > { %v5498_v10 = vpack.c.bf16 %v5494_v20, %v5493_v58 }
 0xa9d   : > { %v5497_v39 = vpack.c.bf16 %v5492_v9, %v5491_v56 }
 0xa9f   : > { %6549 = vmatprep.mubr.bf16.mxu1 %v5497_v39 }
 0xaa0   : > { %6550 = vmatmul.mubr.bf16.gmra.mrb[56].mxu1 %v5498_v10 }
 0xb6b   : > { %v6547_v28 = vpop.f32.mrb[52].mxu1 }
 0xb6c   : > { %v5604_v53 = vpop.f32.mrb[53].mxu1  ;;  %v5613_v21 = vadd.f32 %v6547_v28, %v6076_v46 }
 0xb6d   : > { %v5605_v4 = vadd.f32 %v6076_v46, %v5604_v53  ;;  %v6548_v44 = vpop.f32.mrb[54].mxu1 }
 0xb6e   : > { %v5607_v16 = vpop.f32.mrb[55].mxu1  ;;  %5637 = vst [vmem:[%s456_s27 + $0x10] sm:$0xff] %v5613_v21  ;;  %v5616_v23 = vadd.f32 %v6548_v44, %v6076_v46 }
 0xb6f   : > { %5635 = vst [vmem:[%s456_s27] sm:$0xff] %v5605_v4  ;;  %v5608_v1 = vadd.f32 %v6076_v46, %v5607_v16 }
 0xb70   : > { %5638 = vst [vmem:[%s456_s27 + $0x18] sm:$0xff] %v5616_v23 }
 0xb71   : > { %5636 = vst [vmem:[%s456_s27 + $0x8] sm:$0xff] %v5608_v1 }
 0xb73   : > { %v6551_v6 = vpop.f32.mrb[56].mxu1 }
 0xb74   : > { %v5620_v37 = vpop.f32.mrb[57].mxu1  ;;  %v5629_v25 = vadd.f32 %v6551_v6, %v6076_v46 }
 0xb75   : > { %v5621_v29 = vadd.f32 %v6076_v46, %v5620_v37  ;;  %v6552_v59 = vpop.f32.mrb[58].mxu1 }
 0xb76   : > { %v5623_v51 = vpop.f32.mrb[59].mxu1  ;;  %5641 = vst [vmem:[%s456_s27 + $0x30] sm:$0xff] %v5629_v25  ;;  %v5632_v18 = vadd.f32 %v6552_v59, %v6076_v46 }
 0xb77   : > { %5639 = vst [vmem:[%s456_s27 + $0x20] sm:$0xff] %v5621_v29  ;;  %v5624_v35 = vadd.f32 %v6076_v46, %v5623_v51 }
 0xb78   : > { %5642 = vst [vmem:[%s456_s27 + $0x38] sm:$0xff] %v5632_v18 }
 0xb79   : > { %5640 = vst [vmem:[%s456_s27 + $0x28] sm:$0xff] %v5624_v35 }
 0xb7a PF: > { %s23_s17 = sadd.s32 1, %s7008_s17  }
 0xb7b   : > { %p20_p3 = scmp.ge.s32.totalorder %s23_s17, 4  }
 0xb7d   :  { %22 = sbr.rel (!%p20_p3) target bundleno = 2 (0x2), region = 126 }
 0xb84   :  { %5667 = vsyncpa [#allocation4], 1 }
 0xb85   :  { %5669 = vsyncpa [#allocation4 + $0x1], 1 }
 0xb86   :  { %5670 = vsyncpa [#allocation6], 1 }

</bundles_post_ra>
